<compile_context>
chip_gen: v5e
topology: v5e:2x2
jax: 0.10.0
libtpu: 0.0.40
codegen_flags: <defaults>
</compile_context>

<pallas_src>
import functools

import jax
import jax.numpy as jnp
from jax.experimental import pallas as pl
from jax.experimental.pallas import tpu as pltpu

NEG_SLOPE = 0.01   # F.leaky_relu default
BN_EPS = 1e-5      # nn.BatchNorm1d default


def _leaky_relu(x):
    # max(x, 0.01*x) == leaky_relu for slope < 1: one mul + one max on the VPU.
    return jnp.maximum(x, NEG_SLOPE * x)


def _bn_train(x, gamma, beta):
    """Training-mode BatchNorm1d, fused single pass (f32).

    sum and sum-of-squares are computed with ONE cross-sublane (axis=0)
    reduction over a lane-concatenated [x | x*x] block (halves XLU reduction
    traffic vs two separate axis-0 sums); the affine is folded so the
    per-element apply is a single FMA: x*scale + shift.  Variance is clamped
    at 0 to avoid NaNs from f32 cancellation.
    """
    n, c = x.shape
    inv_n = 1.0 / n
    both = jnp.concatenate([x, x * x], axis=1)                  # (n, 2c)
    s = jnp.sum(both, axis=0, keepdims=True) * inv_n            # (1, 2c)
    mean = s[:, :c]
    var = jnp.maximum(s[:, c:] - mean * mean, 0.0)
    scale = gamma * jax.lax.rsqrt(var + BN_EPS)                 # rsqrt -> EUP slot
    shift = beta - mean * scale
    return x * scale + shift


def model_kernel(B, T,
                 x_ref, w1_ref, w2_ref, wf1a_ref, wf1b_ref, wf2_ref, wf3_ref,
                 vec_ref, out_ref):
    x = x_ref[...]                       # (B*T, 128) bf16, lanes 41..127 zero
    vec = vec_ref[...]                   # (16, 512) f32 packed param slab

    b1, g1, be1 = vec[0:1, :128], vec[1:2, :128], vec[2:3, :128]
    b2, g2, be2 = vec[3:4, :256], vec[4:5, :256], vec[5:6, :256]
    bf1, g3, be3 = vec[6:7, :], vec[7:8, :], vec[8:9, :]
    bf2, g4, be4 = vec[9:10, :], vec[10:11, :], vec[11:12, :]
    bf3 = vec[12:13, :]

    # h1 = bn1(leaky_relu(l1(h0)))  — bf16 MXU inputs, f32 accumulate, f32 BN
    h1 = jnp.dot(x, w1_ref[...], preferred_element_type=jnp.float32) + b1
    h1 = _bn_train(_leaky_relu(h1), g1, be1)                     # (B*T, 128) f32
    # TODO(synk): for large B*T, fold bn1's runtime scale/shift into w2/b2
    # (one (1,128)@(128,256) matmul + weight prep) instead of the per-row FMA
    # above; not profitable at small M, and NOT valid for bn2 (max-pooling
    # does not commute with possibly-negative gamma).

    # h2 = bn2(leaky_relu(l2(h1)))
    h2 = jnp.dot(h1.astype(jnp.bfloat16), w2_ref[...],
                 preferred_element_type=jnp.float32) + b2
    h2 = _bn_train(_leaky_relu(h2), g2, be2)                     # (B*T, 256) f32

    # Pooling over T.  When T % 8 == 0 the (B, T, 256) view keeps the f32
    # sublane axis aligned and the reduction is a single clean XLU pass.
    if T % 8 == 0:
        h3 = h2.reshape(B, T, 256)
        h_sum = jnp.sum(h3, axis=1)                              # (B, 256)
        h_max = jnp.max(h3, axis=1)                              # (B, 256)
    else:
        # Fallback: static per-sequence slices (B, T are Python ints) to avoid
        # a misaligned-sublane relayout of the whole (B*T, 256) buffer.
        h_sum = jnp.concatenate(
            [jnp.sum(h2[b * T:(b + 1) * T], axis=0, keepdims=True)
             for b in range(B)], axis=0)
        h_max = jnp.concatenate(
            [jnp.max(h2[b * T:(b + 1) * T], axis=0, keepdims=True)
             for b in range(B)], axis=0)

    # j1 = bn3(leaky_relu(f1(cat(h_sum, h_max))))
    # The lane-dim concat is replaced by a split-weight accumulate:
    #   [h_sum | h_max] @ wf1 == h_sum @ wf1[:256] + h_max @ wf1[256:]
    j1 = (jnp.dot(h_sum.astype(jnp.bfloat16), wf1a_ref[...],
                  preferred_element_type=jnp.float32)
          + jnp.dot(h_max.astype(jnp.bfloat16), wf1b_ref[...],
                    preferred_element_type=jnp.float32)
          + bf1)
    j1 = _bn_train(_leaky_relu(j1), g3, be3)                     # (B, 512)

    # j2 = bn4(leaky_relu(f2(j1)))
    j2 = jnp.dot(j1.astype(jnp.bfloat16), wf2_ref[...],
                 preferred_element_type=jnp.float32) + bf2
    j2 = _bn_train(_leaky_relu(j2), g4, be4)                     # (B, 512)

    # j3 = f3(j2)
    out_ref[...] = jnp.dot(j2.astype(jnp.bfloat16), wf3_ref[...],
                           preferred_element_type=jnp.float32) + bf3


def init_params(key):
    """Deterministic f32 master params matching ModelMain.__init__ shapes.

    Weights are stored (in, out); importing real PyTorch Linear weights
    ((out, in)) requires a transpose, and wf1[:256]/wf1[256:] must correspond
    to the (sum, max) concat order.
    """
    ks = jax.random.split(key, 5)

    def lin(k, fan_in, fan_out):
        bound = 1.0 / (fan_in ** 0.5)
        kw, kb = jax.random.split(k)
        w = jax.random.uniform(kw, (fan_in, fan_out), jnp.float32, -bound, bound)
        b = jax.random.uniform(kb, (1, fan_out), jnp.float32, -bound, bound)
        return w, b

    p = {}
    p['w1'], p['b1'] = lin(ks[0], 41, 128)
    p['w2'], p['b2'] = lin(ks[1], 128, 256)
    p['wf1'], p['bf1'] = lin(ks[2], 512, 512)
    p['wf2'], p['bf2'] = lin(ks[3], 512, 512)
    p['wf3'], p['bf3'] = lin(ks[4], 512, 512)
    for i, c in zip((1, 2, 3, 4), (128, 256, 512, 512)):
        p[f'g{i}'] = jnp.ones((1, c), jnp.float32)     # BN weight init = 1
        p[f'be{i}'] = jnp.zeros((1, c), jnp.float32)   # BN bias init = 0
    return p


def prepare_params(p):
    """One-time (outside the step) weight prep: bf16 cast, 41->128 row pad of
    w1, split of wf1 (avoids the in-kernel lane concat), and packing of all 13
    tiny (1, C) bias/gamma/beta vectors into one (16, 512) f32 slab, so every
    call re-casts nothing and the kernel takes 8 operands instead of 20."""
    bf16 = lambda a: a.astype(jnp.bfloat16)
    w1p = jnp.zeros((128, 128), jnp.float32).at[:41, :].set(p['w1'])
    vec = jnp.zeros((16, 512), jnp.float32)
    rows = [('b1', 128), ('g1', 128), ('be1', 128),
            ('b2', 256), ('g2', 256), ('be2', 256),
            ('bf1', 512), ('g3', 512), ('be3', 512),
            ('bf2', 512), ('g4', 512), ('be4', 512),
            ('bf3', 512)]
    for r, (name, c) in enumerate(rows):
        vec = vec.at[r, :c].set(p[name][0])
    wf1 = p['wf1']
    return {
        'w1': bf16(w1p), 'w2': bf16(p['w2']),
        'wf1a': bf16(wf1[:256]), 'wf1b': bf16(wf1[256:]),
        'wf2': bf16(p['wf2']), 'wf3': bf16(p['wf3']),
        'vec': vec,
    }


def _forward_impl(x, kp):
    """x: (B, 41, T) float32, kp = prepare_params(...)  ->  (B, 512) float32."""
    B, C, T = x.shape
    assert C == 41
    M = B * T
    # Glue: transpose(1, 2).contiguous().view(-1, 41); pad the 41 feature
    # lanes to 128 once here (w1 is already row-padded at init) so the first
    # MXU operand is lane-dense, and downcast to bf16 (f32 accumulation inside
    # the kernel).
    x0 = jnp.transpose(x, (0, 2, 1)).reshape(M, C)
    x0 = jnp.pad(x0, ((0, 0), (0, 128 - C))).astype(jnp.bfloat16)

    args = [x0, kp['w1'], kp['w2'], kp['wf1a'], kp['wf1b'],
            kp['wf2'], kp['wf3'], kp['vec']]

    # Explicit scoped-VMEM budget: ~2 MiB of bf16 weights + a few KiB of live
    # activations per row, with headroom; capped at 56 MiB so it is safe on
    # v7x's 64 MiB physical VMEM (v5e/v6e have 128 MiB).
    est = 4 * 1024 * 1024 + M * 8 * 1024
    vmem_limit = int(min(56 * 1024 * 1024, max(8 * 1024 * 1024, est)))

    # TODO(synk): when B*T outgrows the single-block budget (~12-15K rows on
    # v7x), switch to a row-tiled two-pass grid: pass 1 accumulates bn1/bn2
    # sum/sumsq and per-sequence sum/max/min pooling partials into VMEM
    # scratch over a 512-1024-row 'parallel' axis (shards across v7x's 2 TCs
    # and restores BlockSpec double-buffering); pass 2 recomputes l1/l2 per
    # tile and applies normalize + f1/f2/f3 once.
    # TODO(synk): if this forward is called in a tight loop at small M, keep
    # the ~1.6 MiB of bf16 weights VMEM-resident across calls (P10 cross-call
    # prefetch) instead of re-DMAing them every invocation (largest win: v5e).
    out = pl.pallas_call(
        functools.partial(model_kernel, B, T),
        out_shape=jax.ShapeDtypeStruct((B, 512), jnp.float32),
        in_specs=[pl.BlockSpec(memory_space=pltpu.MemorySpace.VMEM)] * len(args),
        out_specs=pl.BlockSpec(memory_space=pltpu.MemorySpace.VMEM),
        compiler_params=pltpu.CompilerParams(vmem_limit_bytes=vmem_limit),
    )(*args)
    return out


# jit the whole step: the transpose/pad glue fuses into one program per shape
# and (because weights are pre-cast once) nothing but x moves per call.
model_main_forward = jax.jit(_forward_impl)


if __name__ == "__main__":
    key = jax.random.PRNGKey(0)
    k_x, k_p = jax.random.split(key)

    # NOTE: at B*T = 16 the MXU is badly underfilled (M << 128/256); this
    # model is launch/DMA-overhead bound at these shapes — batch more
    # sequences per call (M >= 128) to approach roofline on any generation.
    B, C, T = 2, 41, 8                      # small shapes consistent with forward
    x = jax.random.normal(k_x, (B, C, T), dtype=jnp.float32)
    params = init_params(k_p)
    kparams = prepare_params(params)        # one-time bf16 cast / pad / pack

    out = model_main_forward(x, kparams)
    out = jax.block_until_ready(out)
    assert out.shape == (B, 512) and out.dtype == jnp.float32
    print("KERNEL_OK")
</pallas_src>

<mosaic_0001>
module attributes {stable_mosaic.version = 11 : i64} {
  func.func @model_kernel(%arg0: memref<16x128xbf16, #tpu.memory_space<vmem>>, %arg1: memref<128x128xbf16, #tpu.memory_space<vmem>>, %arg2: memref<128x256xbf16, #tpu.memory_space<vmem>>, %arg3: memref<256x512xbf16, #tpu.memory_space<vmem>>, %arg4: memref<256x512xbf16, #tpu.memory_space<vmem>>, %arg5: memref<512x512xbf16, #tpu.memory_space<vmem>>, %arg6: memref<512x512xbf16, #tpu.memory_space<vmem>>, %arg7: memref<16x512xf32, #tpu.memory_space<vmem>>, %arg8: memref<2x512xf32, #tpu.memory_space<vmem>>) attributes {dimension_semantics = [], scalar_prefetch = 0 : i64, scratch_operands = 0 : i64, tpu.core_type = #tpu.core_type<tc>} {
    %c0 = arith.constant 0 : index
    %c0_0 = arith.constant 0 : index
    %0 = vector.load %arg0[%c0, %c0_0] : memref<16x128xbf16, #tpu.memory_space<vmem>>, vector<16x128xbf16>
    %c0_1 = arith.constant 0 : index
    %c0_2 = arith.constant 0 : index
    %1 = vector.load %arg7[%c0_1, %c0_2] : memref<16x512xf32, #tpu.memory_space<vmem>>, vector<16x512xf32>
    %2 = vector.extract_strided_slice %1 {offsets = [0, 0], sizes = [1, 128], strides = [1, 1]} : vector<16x512xf32> to vector<1x128xf32>
    %3 = vector.extract_strided_slice %1 {offsets = [1, 0], sizes = [1, 128], strides = [1, 1]} : vector<16x512xf32> to vector<1x128xf32>
    %4 = vector.extract_strided_slice %1 {offsets = [2, 0], sizes = [1, 128], strides = [1, 1]} : vector<16x512xf32> to vector<1x128xf32>
    %5 = vector.extract_strided_slice %1 {offsets = [3, 0], sizes = [1, 256], strides = [1, 1]} : vector<16x512xf32> to vector<1x256xf32>
    %6 = vector.extract_strided_slice %1 {offsets = [4, 0], sizes = [1, 256], strides = [1, 1]} : vector<16x512xf32> to vector<1x256xf32>
    %7 = vector.extract_strided_slice %1 {offsets = [5, 0], sizes = [1, 256], strides = [1, 1]} : vector<16x512xf32> to vector<1x256xf32>
    %8 = vector.extract_strided_slice %1 {offsets = [6, 0], sizes = [1, 512], strides = [1, 1]} : vector<16x512xf32> to vector<1x512xf32>
    %9 = vector.extract_strided_slice %1 {offsets = [7, 0], sizes = [1, 512], strides = [1, 1]} : vector<16x512xf32> to vector<1x512xf32>
    %10 = vector.extract_strided_slice %1 {offsets = [8, 0], sizes = [1, 512], strides = [1, 1]} : vector<16x512xf32> to vector<1x512xf32>
    %11 = vector.extract_strided_slice %1 {offsets = [9, 0], sizes = [1, 512], strides = [1, 1]} : vector<16x512xf32> to vector<1x512xf32>
    %12 = vector.extract_strided_slice %1 {offsets = [10, 0], sizes = [1, 512], strides = [1, 1]} : vector<16x512xf32> to vector<1x512xf32>
    %13 = vector.extract_strided_slice %1 {offsets = [11, 0], sizes = [1, 512], strides = [1, 1]} : vector<16x512xf32> to vector<1x512xf32>
    %14 = vector.extract_strided_slice %1 {offsets = [12, 0], sizes = [1, 512], strides = [1, 1]} : vector<16x512xf32> to vector<1x512xf32>
    %c0_3 = arith.constant 0 : index
    %c0_4 = arith.constant 0 : index
    %15 = vector.load %arg1[%c0_3, %c0_4] : memref<128x128xbf16, #tpu.memory_space<vmem>>, vector<128x128xbf16>
    %cst = arith.constant dense<0.000000e+00> : vector<16x128xf32>
    %16 = tpu.matmul %0, %15, %cst {dimension_numbers = #tpu.dot_dimension_numbers<[1], [0], [0], [1], [0, 0, 1, 1], [], []>} : vector<16x128xbf16>, vector<128x128xbf16>, vector<16x128xf32> -> vector<16x128xf32>
    %17 = vector.broadcast %2 : vector<1x128xf32> to vector<16x128xf32>
    %18 = arith.addf %16, %17 : vector<16x128xf32>
    %cst_5 = arith.constant 0.00999999977 : f32
    %19 = vector.broadcast %cst_5 : f32 to vector<16x128xf32>
    %20 = arith.mulf %19, %18 : vector<16x128xf32>
    %21 = arith.maximumf %18, %20 : vector<16x128xf32>
    %22 = arith.mulf %21, %21 : vector<16x128xf32>
    %23 = tpu.concatenate %21, %22 in 1 : vector<16x128xf32>, vector<16x128xf32> -> vector<16x256xf32>
    %cst_6 = arith.constant dense<0.000000e+00> : vector<256xf32>
    %24 = vector.multi_reduction <add>, %23, %cst_6 [0] : vector<16x256xf32> to vector<256xf32>
    %25 = vector.shape_cast %24 : vector<256xf32> to vector<1x256xf32>
    %cst_7 = arith.constant 6.250000e-02 : f32
    %26 = vector.broadcast %cst_7 : f32 to vector<1x256xf32>
    %27 = arith.mulf %25, %26 : vector<1x256xf32>
    %28 = vector.extract_strided_slice %27 {offsets = [0, 0], sizes = [1, 128], strides = [1, 1]} : vector<1x256xf32> to vector<1x128xf32>
    %29 = vector.extract_strided_slice %27 {offsets = [0, 128], sizes = [1, 128], strides = [1, 1]} : vector<1x256xf32> to vector<1x128xf32>
    %30 = arith.mulf %28, %28 : vector<1x128xf32>
    %31 = arith.subf %29, %30 : vector<1x128xf32>
    %cst_8 = arith.constant 0.000000e+00 : f32
    %32 = vector.broadcast %cst_8 : f32 to vector<1x128xf32>
    %33 = arith.maximumf %31, %32 : vector<1x128xf32>
    %cst_9 = arith.constant 9.99999974E-6 : f32
    %34 = vector.broadcast %cst_9 : f32 to vector<1x128xf32>
    %35 = arith.addf %33, %34 : vector<1x128xf32>
    %36 = math.rsqrt %35 : vector<1x128xf32>
    %37 = arith.mulf %3, %36 : vector<1x128xf32>
    %38 = arith.mulf %28, %37 : vector<1x128xf32>
    %39 = arith.subf %4, %38 : vector<1x128xf32>
    %40 = vector.broadcast %37 : vector<1x128xf32> to vector<16x128xf32>
    %41 = arith.mulf %21, %40 : vector<16x128xf32>
    %42 = vector.broadcast %39 : vector<1x128xf32> to vector<16x128xf32>
    %43 = arith.addf %41, %42 : vector<16x128xf32>
    %44 = arith.truncf %43 : vector<16x128xf32> to vector<16x128xbf16>
    %c0_10 = arith.constant 0 : index
    %c0_11 = arith.constant 0 : index
    %45 = vector.load %arg2[%c0_10, %c0_11] : memref<128x256xbf16, #tpu.memory_space<vmem>>, vector<128x256xbf16>
    %cst_12 = arith.constant dense<0.000000e+00> : vector<16x256xf32>
    %46 = tpu.matmul %44, %45, %cst_12 {dimension_numbers = #tpu.dot_dimension_numbers<[1], [0], [0], [1], [0, 0, 1, 1], [], []>} : vector<16x128xbf16>, vector<128x256xbf16>, vector<16x256xf32> -> vector<16x256xf32>
    %47 = vector.broadcast %5 : vector<1x256xf32> to vector<16x256xf32>
    %48 = arith.addf %46, %47 : vector<16x256xf32>
    %cst_13 = arith.constant 0.00999999977 : f32
    %49 = vector.broadcast %cst_13 : f32 to vector<16x256xf32>
    %50 = arith.mulf %49, %48 : vector<16x256xf32>
    %51 = arith.maximumf %48, %50 : vector<16x256xf32>
    %52 = arith.mulf %51, %51 : vector<16x256xf32>
    %53 = tpu.concatenate %51, %52 in 1 : vector<16x256xf32>, vector<16x256xf32> -> vector<16x512xf32>
    %cst_14 = arith.constant dense<0.000000e+00> : vector<512xf32>
    %54 = vector.multi_reduction <add>, %53, %cst_14 [0] : vector<16x512xf32> to vector<512xf32>
    %55 = vector.shape_cast %54 : vector<512xf32> to vector<1x512xf32>
    %cst_15 = arith.constant 6.250000e-02 : f32
    %56 = vector.broadcast %cst_15 : f32 to vector<1x512xf32>
    %57 = arith.mulf %55, %56 : vector<1x512xf32>
    %58 = vector.extract_strided_slice %57 {offsets = [0, 0], sizes = [1, 256], strides = [1, 1]} : vector<1x512xf32> to vector<1x256xf32>
    %59 = vector.extract_strided_slice %57 {offsets = [0, 256], sizes = [1, 256], strides = [1, 1]} : vector<1x512xf32> to vector<1x256xf32>
    %60 = arith.mulf %58, %58 : vector<1x256xf32>
    %61 = arith.subf %59, %60 : vector<1x256xf32>
    %cst_16 = arith.constant 0.000000e+00 : f32
    %62 = vector.broadcast %cst_16 : f32 to vector<1x256xf32>
    %63 = arith.maximumf %61, %62 : vector<1x256xf32>
    %cst_17 = arith.constant 9.99999974E-6 : f32
    %64 = vector.broadcast %cst_17 : f32 to vector<1x256xf32>
    %65 = arith.addf %63, %64 : vector<1x256xf32>
    %66 = math.rsqrt %65 : vector<1x256xf32>
    %67 = arith.mulf %6, %66 : vector<1x256xf32>
    %68 = arith.mulf %58, %67 : vector<1x256xf32>
    %69 = arith.subf %7, %68 : vector<1x256xf32>
    %70 = vector.broadcast %67 : vector<1x256xf32> to vector<16x256xf32>
    %71 = arith.mulf %51, %70 : vector<16x256xf32>
    %72 = vector.broadcast %69 : vector<1x256xf32> to vector<16x256xf32>
    %73 = arith.addf %71, %72 : vector<16x256xf32>
    %74 = vector.shape_cast %73 : vector<16x256xf32> to vector<2x8x256xf32>
    %cst_18 = arith.constant dense<0.000000e+00> : vector<2x256xf32>
    %75 = vector.multi_reduction <add>, %74, %cst_18 [1] : vector<2x8x256xf32> to vector<2x256xf32>
    %cst_19 = arith.constant dense<0xFF800000> : vector<2x256xf32>
    %76 = vector.multi_reduction <maximumf>, %74, %cst_19 [1] : vector<2x8x256xf32> to vector<2x256xf32>
    %77 = arith.truncf %75 : vector<2x256xf32> to vector<2x256xbf16>
    %c0_20 = arith.constant 0 : index
    %c0_21 = arith.constant 0 : index
    %78 = vector.load %arg3[%c0_20, %c0_21] : memref<256x512xbf16, #tpu.memory_space<vmem>>, vector<256x512xbf16>
    %cst_22 = arith.constant dense<0.000000e+00> : vector<2x512xf32>
    %79 = tpu.matmul %77, %78, %cst_22 {dimension_numbers = #tpu.dot_dimension_numbers<[1], [0], [0], [1], [0, 0, 1, 1], [], []>} : vector<2x256xbf16>, vector<256x512xbf16>, vector<2x512xf32> -> vector<2x512xf32>
    %80 = arith.truncf %76 : vector<2x256xf32> to vector<2x256xbf16>
    %c0_23 = arith.constant 0 : index
    %c0_24 = arith.constant 0 : index
    %81 = vector.load %arg4[%c0_23, %c0_24] : memref<256x512xbf16, #tpu.memory_space<vmem>>, vector<256x512xbf16>
    %cst_25 = arith.constant dense<0.000000e+00> : vector<2x512xf32>
    %82 = tpu.matmul %80, %81, %cst_25 {dimension_numbers = #tpu.dot_dimension_numbers<[1], [0], [0], [1], [0, 0, 1, 1], [], []>} : vector<2x256xbf16>, vector<256x512xbf16>, vector<2x512xf32> -> vector<2x512xf32>
    %83 = arith.addf %79, %82 : vector<2x512xf32>
    %84 = vector.broadcast %8 : vector<1x512xf32> to vector<2x512xf32>
    %85 = arith.addf %83, %84 : vector<2x512xf32>
    %cst_26 = arith.constant 0.00999999977 : f32
    %86 = vector.broadcast %cst_26 : f32 to vector<2x512xf32>
    %87 = arith.mulf %86, %85 : vector<2x512xf32>
    %88 = arith.maximumf %85, %87 : vector<2x512xf32>
    %89 = arith.mulf %88, %88 : vector<2x512xf32>
    %90 = tpu.concatenate %88, %89 in 1 : vector<2x512xf32>, vector<2x512xf32> -> vector<2x1024xf32>
    %cst_27 = arith.constant dense<0.000000e+00> : vector<1024xf32>
    %91 = vector.multi_reduction <add>, %90, %cst_27 [0] : vector<2x1024xf32> to vector<1024xf32>
    %92 = vector.shape_cast %91 : vector<1024xf32> to vector<1x1024xf32>
    %cst_28 = arith.constant 5.000000e-01 : f32
    %93 = vector.broadcast %cst_28 : f32 to vector<1x1024xf32>
    %94 = arith.mulf %92, %93 : vector<1x1024xf32>
    %95 = vector.extract_strided_slice %94 {offsets = [0, 0], sizes = [1, 512], strides = [1, 1]} : vector<1x1024xf32> to vector<1x512xf32>
    %96 = vector.extract_strided_slice %94 {offsets = [0, 512], sizes = [1, 512], strides = [1, 1]} : vector<1x1024xf32> to vector<1x512xf32>
    %97 = arith.mulf %95, %95 : vector<1x512xf32>
    %98 = arith.subf %96, %97 : vector<1x512xf32>
    %cst_29 = arith.constant 0.000000e+00 : f32
    %99 = vector.broadcast %cst_29 : f32 to vector<1x512xf32>
    %100 = arith.maximumf %98, %99 : vector<1x512xf32>
    %cst_30 = arith.constant 9.99999974E-6 : f32
    %101 = vector.broadcast %cst_30 : f32 to vector<1x512xf32>
    %102 = arith.addf %100, %101 : vector<1x512xf32>
    %103 = math.rsqrt %102 : vector<1x512xf32>
    %104 = arith.mulf %9, %103 : vector<1x512xf32>
    %105 = arith.mulf %95, %104 : vector<1x512xf32>
    %106 = arith.subf %10, %105 : vector<1x512xf32>
    %107 = vector.broadcast %104 : vector<1x512xf32> to vector<2x512xf32>
    %108 = arith.mulf %88, %107 : vector<2x512xf32>
    %109 = vector.broadcast %106 : vector<1x512xf32> to vector<2x512xf32>
    %110 = arith.addf %108, %109 : vector<2x512xf32>
    %111 = arith.truncf %110 : vector<2x512xf32> to vector<2x512xbf16>
    %c0_31 = arith.constant 0 : index
    %c0_32 = arith.constant 0 : index
    %112 = vector.load %arg5[%c0_31, %c0_32] : memref<512x512xbf16, #tpu.memory_space<vmem>>, vector<512x512xbf16>
    %cst_33 = arith.constant dense<0.000000e+00> : vector<2x512xf32>
    %113 = tpu.matmul %111, %112, %cst_33 {dimension_numbers = #tpu.dot_dimension_numbers<[1], [0], [0], [1], [0, 0, 1, 1], [], []>} : vector<2x512xbf16>, vector<512x512xbf16>, vector<2x512xf32> -> vector<2x512xf32>
    %114 = vector.broadcast %11 : vector<1x512xf32> to vector<2x512xf32>
    %115 = arith.addf %113, %114 : vector<2x512xf32>
    %cst_34 = arith.constant 0.00999999977 : f32
    %116 = vector.broadcast %cst_34 : f32 to vector<2x512xf32>
    %117 = arith.mulf %116, %115 : vector<2x512xf32>
    %118 = arith.maximumf %115, %117 : vector<2x512xf32>
    %119 = arith.mulf %118, %118 : vector<2x512xf32>
    %120 = tpu.concatenate %118, %119 in 1 : vector<2x512xf32>, vector<2x512xf32> -> vector<2x1024xf32>
    %cst_35 = arith.constant dense<0.000000e+00> : vector<1024xf32>
    %121 = vector.multi_reduction <add>, %120, %cst_35 [0] : vector<2x1024xf32> to vector<1024xf32>
    %122 = vector.shape_cast %121 : vector<1024xf32> to vector<1x1024xf32>
    %cst_36 = arith.constant 5.000000e-01 : f32
    %123 = vector.broadcast %cst_36 : f32 to vector<1x1024xf32>
    %124 = arith.mulf %122, %123 : vector<1x1024xf32>
    %125 = vector.extract_strided_slice %124 {offsets = [0, 0], sizes = [1, 512], strides = [1, 1]} : vector<1x1024xf32> to vector<1x512xf32>
    %126 = vector.extract_strided_slice %124 {offsets = [0, 512], sizes = [1, 512], strides = [1, 1]} : vector<1x1024xf32> to vector<1x512xf32>
    %127 = arith.mulf %125, %125 : vector<1x512xf32>
    %128 = arith.subf %126, %127 : vector<1x512xf32>
    %cst_37 = arith.constant 0.000000e+00 : f32
    %129 = vector.broadcast %cst_37 : f32 to vector<1x512xf32>
    %130 = arith.maximumf %128, %129 : vector<1x512xf32>
    %cst_38 = arith.constant 9.99999974E-6 : f32
    %131 = vector.broadcast %cst_38 : f32 to vector<1x512xf32>
    %132 = arith.addf %130, %131 : vector<1x512xf32>
    %133 = math.rsqrt %132 : vector<1x512xf32>
    %134 = arith.mulf %12, %133 : vector<1x512xf32>
    %135 = arith.mulf %125, %134 : vector<1x512xf32>
    %136 = arith.subf %13, %135 : vector<1x512xf32>
    %137 = vector.broadcast %134 : vector<1x512xf32> to vector<2x512xf32>
    %138 = arith.mulf %118, %137 : vector<2x512xf32>
    %139 = vector.broadcast %136 : vector<1x512xf32> to vector<2x512xf32>
    %140 = arith.addf %138, %139 : vector<2x512xf32>
    %141 = arith.truncf %140 : vector<2x512xf32> to vector<2x512xbf16>
    %c0_39 = arith.constant 0 : index
    %c0_40 = arith.constant 0 : index
    %142 = vector.load %arg6[%c0_39, %c0_40] : memref<512x512xbf16, #tpu.memory_space<vmem>>, vector<512x512xbf16>
    %cst_41 = arith.constant dense<0.000000e+00> : vector<2x512xf32>
    %143 = tpu.matmul %141, %142, %cst_41 {dimension_numbers = #tpu.dot_dimension_numbers<[1], [0], [0], [1], [0, 0, 1, 1], [], []>} : vector<2x512xbf16>, vector<512x512xbf16>, vector<2x512xf32> -> vector<2x512xf32>
    %144 = vector.broadcast %14 : vector<1x512xf32> to vector<2x512xf32>
    %145 = arith.addf %143, %144 : vector<2x512xf32>
    %c0_42 = arith.constant 0 : index
    %c0_43 = arith.constant 0 : index
    %146 = vector.load %arg8[%c0_42, %c0_43] : memref<2x512xf32, #tpu.memory_space<vmem>>, vector<2x512xf32>
    tpu.vector_store %arg8[%c0_42, %c0_43], %145 {strides = array<i32>} : memref<2x512xf32, #tpu.memory_space<vmem>>, vector<2x512xf32>,
    return
  }
}

</mosaic_0001>

<bundles_post_ra>
// kernel: _forward_impl.1
= control target key start
LH: loop header
LB: loop body
LE: loop exit
PB: predicated region body
PF: predicated region fallthrough
CT: control target
= control target key end

     0   :  { %13 = vsyncpa [#allocation3], 0  ;;  %s6754_s0 = inlined_call_operand.vmem [shape: bf16[16,128], index: 0, kind: input, shape index: {}]   ;;  %s6755_s1 = inlined_call_operand.hbm [shape: bf16[128,128], index: 1, kind: input, shape index: {}]   ;;  %s6756_s2 = inlined_call_operand.hbm [shape: bf16[128,256], index: 2, kind: input, shape index: {}]   ;;  %s6757_s3 = inlined_call_operand.hbm [shape: bf16[256,512], index: 3, kind: input, shape index: {}]   ;;  %s6758_s4 = inlined_call_operand.hbm [shape: bf16[256,512], index: 4, kind: input, shape index: {}]   ;;  %s6759_s5 = inlined_call_operand.hbm [shape: bf16[512,512], index: 5, kind: input, shape index: {}]   ;;  %s6760_s6 = inlined_call_operand.hbm [shape: bf16[512,512], index: 6, kind: input, shape index: {}]   ;;  %s6761_s7 = inlined_call_operand.hbm [shape: f32[16,512], index: 7, kind: input, shape index: {}]   ;;  %s6762_s8 = inlined_call_operand.hbm [shape: f32[2,512], index: 8, kind: output, shape index: {}]  }
   0x1   :  { %14 = vsyncpa [#allocation6], 0 }
   0x2   :  { %15 = vsyncpa [#allocation9], 0 }
   0x3   :  { %16 = vsyncpa [#allocation12], 0  ;;  %s37_s29 = sshll.u32 %s6756_s2, 4  ;;  %s38_s29 = int_to_ptr.hbm [resolvable:$true] %s37_s29 }
   0x4   :  { %17 = vsyncpa [#allocation4], 0  ;;  %s6212_s30 = smov [#allocation5]   ;;  %s6213_s10 = smov 128  }
   0x5   :  { %s39_s9 = sshll.u32 %s6212_s30, 4  ;;  %s6214_s11 = smov 8   ;;  %s40_s9 = int_to_ptr.vmem [resolvable:$true] %s39_s9 }
   0x6   :  { %45 = dma.hbm_to_vmem [thread:$0]  %s38_s29, 2048, %s40_s9, [#allocation6], %s6213_s10, %s6213_s10, %s6214_s11  }
   0x7   :  { %s63_s14 = sshll.u32 %s6758_s4, 4  ;;  %s6215_s15 = smov [#allocation8]   ;;  %s64_s14 = int_to_ptr.hbm [resolvable:$true] %s63_s14 }
   0x8   :  { %s65_s16 = sshll.u32 %s6215_s15, 4  ;;  %s89_s19 = sshll.u32 %s6760_s6, 4  ;;  %s66_s16 = int_to_ptr.vmem [resolvable:$true] %s65_s16  ;;  %s90_s19 = int_to_ptr.hbm [resolvable:$true] %s89_s19 }
   0x9   :  { %s6216_s2 = smov 256   ;;  %s6217_s20 = smov 16  }
   0xa   :  { %71 = dma.hbm_to_vmem [thread:$0]  %s64_s14, 8192, %s66_s16, [#allocation9], %s6216_s2, %s6216_s2, %s6217_s20  }
   0xb   :  { %s24_s23 = sshll.u32 %s6755_s1, 4  ;;  %s6218_s4 = smov [#allocation11]   ;;  %s25_s23 = int_to_ptr.hbm [resolvable:$true] %s24_s23 }
   0xc   :  { %s91_s24 = sshll.u32 %s6218_s4, 4  ;;  %s6219_s6 = smov [#allocation2]   ;;  %s92_s24 = int_to_ptr.vmem [resolvable:$true] %s91_s24 }
   0xd   :  { %97 = dma.hbm_to_vmem [thread:$0]  %s90_s19, 16384, %s92_s24, [#allocation12], %s6216_s2, %s6216_s2, %s6217_s20  }
   0xe   :  { %s26_s25 = sshll.u32 %s6219_s6, 4  ;;  %s6220_s26 = smov 64   ;;  %s27_s25 = int_to_ptr.vmem [resolvable:$true] %s26_s25 }
   0xf   :  { %s6221_s27 = smov 4   ;;  %s50_s30 = sshll.u32 %s6757_s3, 4  ;;  %s51_s30 = int_to_ptr.hbm [resolvable:$true] %s50_s30 }
  0x10   :  { %32 = dma.hbm_to_vmem [thread:$0]  %s25_s23, 1024, %s27_s25, [#allocation3], %s6220_s26, %s6220_s26, %s6221_s27  }
  0x11   :  { %s6222_s1 = smov [#allocation7]   ;;  %s76_s12 = sshll.u32 %s6759_s5, 4  ;;  %s77_s12 = int_to_ptr.hbm [resolvable:$true] %s76_s12 }
  0x12   :  { %s52_s9 = sshll.u32 %s6222_s1, 4  ;;  %s6223_s13 = smov [#allocation10]   ;;  %s53_s9 = int_to_ptr.vmem [resolvable:$true] %s52_s9 }
  0x13   :  { %58 = dma.hbm_to_vmem [thread:$0]  %s51_s30, 8192, %s53_s9, [#allocation6], %s6216_s2, %s6216_s2, %s6217_s20  }
  0x14   :  { %s78_s14 = sshll.u32 %s6223_s13, 4  ;;  %s102_s17 = sshll.u32 %s6761_s7, 4  ;;  %s79_s14 = int_to_ptr.vmem [resolvable:$true] %s78_s14  ;;  %s103_s17 = int_to_ptr.hbm [resolvable:$true] %s102_s17 }
  0x15   :  { %84 = dma.hbm_to_vmem [thread:$0]  %s77_s12, 16384, %s79_s14, [#allocation9], %s6216_s2, %s6216_s2, %s6217_s20  }
  0x16   :  { %s6224_s3 = smov [#allocation13]   ;;  %s6225_s5 = smov 512  }
  0x17   :  { %s104_s18 = sshll.u32 %s6224_s3, 4  ;;  %s6226_s19 = smov 32   ;;  %s105_s18 = int_to_ptr.vmem [resolvable:$true] %s104_s18 }
  0x18   :  { %110 = dma.hbm_to_vmem [thread:$0]  %s103_s17, 1024, %s105_s18, [#allocation12], %s6225_s5, %s6225_s5, %s6226_s19  }
  0x19   :  { %6202 = dma.done.wait [#allocation3], 1024  }
  0x1a   :  { %6203 = vsyncadd [#allocation3], 4294966272 }
  0x1b   :  { %6204 = dma.done.wait [#allocation6], 10240  }
  0x1c   :  { %6205 = vsyncadd [#allocation6], 4294957056 }
  0x1d   :  { %6206 = dma.done.wait [#allocation9], 24576  }
  0x1e   :  { %6207 = vsyncadd [#allocation9], 4294942720 }
  0x1f   :  { %6208 = dma.done.wait [#allocation12], 17408  }
  0x20   :  { %6209 = vsyncadd [#allocation12], 4294949888  ;;  %v5565_v0 = vld [vmem:[#allocation2 + $0x38] sm:$0xff]  ;;  %v5564_v1 = vld [vmem:[#allocation2 + $0x30] sm:$0xff]  ;;  %vm697_vm9 = vcmask 1041409   ;;  %vm1586_vm10 = vcmask 1041408  }
  0x21   :  { %220 = vmatpush.bf16.msra.mxu0 %v5565_v0  ;;  %v5563_v2 = vld [vmem:[#allocation2 + $0x28] sm:$0xff]  ;;  %v5562_v3 = vld [vmem:[#allocation2 + $0x20] sm:$0xff]  ;;  %v5561_v4 = vld [vmem:[#allocation2 + $0x18] sm:$0xff]  ;;  %s3908_s23 = sshll.u32 %s6762_s8, 4  ;;  %s3909_s23 = int_to_ptr.hbm [resolvable:$true] %s3908_s23 }
  0x22   :  { %v5560_v5 = vld [vmem:[#allocation2 + $0x10] sm:$0xff]  ;;  %v5559_v6 = vld [vmem:[#allocation2 + $0x8] sm:$0xff]  ;;  %v5558_v7 = vld [vmem:[#allocation2] sm:$0xff] }
  0x23   :  { %v5557_v8 = vld [vmem:[%s6754_s0] sm:$0xff]  ;;  %v4015_v10 = vld [vmem:[#allocation5 + $0x70] sm:$0xf]  ;;  %v5581_v11 = vld [vmem:[#allocation5 + $0x74] sm:$0xf0]  ;;  %s6227_s0 = smov [#allocation14]  }
  0x24   :  { %v6309_v9 = vld [vmem:[#allocation13] sm:$0xff]  ;;  %v5580_v12 = vld [vmem:[#allocation5 + $0x74] sm:$0xf]  ;;  %v4016_v13 = vor.u32 %v5581_v11, %v4015_v10  ;;  %v4017_v14 = vld [vmem:[#allocation5 + $0x78] sm:$0xf0]  ;;  %s3906_s20 = sshll.u32 %s6227_s0, 4  ;;  %s3907_s20 = int_to_ptr.vmem [resolvable:$true] %s3906_s20 }
  0x25   :  { %221 = vmatpush.bf16.msra.mxu0 %v5564_v1  ;;  %v4007_v15 = vld [vmem:[#allocation5 + $0x60] sm:$0xf]  ;;  %v5579_v16 = vld [vmem:[#allocation5 + $0x64] sm:$0xf0]  ;;  %v165_v17 = vperm.slane %v6309_v9, 0  ;;  %v4020_v18 = vor.u32 %v5580_v12, %v4017_v14 }
  0x26   :  { %v5578_v19 = vld [vmem:[#allocation5 + $0x64] sm:$0xf]  ;;  %v4009_v20 = vld [vmem:[#allocation5 + $0x68] sm:$0xf0]  ;;  %381 = vmatpush.bf16.msra.mxu1 %v4016_v13  ;;  %v4008_v22 = vor.u32 %v5579_v16, %v4007_v15  ;;  %v3999_v24 = vld [vmem:[#allocation5 + $0x50] sm:$0xf] }
  0x27   :  { %395 = vmatpush.bf16.msra.mxu2 %v4020_v18  ;;  %v4012_v23 = vor.u32 %v5578_v19, %v4009_v20  ;;  %v5577_v25 = vld [vmem:[#allocation5 + $0x54] sm:$0xf0]  ;;  %v5576_v26 = vld [vmem:[#allocation5 + $0x54] sm:$0xf]  ;;  %v4001_v27 = vld [vmem:[#allocation5 + $0x58] sm:$0xf0] }
  0x28   :  { %v4000_v29 = vor.u32 %v5577_v25, %v3999_v24  ;;  %v4004_v30 = vor.u32 %v5576_v26, %v4001_v27  ;;  %v3991_v31 = vld [vmem:[#allocation5 + $0x40] sm:$0xf]  ;;  %v5575_v32 = vld [vmem:[#allocation5 + $0x44] sm:$0xf0]  ;;  %v5574_v33 = vld [vmem:[#allocation5 + $0x44] sm:$0xf] }
  0x29   :  { %222 = vmatpush.bf16.msra.mxu0 %v5563_v2  ;;  %v3993_v34 = vld [vmem:[#allocation5 + $0x48] sm:$0xf0]  ;;  %v3992_v37 = vor.u32 %v5575_v32, %v3991_v31  ;;  %v3983_v40 = vld [vmem:[#allocation5 + $0x30] sm:$0xf]  ;;  %v5573_v41 = vld [vmem:[#allocation5 + $0x34] sm:$0xf0] }
  0x2a   :  { %382 = vmatpush.bf16.msra.mxu1 %v4008_v22  ;;  %v3996_v39 = vor.u32 %v5574_v33, %v3993_v34  ;;  %v5572_v42 = vld [vmem:[#allocation5 + $0x34] sm:$0xf]  ;;  %v3985_v43 = vld [vmem:[#allocation5 + $0x38] sm:$0xf0]  ;;  %v3984_v46 = vor.u32 %v5573_v41, %v3983_v40  ;;  %v3975_v49 = vld [vmem:[#allocation5 + $0x20] sm:$0xf] }
  0x2b   :  { %396 = vmatpush.bf16.msra.mxu2 %v4012_v23  ;;  %v3988_v48 = vor.u32 %v5572_v42, %v3985_v43  ;;  %v5571_v50 = vld [vmem:[#allocation5 + $0x24] sm:$0xf0]  ;;  %v5570_v51 = vld [vmem:[#allocation5 + $0x24] sm:$0xf]  ;;  %v3977_v52 = vld [vmem:[#allocation5 + $0x28] sm:$0xf0] }
  0x2c   :  { %v3976_v56 = vor.u32 %v5571_v50, %v3975_v49  ;;  %v3980_v59 = vor.u32 %v5570_v51, %v3977_v52  ;;  %v3967_v60 = vld [vmem:[#allocation5 + $0x10] sm:$0xf]  ;;  %v5569_v61 = vld [vmem:[#allocation5 + $0x14] sm:$0xf0]  ;;  %v5568_v62 = vld [vmem:[#allocation5 + $0x14] sm:$0xf] }
  0x2d   :  { %223 = vmatpush.bf16.msra.mxu0 %v5562_v3  ;;  %v3969_v63 = vld [vmem:[#allocation5 + $0x18] sm:$0xf0]  ;;  %v3968_v2 = vor.u32 %v5569_v61, %v3967_v60  ;;  %v3961_v10 = vld [vmem:[#allocation5 + $0x8] sm:$0xf0]  ;;  %v299_v49 = vperm.slane %v6309_v9, 3 }
  0x2e   :  { %383 = vmatpush.bf16.msra.mxu1 %v4000_v29  ;;  %v4137_v51 = vld [vmem:[#allocation8 + $0xf0] sm:$0xf0]  ;;  %v4263_v60 = vld [vmem:[#allocation8 + $0x1e0] sm:$0xf]  ;;  %v5708_v61 = vld [vmem:[#allocation8 + $0x1ec] sm:$0xf0] }
  0x2f   :  { %397 = vmatpush.bf16.msra.mxu2 %v4004_v30 }
  0x31   :  { %224 = vmatpush.bf16.msra.mxu0 %v5561_v4 }
  0x32   :  { %384 = vmatpush.bf16.msra.mxu1 %v3992_v37 }
  0x33   :  { %398 = vmatpush.bf16.msra.mxu2 %v3996_v39 }
  0x35   :  { %225 = vmatpush.bf16.msra.mxu0 %v5560_v5  ;;  %v3972_v5 = vor.u32 %v5568_v62, %v3969_v63  ;;  %v5706_v62 = vld [vmem:[#allocation8 + $0x1e4] sm:$0xf] }
  0x36   :  { %385 = vmatpush.bf16.msra.mxu1 %v3984_v46  ;;  %v5676_v46 = vld [vmem:[#allocation8 + $0xec] sm:$0xf0] }
  0x37   :  { %399 = vmatpush.bf16.msra.mxu2 %v3988_v48  ;;  %v5674_v48 = vld [vmem:[#allocation8 + $0xe4] sm:$0xf] }
  0x38   :  { %v4140_v52 = vor.u32 %v5674_v48, %v4137_v51  ;;  %v5696_v48 = vld [vmem:[#allocation8 + $0x18c] sm:$0xf0] }
  0x39   :  { %226 = vmatpush.bf16.msra.mxu0 %v5559_v6  ;;  %v3959_v6 = vld [vmem:[#allocation5] sm:$0xf] }
  0x3a   :  { %386 = vmatpush.bf16.msra.mxu1 %v3976_v56 }
  0x3b   :  { %400 = vmatpush.bf16.msra.mxu2 %v3980_v59 }
  0x3d   :  { %227 = vmatpush.bf16.msra.mxu0 %v5558_v7  ;;  %v5567_v7 = vld [vmem:[#allocation5 + $0x4] sm:$0xf0] }
  0x3e   :  { %387 = vmatpush.bf16.msra.mxu1 %v3968_v2  ;;  %v3960_v13 = vor.u32 %v5567_v7, %v3959_v6 }
  0x3f   :  { %401 = vmatpush.bf16.msra.mxu2 %v3972_v5  ;;  %v5666_v5 = vld [vmem:[#allocation8 + $0xa4] sm:$0xf] }
  0x40   :  { %228 = vmatmul.bf16.vlgmr.msra.gmra.mxu0 %v5557_v8  ;;  %v5566_v8 = vld [vmem:[#allocation5 + $0x4] sm:$0xf] }
  0x41   :  { %v3964_v15 = vor.u32 %v5566_v8, %v3961_v10  ;;  %v4105_v8 = vld [vmem:[#allocation8 + $0xb0] sm:$0xf0] }
  0x42   :  { %388 = vmatpush.bf16.msra.mxu1 %v3960_v13  ;;  %v5704_v13 = vld [vmem:[#allocation8 + $0x1cc] sm:$0xf0] }
  0x43   :  { %402 = vmatpush.bf16.msra.mxu2 %v3964_v15 }
  0x46   :  { %1050 = vmatpush.bf16.msrb.mxu1 %v4140_v52 }
  0xbd   :  { %v229_v21 = vpop.f32.mrf.mxu0 }
  0xbe   :  { %v230_v28 = vadd.f32 %v229_v21, %v165_v17 }
  0xc0   :  { %v234_v35 = vmul.f32 0.01, %v230_v28 }
  0xc2   :  { %v6312_v44 = vmax.f32 %v230_v28, %v234_v35 }
  0xc4   :  { %v238_v53 = vmul.f32 %v6312_v44, %v6312_v44 }
  0xc5   :  { %v231_v36 = vpop.f32.mrf.mxu0 }
  0xc6   :  { %v232_v38 = vadd.f32 %v231_v36, %v165_v17 }
  0xc8   :  { %v235_v45 = vmul.f32 0.01, %v232_v38 }
  0xca   :  { %v6314_v47 = vmax.f32 %v232_v38, %v235_v45  ;;  %v4135_v45 = vld [vmem:[#allocation8 + $0xe0] sm:$0xf] }
  0xcb   :  { %v4136_v50 = vor.u32 %v5676_v46, %v4135_v45  ;;  %v4215_v46 = vld [vmem:[#allocation8 + $0x180] sm:$0xf] }
  0xcc   :  { %v239_v54 = vmul.f32 %v6314_v47, %v6314_v47  ;;  %v240_v55 = vadd.f32 %v6314_v47, %v6312_v44 }
  0xcd   :  { %1024 = vmatpush.bf16.msra.mxu3 %v4136_v50 }
  0xce   :  { %v241_v57 = vrot.slane %v240_v55, 4  ;;  %v247_v58 = vadd.f32 %v239_v54, %v238_v53  ;;  %v6327_v53 = vld [vmem:[#allocation13 + $0x8] sm:$0xff]  ;;  %v5672_v54 = vld [vmem:[#allocation8 + $0xcc] sm:$0xf0] }
  0xcf   :  { %v300_v63 = vperm.slane %v6327_v53, 3 }
  0xd0   :  { %v242_v0 = vadd.f32 %v241_v57, %v240_v55  ;;  %v248_v1 = vrot.slane %v247_v58, 4  ;;  %v5670_v55 = vld [vmem:[#allocation8 + $0xc4] sm:$0xf] }
  0xd2   :  { %v243_v3 = vrot.slane %v242_v0, 2  ;;  %v249_v4 = vadd.f32 %v248_v1, %v247_v58  ;;  %v4121_v58 = vld [vmem:[#allocation8 + $0xd0] sm:$0xf0] }
  0xd3   :  { %v4124_v59 = vor.u32 %v5670_v55, %v4121_v58  ;;  %v4265_v1 = vld [vmem:[#allocation8 + $0x1f0] sm:$0xf0]  ;;  %v5654_v58 = vld [vmem:[#allocation8 + $0x44] sm:$0xf] }
  0xd4   :  { %v244_v11 = vadd.f32 %v243_v3, %v242_v0  ;;  %v250_v12 = vrot.slane %v249_v4, 2  ;;  %v4264_v0 = vor.u32 %v5708_v61, %v4263_v60  ;;  %v4268_v2 = vor.u32 %v5706_v62, %v4265_v1  ;;  %v4103_v3 = vld [vmem:[#allocation8 + $0xa0] sm:$0xf] }
  0xd5   :  { %1051 = vmatpush.bf16.msrb.mxu1 %v4124_v59 }
  0xd6   :  { %v251_v14 = vadd.f32 %v250_v12, %v249_v4  ;;  %v245_v16 = vrot.slane %v244_v11, 1  ;;  %v5668_v4 = vld [vmem:[#allocation8 + $0xac] sm:$0xf0]  ;;  %1037 = vmatpush.bf16.msrb.mxu0 %v4264_v0  ;;  %1063 = vmatpush.bf16.msrb.mxu2 %v4268_v2  ;;  %v4247_v12 = vld [vmem:[#allocation8 + $0x1c0] sm:$0xf] }
  0xd7   :  { %v4104_v7 = vor.u32 %v5668_v4, %v4103_v3  ;;  %v4057_v0 = vld [vmem:[#allocation8 + $0x50] sm:$0xf0]  ;;  %v4199_v2 = vld [vmem:[#allocation8 + $0x160] sm:$0xf]  ;;  %v5690_v3 = vld [vmem:[#allocation8 + $0x164] sm:$0xf] }
  0xd8   :  { %v252_v17 = vrot.slane %v251_v14, 1  ;;  %v246_v18 = vadd.f32 %v245_v16, %v244_v11  ;;  %v4108_v11 = vor.u32 %v5666_v5, %v4105_v8  ;;  %v4248_v16 = vor.u32 %v5704_v13, %v4247_v12  ;;  %v4201_v8 = vld [vmem:[#allocation8 + $0x170] sm:$0xf0]  ;;  %v4039_v12 = vld [vmem:[#allocation8 + $0x20] sm:$0xf] }
  0xd9   :  { %v4060_v1 = vor.u32 %v5654_v58, %v4057_v0  ;;  %v5652_v13 = vld [vmem:[#allocation8 + $0x2c] sm:$0xf0] }
  0xda   :  { %v253_v19 = vadd.f32 %v252_v17, %v251_v14  ;;  %v254_v20 = vmul.f32 0.0625, %v246_v18  ;;  %v5702_v14 = vld [vmem:[#allocation8 + $0x1c4] sm:$0xf]  ;;  %v4249_v17 = vld [vmem:[#allocation8 + $0x1d0] sm:$0xf0]  ;;  %1052 = vmatpush.bf16.msrb.mxu1 %v4108_v11  ;;  %1038 = vmatpush.bf16.msrb.mxu0 %v4248_v16  ;;  %v4204_v11 = vor.u32 %v5690_v3, %v4201_v8 }
  0xdb   :  { %v4151_v8 = vld [vmem:[#allocation8 + $0x100] sm:$0xf] }
  0xdc   :  { %v255_v21 = vmul.f32 0.0625, %v253_v19  ;;  %v256_v22 = vmul.f32 %v254_v20, %v254_v20  ;;  %v4252_v19 = vor.u32 %v5702_v14, %v4249_v17  ;;  %v5650_v14 = vld [vmem:[#allocation8 + $0x24] sm:$0xf] }
  0xde   :  { %v257_v23 = vsub.f32 %v255_v21, %v256_v22  ;;  %v5664_v21 = vld [vmem:[#allocation8 + $0x8c] sm:$0xf0]  ;;  %v5662_v22 = vld [vmem:[#allocation8 + $0x84] sm:$0xf]  ;;  %1064 = vmatpush.bf16.msrb.mxu2 %v4252_v19  ;;  %v4041_v19 = vld [vmem:[#allocation8 + $0x30] sm:$0xf0] }
  0xe0   :  { %v258_v24 = vmax.f32 %v257_v23, 0.0 }
  0xe2   :  { %v259_v25 = vadd.f32 1e-05, %v258_v24 }
  0xe4   :  { %5982 = vrsqrt.f32 %v259_v25  ;;  %vm266_vm1 = vweird.f32 %v259_v25 }
  0xea   :  { %v5983_v26 = vpop.eup %5982 }
  0xeb   :  { %v261_v27 = vmul.f32 %v5983_v26, %v259_v25  ;;  %vm267_vm0 = vweird.f32 %v5983_v26  ;;  %v4089_v25 = vld [vmem:[#allocation8 + $0x90] sm:$0xf0] }
  0xec   :  { %vm268_vm2 = vmor %vm266_vm1, %vm267_vm0 }
  0xed   :  { %v262_v28 = vmul.f32 %v5983_v26, %v261_v27  ;;  %v4092_v27 = vor.u32 %v5662_v22, %v4089_v25  ;;  %v4183_v22 = vld [vmem:[#allocation8 + $0x140] sm:$0xf] }
  0xef   :  { %v263_v29 = vmul.f32 0.5, %v262_v28  ;;  %v4231_v28 = vld [vmem:[#allocation8 + $0x1a0] sm:$0xf]  ;;  %1053 = vmatpush.bf16.msrb.mxu1 %v4092_v27 }
  0xf1   :  { %v264_v30 = vsub.f32 1.5, %v263_v29  ;;  %v5700_v29 = vld [vmem:[#allocation8 + $0x1ac] sm:$0xf0] }
  0xf3   :  { %v265_v31 = vmul.f32 %v5983_v26, %v264_v30  ;;  %v5698_v30 = vld [vmem:[#allocation8 + $0x1a4] sm:$0xf] }
  0xf5   :  { %v269_v32 = vsel %vm268_vm2, %v5983_v26, %v265_v31 }
  0xf6   :  { %v270_v33 = vmul.f32 %v269_v32, %v6309_v9 }
  0xf8   :  { %v271_v34 = vmul.f32 %v270_v33, %v254_v20  ;;  %v276_v36 = vperm.slane %v270_v33, 1  ;;  %v4087_v20 = vld [vmem:[#allocation8 + $0x80] sm:$0xf]  ;;  %v4232_v33 = vor.u32 %v5700_v29, %v4231_v28 }
  0xf9   :  { %v4088_v24 = vor.u32 %v5664_v21, %v4087_v20  ;;  %v4040_v20 = vor.u32 %v5652_v13, %v4039_v12  ;;  %v4044_v21 = vor.u32 %v5650_v14, %v4041_v19  ;;  %v5680_v14 = vld [vmem:[#allocation8 + $0x10c] sm:$0xf0]  ;;  %v4271_v19 = vld [vmem:[#allocation8 + $0x1e8] sm:$0xf] }
  0xfa   :  { %v273_v35 = vrot.slane %v271_v34, 7  ;;  %v277_v38 = vmul.f32 %v276_v36, %v6312_v44  ;;  %v278_v39 = vmul.f32 %v276_v36, %v6314_v47  ;;  %v4119_v47 = vld [vmem:[#allocation8 + $0xc0] sm:$0xf]  ;;  %v4233_v34 = vld [vmem:[#allocation8 + $0x1b0] sm:$0xf0]  ;;  %1039 = vmatpush.bf16.msrb.mxu0 %v4232_v33 }
  0xfb   :  { %v4120_v57 = vor.u32 %v5672_v54, %v4119_v47  ;;  %v4071_v36 = vld [vmem:[#allocation8 + $0x60] sm:$0xf]  ;;  %v4217_v47 = vld [vmem:[#allocation8 + $0x190] sm:$0xf0] }
  0xfc   :  { %v275_v37 = vsub.f32 %v6309_v9, %v273_v35  ;;  %v4236_v35 = vor.u32 %v5698_v30, %v4233_v34  ;;  %v4185_v30 = vld [vmem:[#allocation8 + $0x150] sm:$0xf0]  ;;  %v4023_v33 = vld [vmem:[#allocation8] sm:$0xf]  ;;  %v5648_v34 = vld [vmem:[#allocation8 + $0xc] sm:$0xf0] }
  0xfd   :  { %1025 = vmatpush.bf16.msra.mxu3 %v4120_v57  ;;  %v5656_v57 = vld [vmem:[#allocation8 + $0x4c] sm:$0xf0] }
  0xfe   :  { %v279_v40 = vperm.slane %v275_v37, 2  ;;  %v5660_v37 = vld [vmem:[#allocation8 + $0x6c] sm:$0xf0]  ;;  %1065 = vmatpush.bf16.msrb.mxu2 %v4236_v35  ;;  %v5646_v35 = vld [vmem:[#allocation8 + $0x4] sm:$0xf] }
 0x100   :  { %v280_v41 = vadd.f32 %v279_v40, %v277_v38  ;;  %v281_v42 = vadd.f32 %v279_v40, %v278_v39  ;;  %v5658_v38 = vld [vmem:[#allocation8 + $0x64] sm:$0xf]  ;;  %v4072_v40 = vor.u32 %v5660_v37, %v4071_v36 }
 0x101   :  { %1026 = vmatpush.bf16.msra.mxu3 %v4104_v7 }
 0x102   :  { %v282_v43 = vpack.c.bf16 %v281_v42, %v280_v41  ;;  %v4073_v41 = vld [vmem:[#allocation8 + $0x70] sm:$0xf0] }
 0x103   :  { %v4076_v45 = vor.u32 %v5658_v38, %v4073_v41  ;;  %v4025_v41 = vld [vmem:[#allocation8 + $0x10] sm:$0xf0] }
 0x104   :  { %389 = vmatmul.bf16.vlgmr.msra.gmra.mxu1 %v282_v43  ;;  %403 = vmatmul.bf16.vlgmr.msra.gmra.mxu2 %v282_v43 }
 0x105   :  { %1027 = vmatpush.bf16.msra.mxu3 %v4088_v24  ;;  %1054 = vmatpush.bf16.msrb.mxu1 %v4076_v45  ;;  %v5686_v24 = vld [vmem:[#allocation8 + $0x144] sm:$0xf]  ;;  %v4028_v45 = vor.u32 %v5646_v35, %v4025_v41  ;;  %v5705_v41 = vld [vmem:[#allocation8 + $0x1d4] sm:$0xf0] }
 0x109   :  { %1028 = vmatpush.bf16.msra.mxu3 %v4072_v40  ;;  %1055 = vmatpush.bf16.msrb.mxu1 %v4060_v1 }
 0x10d   :  { %1056 = vmatpush.bf16.msrb.mxu1 %v4044_v21 }
 0x111   :  { %1057 = vmatpush.bf16.msrb.mxu1 %v4028_v45 }
 0x181   :  { %v390_v44 = vpop.f32.mrf.mxu1 }
 0x182   :  { %v391_v56 = vadd.f32 %v390_v44, %v299_v49  ;;  %v4216_v44 = vor.u32 %v5696_v48, %v4215_v46  ;;  %v5677_v46 = vld [vmem:[#allocation8 + $0xf4] sm:$0xf0]  ;;  %v5675_v48 = vld [vmem:[#allocation8 + $0xec] sm:$0xf] }
 0x184   :  { %v409_v6 = vmul.f32 0.01, %v391_v56  ;;  %1040 = vmatpush.bf16.msrb.mxu0 %v4216_v44 }
 0x186   :  { %v6330_v26 = vmax.f32 %v391_v56, %v409_v6  ;;  %v4055_v56 = vld [vmem:[#allocation8 + $0x40] sm:$0xf] }
 0x187   :  { %v404_v10 = vpop.f32.mrf.mxu2  ;;  %v4056_v62 = vor.u32 %v5656_v57, %v4055_v56 }
 0x188   :  { %v405_v15 = vadd.f32 %v404_v10, %v300_v63  ;;  %v417_v42 = vmul.f32 %v6330_v26, %v6330_v26 }
 0x189   :  { %v392_v18 = vpop.f32.mrf.mxu1  ;;  %1029 = vmatpush.bf16.msra.mxu3 %v4056_v62 }
 0x18a   :  { %v393_v23 = vadd.f32 %v392_v18, %v299_v49  ;;  %v410_v31 = vmul.f32 0.01, %v405_v15  ;;  %v5694_v49 = vld [vmem:[#allocation8 + $0x184] sm:$0xf] }
 0x18b   :  { %v4220_v55 = vor.u32 %v5694_v49, %v4217_v47  ;;  %v4145_v49 = vld [vmem:[#allocation8 + $0xf8] sm:$0xf0]  ;;  %v4167_v47 = vld [vmem:[#allocation8 + $0x120] sm:$0xf] }
 0x18c   :  { %v411_v32 = vmul.f32 0.01, %v393_v23  ;;  %v6340_v54 = vmax.f32 %v405_v15, %v410_v31  ;;  %v4148_v57 = vor.u32 %v5675_v48, %v4145_v49 }
 0x18d   :  { %1066 = vmatpush.bf16.msrb.mxu2 %v4220_v55  ;;  %1030 = vmatpush.bf16.msra.mxu3 %v4040_v20  ;;  %v5684_v55 = vld [vmem:[#allocation8 + $0x12c] sm:$0xf0]  ;;  %v5709_v20 = vld [vmem:[#allocation8 + $0x1f4] sm:$0xf0] }
 0x18e   :  { %v6332_v39 = vmax.f32 %v393_v23, %v411_v32  ;;  %v418_v10 = vmul.f32 %v6340_v54, %v6340_v54  ;;  %v5688_v23 = vld [vmem:[#allocation8 + $0x14c] sm:$0xf0]  ;;  %v4188_v32 = vor.u32 %v5686_v24, %v4185_v30  ;;  %v4168_v58 = vor.u32 %v5684_v55, %v4167_v47  ;;  %1102 = vmatpush.bf16.msra.mxu1 %v4148_v57  ;;  %v4111_v30 = vld [vmem:[#allocation8 + $0xa8] sm:$0xf]  ;;  %v4097_v47 = vld [vmem:[#allocation8 + $0x98] sm:$0xf0] }
 0x18f   :  { %v406_v43 = vpop.f32.mrf.mxu2  ;;  %v4184_v31 = vor.u32 %v5688_v23, %v4183_v22  ;;  %v4239_v57 = vld [vmem:[#allocation8 + $0x1a8] sm:$0xf] }
 0x190   :  { %v419_v50 = vmul.f32 %v6332_v39, %v6332_v39  ;;  %v421_v51 = vadd.f32 %v6332_v39, %v6330_v26  ;;  %v407_v52 = vadd.f32 %v406_v43, %v300_v63  ;;  %v5692_v63 = vld [vmem:[#allocation8 + $0x16c] sm:$0xf0]  ;;  %v4024_v43 = vor.u32 %v5648_v34, %v4023_v33 }
 0x191   :  { %v4200_v7 = vor.u32 %v5692_v63, %v4199_v2  ;;  %1067 = vmatpush.bf16.msrb.mxu2 %v4204_v11  ;;  %v4127_v2 = vld [vmem:[#allocation8 + $0xc8] sm:$0xf]  ;;  %v5673_v63 = vld [vmem:[#allocation8 + $0xd4] sm:$0xf0] }
 0x192   :  { %v422_v59 = vrot.slane %v421_v51, 4  ;;  %v435_v60 = vadd.f32 %v419_v50, %v417_v42  ;;  %v412_v61 = vmul.f32 0.01, %v407_v52  ;;  %v4143_v42 = vld [vmem:[#allocation8 + $0xe8] sm:$0xf]  ;;  %1031 = vmatpush.bf16.msra.mxu3 %v4024_v43 }
 0x193   :  { %1041 = vmatpush.bf16.msrb.mxu0 %v4200_v7  ;;  %v4144_v56 = vor.u32 %v5677_v46, %v4143_v42  ;;  %v4129_v7 = vld [vmem:[#allocation8 + $0xd8] sm:$0xf0]  ;;  %v5703_v42 = vld [vmem:[#allocation8 + $0x1cc] sm:$0xf] }
 0x194   :  { %v423_v4 = vadd.f32 %v422_v59, %v421_v51  ;;  %v436_v5 = vrot.slane %v435_v60, 4  ;;  %v6342_v6 = vmax.f32 %v407_v52, %v412_v61  ;;  %v5682_v59 = vld [vmem:[#allocation8 + $0x124] sm:$0xf]  ;;  %v4257_v43 = vld [vmem:[#allocation8 + $0x1d8] sm:$0xf0] }
 0x195   :  { %1068 = vmatpush.bf16.msrb.mxu2 %v4188_v32  ;;  %v5667_v32 = vld [vmem:[#allocation8 + $0xac] sm:$0xf] }
 0x196   :  { %v424_v15 = vrot.slane %v423_v4, 2  ;;  %v437_v16 = vadd.f32 %v436_v5, %v435_v60  ;;  %v420_v17 = vmul.f32 %v6342_v6, %v6342_v6  ;;  %v428_v18 = vadd.f32 %v6342_v6, %v6340_v54  ;;  %v4169_v60 = vld [vmem:[#allocation8 + $0x130] sm:$0xf0]  ;;  %1076 = vmatpush.bf16.msrb.mxu3 %v4144_v56  ;;  %v5671_v5 = vld [vmem:[#allocation8 + $0xcc] sm:$0xf] }
 0x197   :  { %1042 = vmatpush.bf16.msrb.mxu0 %v4184_v31  ;;  %v4172_v3 = vor.u32 %v5682_v59, %v4169_v60  ;;  %v5669_v31 = vld [vmem:[#allocation8 + $0xb4] sm:$0xf0]  ;;  %v5699_v59 = vld [vmem:[#allocation8 + $0x1ac] sm:$0xf] }
 0x198   :  { %v425_v25 = vadd.f32 %v424_v15, %v423_v4  ;;  %v438_v27 = vrot.slane %v437_v16, 2  ;;  %v429_v28 = vrot.slane %v428_v18, 4  ;;  %v442_v29 = vadd.f32 %v420_v17, %v418_v10  ;;  %v5678_v15 = vld [vmem:[#allocation8 + $0x104] sm:$0xf] }
 0x199   :  { %v4128_v4 = vor.u32 %v5673_v63, %v4127_v2  ;;  %1069 = vmatpush.bf16.msrb.mxu2 %v4172_v3  ;;  %v4152_v17 = vor.u32 %v5680_v14, %v4151_v8  ;;  %v4079_v63 = vld [vmem:[#allocation8 + $0x68] sm:$0xf]  ;;  %v5661_v3 = vld [vmem:[#allocation8 + $0x74] sm:$0xf0]  ;;  %v5695_v14 = vld [vmem:[#allocation8 + $0x18c] sm:$0xf] }
 0x19a   :  { %v426_v36 = vrot.slane %v425_v25, 1  ;;  %v439_v37 = vadd.f32 %v438_v27, %v437_v16  ;;  %v430_v38 = vadd.f32 %v429_v28, %v428_v18  ;;  %v443_v40 = vrot.slane %v442_v29, 4  ;;  %v4153_v18 = vld [vmem:[#allocation8 + $0x110] sm:$0xf0]  ;;  %v4273_v27 = vld [vmem:[#allocation8 + $0x1f8] sm:$0xf0] }
 0x19b   :  { %1043 = vmatpush.bf16.msrb.mxu0 %v4168_v58  ;;  %v4132_v16 = vor.u32 %v5671_v5, %v4129_v7  ;;  %v4156_v24 = vor.u32 %v5678_v15, %v4153_v18  ;;  %1077 = vmatpush.bf16.msrb.mxu3 %v4128_v4  ;;  %v4272_v28 = vor.u32 %v5709_v20, %v4271_v19  ;;  %v5701_v58 = vld [vmem:[#allocation8 + $0x1b4] sm:$0xf0]  ;;  %v5659_v5 = vld [vmem:[#allocation8 + $0x6c] sm:$0xf]  ;;  %v4081_v7 = vld [vmem:[#allocation8 + $0x78] sm:$0xf0] }
 0x19c   :  { %v427_v50 = vadd.f32 %v426_v36, %v425_v25  ;;  %v440_v51 = vrot.slane %v439_v37, 1  ;;  %v431_v52 = vrot.slane %v430_v38, 2  ;;  %v444_v44 = vadd.f32 %v443_v40, %v442_v29  ;;  %v5707_v25 = vld [vmem:[#allocation8 + $0x1ec] sm:$0xf]  ;;  %v4225_v15 = vld [vmem:[#allocation8 + $0x198] sm:$0xf0] }
 0x19d   :  { %1103 = vmatpush.bf16.msra.mxu1 %v4132_v16  ;;  %v4276_v29 = vor.u32 %v5707_v25, %v4273_v27  ;;  %v4112_v36 = vor.u32 %v5669_v31, %v4111_v30  ;;  %1070 = vmatpush.bf16.msrb.mxu2 %v4156_v24  ;;  %v4080_v4 = vor.u32 %v5661_v3, %v4079_v63  ;;  %v4063_v18 = vld [vmem:[#allocation8 + $0x48] sm:$0xf]  ;;  %v5657_v19 = vld [vmem:[#allocation8 + $0x54] sm:$0xf0]  ;;  %v5655_v20 = vld [vmem:[#allocation8 + $0x4c] sm:$0xf] }
 0x19e   :  { %v441_v61 = vadd.f32 %v440_v51, %v439_v37  ;;  %v6350_v62 = vmul.f32 0.0625, %v427_v50  ;;  %v432_v0 = vadd.f32 %v431_v52, %v430_v38  ;;  %v445_v1 = vrot.slane %v444_v44, 2  ;;  %v4113_v37 = vld [vmem:[#allocation8 + $0xb8] sm:$0xf0]  ;;  %v4255_v38 = vld [vmem:[#allocation8 + $0x1c8] sm:$0xf] }
 0x19f   :  { %1044 = vmatpush.bf16.msrb.mxu0 %v4152_v17  ;;  %v4116_v40 = vor.u32 %v5667_v32, %v4113_v37  ;;  %v4256_v49 = vor.u32 %v5705_v41, %v4255_v38  ;;  %v4095_v50 = vld [vmem:[#allocation8 + $0x88] sm:$0xf]  ;;  %1078 = vmatpush.bf16.msrb.mxu3 %v4112_v36  ;;  %v4260_v51 = vor.u32 %v5703_v42, %v4257_v43  ;;  %v5665_v52 = vld [vmem:[#allocation8 + $0x94] sm:$0xf0]  ;;  %v5691_v30 = vld [vmem:[#allocation8 + $0x16c] sm:$0xf] }
 0x1a0   :  { %v451_v10 = vmul.f32 0.0625, %v441_v61  ;;  %v453_v11 = vmul.f32 %v6350_v62, %v6350_v62  ;;  %v433_v12 = vrot.slane %v432_v0, 1  ;;  %v446_v13 = vadd.f32 %v445_v1, %v444_v44  ;;  %v5663_v44 = vld [vmem:[#allocation8 + $0x8c] sm:$0xf]  ;;  %v4207_v25 = vld [vmem:[#allocation8 + $0x168] sm:$0xf] }
 0x1a1   :  { %1115 = vmatpush.bf16.msra.mxu2 %v4276_v29  ;;  %1104 = vmatpush.bf16.msra.mxu1 %v4116_v40  ;;  %v4096_v56 = vor.u32 %v5665_v52, %v4095_v50  ;;  %v4100_v60 = vor.u32 %v5663_v44, %v4097_v47  ;;  %v4240_v61 = vor.u32 %v5701_v58, %v4239_v57  ;;  %v5693_v27 = vld [vmem:[#allocation8 + $0x174] sm:$0xf0]  ;;  %v4209_v31 = vld [vmem:[#allocation8 + $0x178] sm:$0xf0]  ;;  %v4047_v32 = vld [vmem:[#allocation8 + $0x28] sm:$0xf] }
 0x1a2   :  { %v455_v21 = vsub.f32 %v451_v10, %v453_v11  ;;  %v434_v22 = vadd.f32 %v433_v12, %v432_v0  ;;  %v447_v23 = vrot.slane %v446_v13, 1  ;;  %v4241_v0 = vld [vmem:[#allocation8 + $0x1b8] sm:$0xf0]  ;;  %v4084_v10 = vor.u32 %v5659_v5, %v4081_v7  ;;  %v4223_v11 = vld [vmem:[#allocation8 + $0x188] sm:$0xf] }
 0x1a3   :  { %1089 = vmatpush.bf16.msra.mxu0 %v4272_v28  ;;  %v4244_v2 = vor.u32 %v5699_v59, %v4241_v0  ;;  %1079 = vmatpush.bf16.msrb.mxu3 %v4096_v56  ;;  %v5697_v12 = vld [vmem:[#allocation8 + $0x194] sm:$0xf0]  ;;  %v4228_v17 = vor.u32 %v5695_v14, %v4225_v15  ;;  %v4208_v29 = vor.u32 %v5693_v27, %v4207_v25  ;;  %v5651_v36 = vld [vmem:[#allocation8 + $0x2c] sm:$0xf]  ;;  %v4049_v37 = vld [vmem:[#allocation8 + $0x38] sm:$0xf0] }
 0x1a4   :  { %v457_v33 = vmax.f32 %v455_v21, 0.0  ;;  %v448_v34 = vadd.f32 %v447_v23, %v446_v13  ;;  %v6354_v35 = vmul.f32 0.0625, %v434_v22  ;;  %v4224_v13 = vor.u32 %v5697_v12, %v4223_v11  ;;  %v4065_v23 = vld [vmem:[#allocation8 + $0x58] sm:$0xf0]  ;;  %v4191_v42 = vld [vmem:[#allocation8 + $0x148] sm:$0xf] }
 0x1a5   :  { %1116 = vmatpush.bf16.msra.mxu2 %v4260_v51  ;;  %1105 = vmatpush.bf16.msra.mxu1 %v4100_v60  ;;  %v4064_v22 = vor.u32 %v5657_v19, %v4063_v18  ;;  %v4068_v24 = vor.u32 %v5655_v20, %v4065_v23  ;;  %v4052_v41 = vor.u32 %v5651_v36, %v4049_v37  ;;  %v5689_v43 = vld [vmem:[#allocation8 + $0x154] sm:$0xf0]  ;;  %v4031_v50 = vld [vmem:[#allocation8 + $0x8] sm:$0xf]  ;;  %v4033_v58 = vld [vmem:[#allocation8 + $0x18] sm:$0xf0] }
 0x1a6   :  { %v6356_v45 = vadd.f32 1e-05, %v457_v33  ;;  %v452_v46 = vmul.f32 0.0625, %v448_v34  ;;  %v454_v48 = vmul.f32 %v6354_v35, %v6354_v35  ;;  %v4212_v33 = vor.u32 %v5691_v30, %v4209_v31  ;;  %v5653_v34 = vld [vmem:[#allocation8 + $0x34] sm:$0xf0] }
 0x1a7   :  { %1090 = vmatpush.bf16.msra.mxu0 %v4256_v49  ;;  %1080 = vmatpush.bf16.msrb.mxu3 %v4080_v4  ;;  %v4048_v40 = vor.u32 %v5653_v34, %v4047_v32  ;;  %v4193_v49 = vld [vmem:[#allocation8 + $0x158] sm:$0xf0]  ;;  %v4192_v44 = vor.u32 %v5689_v43, %v4191_v42  ;;  %v5649_v47 = vld [vmem:[#allocation8 + $0x14] sm:$0xf0]  ;;  %v5683_v5 = vld [vmem:[#allocation8 + $0x12c] sm:$0xf] }
 0x1a8   :  { %5984 = vrsqrt.f32 %v6356_v45  ;;  %v456_v55 = vsub.f32 %v452_v46, %v454_v48  ;;  %v5687_v48 = vld [vmem:[#allocation8 + $0x14c] sm:$0xf]  ;;  %v4032_v57 = vor.u32 %v5649_v47, %v4031_v50  ;;  %vm467_vm4 = vweird.f32 %v6356_v45  ;;  %v5685_v63 = vld [vmem:[#allocation8 + $0x134] sm:$0xf0]  ;;  %v4177_v7 = vld [vmem:[#allocation8 + $0x138] sm:$0xf0] }
 0x1a9   :  { %1117 = vmatpush.bf16.msra.mxu2 %v4244_v2  ;;  %1106 = vmatpush.bf16.msra.mxu1 %v4084_v10  ;;  %v4196_v56 = vor.u32 %v5687_v48, %v4193_v49  ;;  %v4175_v2 = vld [vmem:[#allocation8 + $0x128] sm:$0xf]  ;;  %v5681_v14 = vld [vmem:[#allocation8 + $0x114] sm:$0xf0]  ;;  %v5679_v15 = vld [vmem:[#allocation8 + $0x10c] sm:$0xf] }
 0x1aa   :  { %v458_v1 = vmax.f32 %v456_v55, 0.0  ;;  %v5647_v55 = vld [vmem:[#allocation8 + $0xc] sm:$0xf]  ;;  %v4176_v4 = vor.u32 %v5685_v63, %v4175_v2  ;;  %v4161_v19 = vld [vmem:[#allocation8 + $0x118] sm:$0xf0] }
 0x1ab   :  { %1091 = vmatpush.bf16.msra.mxu0 %v4240_v61  ;;  %1081 = vmatpush.bf16.msrb.mxu3 %v4064_v22  ;;  %v4036_v61 = vor.u32 %v5647_v55, %v4033_v58  ;;  %v5612_v58 = vld [vmem:[#allocation7 + $0xec] sm:$0xf0] }
 0x1ac   :  { %v6361_v8 = vadd.f32 1e-05, %v458_v1 }
 0x1ad   :  { %1118 = vmatpush.bf16.msra.mxu2 %v4228_v17  ;;  %1107 = vmatpush.bf16.msra.mxu1 %v4068_v24 }
 0x1ae   :  { %v5985_v16 = vpop.eup %5984  ;;  %5986 = vrsqrt.f32 %v6361_v8  ;;  %vm477_vm7 = vweird.f32 %v6361_v8 }
 0x1af   :  { %v462_v21 = vmul.f32 %v5985_v16, %v6356_v45  ;;  %1092 = vmatpush.bf16.msra.mxu0 %v4224_v13  ;;  %vm468_vm3 = vweird.f32 %v5985_v16  ;;  %1082 = vmatpush.bf16.msrb.mxu3 %v4048_v40  ;;  %v4180_v45 = vor.u32 %v5683_v5, %v4177_v7  ;;  %v4159_v13 = vld [vmem:[#allocation8 + $0x108] sm:$0xf] }
 0x1b0   :  { %vm469_vm5 = vmor %vm467_vm4, %vm468_vm3  ;;  %v4160_v18 = vor.u32 %v5681_v14, %v4159_v13  ;;  %v4377_v13 = vld [vmem:[#allocation7 + $0xd0] sm:$0xf0] }
 0x1b1   :  { %v463_v28 = vmul.f32 %v5985_v16, %v462_v21  ;;  %1119 = vmatpush.bf16.msra.mxu2 %v4212_v33  ;;  %1108 = vmatpush.bf16.msra.mxu1 %v4052_v41  ;;  %v4164_v21 = vor.u32 %v5679_v15, %v4161_v19 }
 0x1b3   :  { %v464_v38 = vmul.f32 0.5, %v463_v28  ;;  %1093 = vmatpush.bf16.msra.mxu0 %v4208_v29  ;;  %1083 = vmatpush.bf16.msrb.mxu3 %v4032_v57  ;;  %v4391_v57 = vld [vmem:[#allocation7 + $0xe0] sm:$0xf] }
 0x1b4   :  { %v5987_v46 = vpop.eup %5986  ;;  %v4392_v5 = vor.u32 %v5612_v58, %v4391_v57  ;;  %v4327_v57 = vld [vmem:[#allocation7 + $0x60] sm:$0xf]  ;;  %v5596_v58 = vld [vmem:[#allocation7 + $0x6c] sm:$0xf0] }
 0x1b5   :  { %v465_v51 = vsub.f32 1.5, %v464_v38  ;;  %v472_v52 = vmul.f32 %v5987_v46, %v6361_v8  ;;  %1120 = vmatpush.bf16.msra.mxu2 %v4196_v56  ;;  %vm478_vm6 = vweird.f32 %v5987_v46  ;;  %1109 = vmatpush.bf16.msra.mxu1 %v4036_v61  ;;  %v4393_v61 = vld [vmem:[#allocation7 + $0xf0] sm:$0xf0] }
 0x1b6   :  { %vm479_vm8 = vmor %vm477_vm7, %vm478_vm6 }
 0x1b7   :  { %v466_v59 = vmul.f32 %v5985_v16, %v465_v51  ;;  %v473_v60 = vmul.f32 %v5987_v46, %v472_v52  ;;  %1094 = vmatpush.bf16.msra.mxu0 %v4192_v44 }
 0x1b9   :  { %v470_v0 = vsel %vm469_vm5, %v5985_v16, %v466_v59  ;;  %v474_v1 = vmul.f32 0.5, %v473_v60  ;;  %1121 = vmatpush.bf16.msra.mxu2 %v4180_v45  ;;  %v5610_v60 = vld [vmem:[#allocation7 + $0xe4] sm:$0xf] }
 0x1ba   :  { %v481_v3 = vmul.f32 %v470_v0, %v6309_v9  ;;  %v4396_v7 = vor.u32 %v5610_v60, %v4393_v61  ;;  %v5594_v60 = vld [vmem:[#allocation7 + $0x64] sm:$0xf]  ;;  %v4329_v61 = vld [vmem:[#allocation7 + $0x70] sm:$0xf0] }
 0x1bb   :  { %v475_v10 = vsub.f32 1.5, %v474_v1  ;;  %1095 = vmatpush.bf16.msra.mxu0 %v4176_v4 }
 0x1bc   :  { %v483_v11 = vmul.f32 %v481_v3, %v6350_v62  ;;  %v493_v17 = vperm.slane %v481_v3, 4 }
 0x1bd   :  { %v476_v12 = vmul.f32 %v5987_v46, %v475_v10  ;;  %1122 = vmatpush.bf16.msra.mxu2 %v4164_v21  ;;  %v4375_v10 = vld [vmem:[#allocation7 + $0xc0] sm:$0xf] }
 0x1be   :  { %v487_v16 = vrot.slane %v483_v11, 7  ;;  %v495_v62 = vmul.f32 %v493_v17, %v6330_v26  ;;  %v497_v8 = vmul.f32 %v493_v17, %v6332_v39  ;;  %v5608_v11 = vld [vmem:[#allocation7 + $0xcc] sm:$0xf0]  ;;  %v4519_v17 = vld [vmem:[#allocation7 + $0x1e0] sm:$0xf] }
 0x1bf   :  { %v480_v20 = vsel %vm479_vm8, %v5987_v46, %v476_v12  ;;  %1096 = vmatpush.bf16.msra.mxu0 %v4160_v18  ;;  %v5606_v12 = vld [vmem:[#allocation7 + $0xc4] sm:$0xf]  ;;  %v5644_v18 = vld [vmem:[#allocation7 + $0x1ec] sm:$0xf0] }
 0x1c0   :  { %v491_v22 = vsub.f32 %v6309_v9, %v487_v16  ;;  %v482_v23 = vmul.f32 %v480_v20, %v6327_v53 }
 0x1c2   :  { %v499_v24 = vperm.slane %v491_v22, 5  ;;  %v484_v25 = vmul.f32 %v482_v23, %v6354_v35  ;;  %v494_v27 = vperm.slane %v482_v23, 4  ;;  %v5642_v22 = vld [vmem:[#allocation7 + $0x1e4] sm:$0xf]  ;;  %v4521_v23 = vld [vmem:[#allocation7 + $0x1f0] sm:$0xf0] }
 0x1c4   :  { %v501_v28 = vadd.f32 %v499_v24, %v495_v62  ;;  %v503_v29 = vadd.f32 %v499_v24, %v497_v8  ;;  %v488_v30 = vrot.slane %v484_v25, 7  ;;  %v496_v9 = vmul.f32 %v494_v27, %v6340_v54  ;;  %v4359_v24 = vld [vmem:[#allocation7 + $0xa0] sm:$0xf] }
 0x1c5   :  { %v498_v36 = vmul.f32 %v494_v27, %v6342_v6  ;;  %v4376_v62 = vor.u32 %v5608_v11, %v4375_v10  ;;  %v4380_v8 = vor.u32 %v5606_v12, %v4377_v13  ;;  %v4520_v27 = vor.u32 %v5644_v18, %v4519_v17  ;;  %v4311_v11 = vld [vmem:[#allocation7 + $0x40] sm:$0xf]  ;;  %v5592_v13 = vld [vmem:[#allocation7 + $0x4c] sm:$0xf0] }
 0x1c6   :  { %v505_v31 = vrot.slane %v501_v28, 4  ;;  %v517_v32 = vrot.slane %v503_v29, 4  ;;  %v492_v33 = vsub.f32 %v6327_v53, %v488_v30  ;;  %v5602_v30 = vld [vmem:[#allocation7 + $0xa4] sm:$0xf]  ;;  %v4332_v10 = vor.u32 %v5594_v60, %v4329_v61 }
 0x1c8   :  { %v542_v34 = vmax.f32 %v503_v29, %v517_v32  ;;  %v500_v26 = vperm.slane %v492_v33, 5  ;;  %v530_v37 = vmax.f32 %v501_v28, %v505_v31  ;;  %v518_v16 = vadd.f32 %v517_v32, %v503_v29  ;;  %v5604_v29 = vld [vmem:[#allocation7 + $0xac] sm:$0xf0]  ;;  %v4361_v32 = vld [vmem:[#allocation7 + $0xb0] sm:$0xf0] }
 0x1c9   :  { %v506_v19 = vadd.f32 %v505_v31, %v501_v28  ;;  %v4524_v33 = vor.u32 %v5642_v22, %v4521_v23  ;;  %v5626_v23 = vld [vmem:[#allocation7 + $0x164] sm:$0xf] }
 0x1ca   :  { %v543_v39 = vrot.slane %v542_v34, 2  ;;  %v6379_v38 = vadd.f32 %v500_v26, %v496_v9  ;;  %v6381_v35 = vadd.f32 %v500_v26, %v498_v36  ;;  %v531_v40 = vrot.slane %v530_v37, 2  ;;  %v4503_v9 = vld [vmem:[#allocation7 + $0x1c0] sm:$0xf]  ;;  %v5638_v26 = vld [vmem:[#allocation7 + $0x1c4] sm:$0xf] }
 0x1cb   :  { %v519_v28 = vrot.slane %v518_v16, 2  ;;  %v507_v36 = vrot.slane %v506_v19, 2 }
 0x1cc   :  { %v511_v41 = vrot.slane %v6379_v38, 4  ;;  %v523_v42 = vrot.slane %v6381_v35, 4  ;;  %v544_v43 = vmax.f32 %v542_v34, %v543_v39  ;;  %v532_v46 = vmax.f32 %v530_v37, %v531_v40  ;;  %v5640_v34 = vld [vmem:[#allocation7 + $0x1cc] sm:$0xf0]  ;;  %v4505_v37 = vld [vmem:[#allocation7 + $0x1d0] sm:$0xf0] }
 0x1cd   :  { %v4360_v39 = vor.u32 %v5604_v29, %v4359_v24  ;;  %v4364_v40 = vor.u32 %v5602_v30, %v4361_v32  ;;  %v5586_v30 = vld [vmem:[#allocation7 + $0x24] sm:$0xf]  ;;  %v4297_v32 = vld [vmem:[#allocation7 + $0x30] sm:$0xf0] }
 0x1ce   :  { %v548_v53 = vmax.f32 %v6381_v35, %v523_v42  ;;  %v545_v54 = vrot.slane %v544_v43, 1  ;;  %v536_v6 = vmax.f32 %v6379_v38, %v511_v41  ;;  %v533_v48 = vrot.slane %v532_v46, 1 }
 0x1d0   :  { %v549_v49 = vrot.slane %v548_v53, 2  ;;  %v546_v50 = vmax.f32 %v544_v43, %v545_v54  ;;  %v537_v51 = vrot.slane %v536_v6, 2  ;;  %v534_v52 = vmax.f32 %v532_v46, %v533_v48  ;;  %v4343_v43 = vld [vmem:[#allocation7 + $0x80] sm:$0xf]  ;;  %v5600_v54 = vld [vmem:[#allocation7 + $0x8c] sm:$0xf0] }
 0x1d1   :  { %v524_v46 = vadd.f32 %v523_v42, %v6381_v35  ;;  %v4345_v48 = vld [vmem:[#allocation7 + $0x90] sm:$0xf0]  ;;  %v5634_v35 = vld [vmem:[#allocation7 + $0x1a4] sm:$0xf] }
 0x1d2   :  { %v623_v44 = vpack.c.bf16 %v546_v50, %v546_v50  ;;  %v538_v47 = vmax.f32 %v536_v6, %v537_v51  ;;  %v550_v55 = vmax.f32 %v548_v53, %v549_v49  ;;  %v621_v56 = vpack.c.bf16 %v534_v52, %v534_v52  ;;  %v5598_v6 = vld [vmem:[#allocation7 + $0x84] sm:$0xf]  ;;  %v4487_v51 = vld [vmem:[#allocation7 + $0x1a0] sm:$0xf]  ;;  %v4489_v42 = vld [vmem:[#allocation7 + $0x1b0] sm:$0xf0] }
 0x1d3   :  { %v4504_v53 = vor.u32 %v5640_v34, %v4503_v9  ;;  %v512_v49 = vadd.f32 %v511_v41, %v6379_v38  ;;  %v4508_v50 = vor.u32 %v5638_v26, %v4505_v37  ;;  %v508_v52 = vadd.f32 %v507_v36, %v506_v19  ;;  %v4455_v19 = vld [vmem:[#allocation7 + $0x160] sm:$0xf]  ;;  %v5622_v37 = vld [vmem:[#allocation7 + $0x144] sm:$0xf] }
 0x1d4   :  { %v695_v59 = vunpack.c.l.b16 %v623_v44  ;;  %v539_v0 = vrot.slane %v538_v47, 1  ;;  %v551_v1 = vrot.slane %v550_v55, 1  ;;  %v693_v2 = vunpack.c.l.b16 %v621_v56  ;;  %v4439_v34 = vld [vmem:[#allocation7 + $0x140] sm:$0xf] }
 0x1d5   :  { %v520_v44 = vadd.f32 %v519_v28, %v518_v16  ;;  %v4348_v56 = vor.u32 %v5598_v6, %v4345_v48  ;;  %v4492_v41 = vor.u32 %v5634_v35, %v4489_v42  ;;  %v4281_v6 = vld [vmem:[#allocation7 + $0x10] sm:$0xf0]  ;;  %v4399_v48 = vld [vmem:[#allocation7 + $0xe8] sm:$0xf]  ;;  %v4401_v35 = vld [vmem:[#allocation7 + $0xf8] sm:$0xf0] }
 0x1d6   :  { %v540_v63 = vmax.f32 %v538_v47, %v539_v0  ;;  %v552_v3 = vmax.f32 %v550_v55, %v551_v1  ;;  %v698_v4 = vsel %vm697_vm9, %v695_v59, %v693_v2  ;;  %v5636_v47 = vld [vmem:[#allocation7 + $0x1ac] sm:$0xf0]  ;;  %v4344_v55 = vor.u32 %v5600_v54, %v4343_v43  ;;  %v4471_v1 = vld [vmem:[#allocation7 + $0x180] sm:$0xf]  ;;  %v5582_v54 = vld [vmem:[#allocation7 + $0x4] sm:$0xf] }
 0x1d7   :  { %v6392_v45 = vpack.c.b16 %v698_v4, %v698_v4  ;;  %v525_v59 = vrot.slane %v524_v46, 2  ;;  %v513_v0 = vrot.slane %v512_v49, 2  ;;  %v4488_v38 = vor.u32 %v5636_v47, %v4487_v51  ;;  %v5632_v2 = vld [vmem:[#allocation7 + $0x18c] sm:$0xf0]  ;;  %v5630_v4 = vld [vmem:[#allocation7 + $0x184] sm:$0xf] }
 0x1d8   :  { %v622_v14 = vpack.c.bf16 %v540_v63, %v540_v63  ;;  %v624_v15 = vpack.c.bf16 %v552_v3, %v552_v3  ;;  %v509_v63 = vrot.slane %v508_v52, 1  ;;  %v521_v3 = vrot.slane %v520_v44, 1  ;;  %v5611_v47 = vld [vmem:[#allocation7 + $0xec] sm:$0xf]  ;;  %v4423_v42 = vld [vmem:[#allocation7 + $0x120] sm:$0xf] }
 0x1d9   :  { %1032 = vmatmul.bf16.vlgmr.msra.gmra.mxu3 %v6392_v45  ;;  %1058 = vmatmul.bf16.vlgmr.msrb.gmra.mxu1 %v6392_v45  ;;  %v4472_v12 = vor.u32 %v5632_v2, %v4471_v1  ;;  %v514_v16 = vadd.f32 %v513_v0, %v512_v49  ;;  %v526_v17 = vadd.f32 %v525_v59, %v524_v46  ;;  %v4279_v46 = vld [vmem:[#allocation7] sm:$0xf]  ;;  %v5613_v49 = vld [vmem:[#allocation7 + $0xf4] sm:$0xf0]  ;;  %v4425_v59 = vld [vmem:[#allocation7 + $0x130] sm:$0xf0] }
 0x1da   :  { %v694_v20 = vunpack.c.l.b16 %v622_v14  ;;  %v696_v21 = vunpack.c.l.b16 %v624_v15  ;;  %1462 = vmatpush.bf16.msra.mxu3 %v4392_v5  ;;  %1488 = vmatpush.bf16.msrb.mxu1 %v4396_v7  ;;  %v4473_v5 = vld [vmem:[#allocation7 + $0x190] sm:$0xf0]  ;;  %v4328_v7 = vor.u32 %v5596_v58, %v4327_v57  ;;  %v5590_v14 = vld [vmem:[#allocation7 + $0x44] sm:$0xf]  ;;  %v522_v22 = vadd.f32 %v521_v3, %v520_v44  ;;  %v5620_v57 = vld [vmem:[#allocation7 + $0x12c] sm:$0xf0] }
 0x1db   :  { %v4313_v15 = vld [vmem:[#allocation7 + $0x50] sm:$0xf0]  ;;  %v4476_v18 = vor.u32 %v5630_v4, %v4473_v5  ;;  %v515_v28 = vrot.slane %v514_v16, 1  ;;  %v4300_v43 = vor.u32 %v5586_v30, %v4297_v32  ;;  %v5618_v58 = vld [vmem:[#allocation7 + $0x124] sm:$0xf]  ;;  %v4284_v60 = vor.u32 %v5582_v54, %v4281_v6 }
 0x1dc   :  { %v699_v25 = vsel %vm697_vm9, %v696_v21, %v694_v20  ;;  %v5628_v20 = vld [vmem:[#allocation7 + $0x16c] sm:$0xf0]  ;;  %v510_v21 = vadd.f32 %v509_v63, %v508_v52  ;;  %v4316_v24 = vor.u32 %v5590_v14, %v4313_v15  ;;  %v555_v26 = vpack.c.bf16 %v522_v22, %v522_v22  ;;  %v5607_v1 = vld [vmem:[#allocation7 + $0xcc] sm:$0xf]  ;;  %v4527_v14 = vld [vmem:[#allocation7 + $0x1e8] sm:$0xf] }
 0x1dd   :  { %v6397_v31 = vpack.c.b16 %v699_v25, %v699_v25  ;;  %v4295_v25 = vld [vmem:[#allocation7 + $0x20] sm:$0xf]  ;;  %v4456_v29 = vor.u32 %v5628_v20, %v4455_v19  ;;  %v4400_v61 = vor.u32 %v5613_v49, %v4399_v48  ;;  %v4404_v0 = vor.u32 %v5611_v47, %v4401_v35  ;;  %v4511_v32 = vld [vmem:[#allocation7 + $0x1c8] sm:$0xf]  ;;  %v5637_v6 = vld [vmem:[#allocation7 + $0x1b4] sm:$0xf0] }
 0x1de   :  { %1463 = vmatpush.bf16.msra.mxu3 %v4376_v62  ;;  %1489 = vmatpush.bf16.msrb.mxu1 %v4380_v8  ;;  %v4457_v62 = vld [vmem:[#allocation7 + $0x170] sm:$0xf0]  ;;  %v4312_v8 = vor.u32 %v5592_v13, %v4311_v11  ;;  %v553_v36 = vpack.c.bf16 %v510_v21, %v510_v21  ;;  %v4424_v3 = vor.u32 %v5620_v57, %v4423_v42  ;;  %v5616_v11 = vld [vmem:[#allocation7 + $0x10c] sm:$0xf0]  ;;  %v4367_v21 = vld [vmem:[#allocation7 + $0xa8] sm:$0xf] }
 0x1df   :  { %1045 = vmatmul.bf16.vlgmr.msrb.gmra.mxu0 %v6397_v31  ;;  %1071 = vmatmul.bf16.vlgmr.msrb.gmra.mxu2 %v6397_v31  ;;  %v4460_v9 = vor.u32 %v5626_v23, %v4457_v62  ;;  %v4428_v4 = vor.u32 %v5618_v58, %v4425_v59  ;;  %v4409_v13 = vld [vmem:[#allocation7 + $0x110] sm:$0xf0]  ;;  %v5635_v48 = vld [vmem:[#allocation7 + $0x1ac] sm:$0xf]  ;;  %v4497_v49 = vld [vmem:[#allocation7 + $0x1b8] sm:$0xf0] }
 0x1e0   :  { %1475 = vmatpush.bf16.msrb.mxu0 %v4520_v27  ;;  %1501 = vmatpush.bf16.msrb.mxu2 %v4524_v33  ;;  %v5588_v27 = vld [vmem:[#allocation7 + $0x2c] sm:$0xf0]  ;;  %v527_v33 = vrot.slane %v526_v17, 1  ;;  %v5595_v47 = vld [vmem:[#allocation7 + $0x6c] sm:$0xf] }
 0x1e1   :  { %v4337_v35 = vld [vmem:[#allocation7 + $0x78] sm:$0xf0]  ;;  %v5633_v57 = vld [vmem:[#allocation7 + $0x194] sm:$0xf0]  ;;  %v5631_v58 = vld [vmem:[#allocation7 + $0x18c] sm:$0xf] }
 0x1e2   :  { %1464 = vmatpush.bf16.msra.mxu3 %v4360_v39  ;;  %1490 = vmatpush.bf16.msrb.mxu1 %v4364_v40  ;;  %v4441_v39 = vld [vmem:[#allocation7 + $0x150] sm:$0xf0]  ;;  %v4296_v40 = vor.u32 %v5588_v27, %v4295_v25  ;;  %v528_v51 = vadd.f32 %v527_v33, %v526_v17  ;;  %v5643_v17 = vld [vmem:[#allocation7 + $0x1ec] sm:$0xf]  ;;  %v4369_v27 = vld [vmem:[#allocation7 + $0xb8] sm:$0xf0] }
 0x1e3   :  { %v4444_v44 = vor.u32 %v5622_v37, %v4441_v39  ;;  %v5603_v25 = vld [vmem:[#allocation7 + $0xac] sm:$0xf]  ;;  %v5601_v37 = vld [vmem:[#allocation7 + $0x94] sm:$0xf0]  ;;  %v4481_v59 = vld [vmem:[#allocation7 + $0x198] sm:$0xf0] }
 0x1e4   :  { %1476 = vmatpush.bf16.msrb.mxu0 %v4504_v53  ;;  %1502 = vmatpush.bf16.msrb.mxu2 %v4508_v50  ;;  %v5584_v53 = vld [vmem:[#allocation7 + $0xc] sm:$0xf0]  ;;  %v516_v50 = vadd.f32 %v515_v28, %v514_v16  ;;  %v556_v63 = vpack.c.bf16 %v528_v51, %v528_v51  ;;  %v5645_v16 = vld [vmem:[#allocation7 + $0x1f4] sm:$0xf0]  ;;  %v5639_v33 = vld [vmem:[#allocation7 + $0x1cc] sm:$0xf] }
 0x1e5   :  { %v5641_v28 = vld [vmem:[#allocation7 + $0x1d4] sm:$0xf0]  ;;  %v5599_v39 = vld [vmem:[#allocation7 + $0x8c] sm:$0xf] }
 0x1e6   :  { %1465 = vmatpush.bf16.msra.mxu3 %v4344_v55  ;;  %1491 = vmatpush.bf16.msrb.mxu1 %v4348_v56  ;;  %v1132_v55 = vunpack.c.l.b16 %v553_v36  ;;  %v1134_v56 = vunpack.c.l.b16 %v555_v26  ;;  %v554_v2 = vpack.c.bf16 %v516_v50, %v516_v50  ;;  %v1135_v23 = vunpack.c.l.b16 %v556_v63  ;;  %v4463_v63 = vld [vmem:[#allocation7 + $0x168] sm:$0xf] }
 0x1e7   :  { %v4372_v36 = vor.u32 %v5603_v25, %v4369_v27  ;;  %v4289_v25 = vld [vmem:[#allocation7 + $0x18] sm:$0xf0] }
 0x1e8   :  { %1477 = vmatpush.bf16.msrb.mxu0 %v4488_v38  ;;  %1503 = vmatpush.bf16.msrb.mxu2 %v4492_v41  ;;  %v4383_v38 = vld [vmem:[#allocation7 + $0xc8] sm:$0xf]  ;;  %v5609_v41 = vld [vmem:[#allocation7 + $0xd4] sm:$0xf0]  ;;  %v1136_v5 = vsel %vm697_vm9, %v1134_v56, %v1132_v55  ;;  %v1133_v22 = vunpack.c.l.b16 %v554_v2  ;;  %v4500_v55 = vor.u32 %v5635_v48, %v4497_v49  ;;  %v4484_v2 = vor.u32 %v5631_v58, %v4481_v59  ;;  %v5736_v58 = vld [vmem:[#allocation10 + $0xcc] sm:$0xf0] }
 0x1e9   :  { %1084 = vmatmul.bf16.vlgmr.msrb.gmra.mxu3 %v6392_v45  ;;  %1110 = vmatmul.bf16.vlgmr.msra.gmra.mxu1 %v6392_v45  ;;  %v5624_v45 = vld [vmem:[#allocation7 + $0x14c] sm:$0xf0]  ;;  %v4384_v15 = vor.u32 %v5609_v41, %v4383_v38  ;;  %v6412_v19 = vpack.c.b16 %v1136_v5, %v1136_v5  ;;  %v4479_v56 = vld [vmem:[#allocation7 + $0x188] sm:$0xf]  ;;  %v5591_v38 = vld [vmem:[#allocation7 + $0x4c] sm:$0xf] }
 0x1ea   :  { %1466 = vmatpush.bf16.msra.mxu3 %v4328_v7  ;;  %1492 = vmatpush.bf16.msrb.mxu1 %v4332_v10  ;;  %v4440_v52 = vor.u32 %v5624_v45, %v4439_v34  ;;  %v4385_v7 = vld [vmem:[#allocation7 + $0xd8] sm:$0xf0]  ;;  %v4407_v10 = vld [vmem:[#allocation7 + $0x100] sm:$0xf]  ;;  %v1137_v26 = vsel %vm697_vm9, %v1135_v23, %v1133_v22  ;;  %v4351_v45 = vld [vmem:[#allocation7 + $0x88] sm:$0xf] }
 0x1eb   :  { %v4388_v20 = vor.u32 %v5607_v1, %v4385_v7  ;;  %v4408_v62 = vor.u32 %v5616_v11, %v4407_v10  ;;  %v6417_v54 = vpack.c.b16 %v1137_v26, %v1137_v26  ;;  %v4352_v50 = vor.u32 %v5601_v37, %v4351_v45  ;;  %v4321_v41 = vld [vmem:[#allocation7 + $0x58] sm:$0xf0]  ;;  %v4303_v11 = vld [vmem:[#allocation7 + $0x28] sm:$0xf]  ;;  %v5617_v37 = vld [vmem:[#allocation7 + $0x114] sm:$0xf0] }
 0x1ec   :  { %1478 = vmatpush.bf16.msrb.mxu0 %v4472_v12  ;;  %1504 = vmatpush.bf16.msrb.mxu2 %v4476_v18  ;;  %v5614_v12 = vld [vmem:[#allocation7 + $0x104] sm:$0xf]  ;;  %v4529_v18 = vld [vmem:[#allocation7 + $0x1f8] sm:$0xf0]  ;;  %v4480_v1 = vor.u32 %v5633_v57, %v4479_v56  ;;  %v4324_v10 = vor.u32 %v5591_v38, %v4321_v41  ;;  %v4415_v45 = vld [vmem:[#allocation7 + $0x108] sm:$0xf] }
 0x1ed   :  { %v4532_v30 = vor.u32 %v5643_v17, %v4529_v18  ;;  %v4465_v5 = vld [vmem:[#allocation7 + $0x178] sm:$0xf0]  ;;  %v4447_v17 = vld [vmem:[#allocation7 + $0x148] sm:$0xf]  ;;  %v5625_v18 = vld [vmem:[#allocation7 + $0x154] sm:$0xf0] }
 0x1ee   :  { %1467 = vmatpush.bf16.msra.mxu3 %v4312_v8  ;;  %1493 = vmatpush.bf16.msrb.mxu1 %v4316_v24  ;;  %v4412_v8 = vor.u32 %v5614_v12, %v4409_v13  ;;  %v5605_v24 = vld [vmem:[#allocation7 + $0xb4] sm:$0xf0]  ;;  %v5587_v13 = vld [vmem:[#allocation7 + $0x2c] sm:$0xf]  ;;  %v4448_v27 = vor.u32 %v5625_v18, %v4447_v17  ;;  %v4775_v59 = vld [vmem:[#allocation10 + $0x1e0] sm:$0xf] }
 0x1ef   :  { %1097 = vmatmul.bf16.vlgmr.msra.gmra.mxu0 %v6397_v31  ;;  %1123 = vmatmul.bf16.vlgmr.msra.gmra.mxu2 %v6397_v31  ;;  %v4280_v31 = vor.u32 %v5584_v53, %v4279_v46  ;;  %v4368_v34 = vor.u32 %v5605_v24, %v4367_v21  ;;  %v4495_v53 = vld [vmem:[#allocation7 + $0x1a8] sm:$0xf]  ;;  %v5589_v12 = vld [vmem:[#allocation7 + $0x34] sm:$0xf0]  ;;  %v4449_v21 = vld [vmem:[#allocation7 + $0x158] sm:$0xf0] }
 0x1f0   :  { %1479 = vmatpush.bf16.msrb.mxu0 %v4456_v29  ;;  %1505 = vmatpush.bf16.msrb.mxu2 %v4460_v9  ;;  %v4528_v29 = vor.u32 %v5645_v16, %v4527_v14  ;;  %v4513_v9 = vld [vmem:[#allocation7 + $0x1d8] sm:$0xf0]  ;;  %v4496_v42 = vor.u32 %v5637_v6, %v4495_v53  ;;  %v4304_v22 = vor.u32 %v5589_v12, %v4303_v11  ;;  %v5583_v24 = vld [vmem:[#allocation7 + $0xc] sm:$0xf]  ;;  %v5728_v11 = vld [vmem:[#allocation10 + $0x8c] sm:$0xf0] }
 0x1f1   :  { %v4516_v46 = vor.u32 %v5639_v33, %v4513_v9  ;;  %v4305_v14 = vld [vmem:[#allocation7 + $0x38] sm:$0xf0]  ;;  %v4743_v12 = vld [vmem:[#allocation10 + $0x1a0] sm:$0xf] }
 0x1f2   :  { %1468 = vmatpush.bf16.msra.mxu3 %v4296_v40  ;;  %1494 = vmatpush.bf16.msrb.mxu1 %v4300_v43  ;;  %v4353_v40 = vld [vmem:[#allocation7 + $0x98] sm:$0xf0]  ;;  %v4512_v43 = vor.u32 %v5641_v28, %v4511_v32  ;;  %v4308_v23 = vor.u32 %v5587_v13, %v4305_v14  ;;  %v5621_v32 = vld [vmem:[#allocation7 + $0x134] sm:$0xf0]  ;;  %v5619_v28 = vld [vmem:[#allocation7 + $0x12c] sm:$0xf] }
 0x1f3   :  { %v4356_v51 = vor.u32 %v5599_v39, %v4353_v40  ;;  %v4433_v33 = vld [vmem:[#allocation7 + $0x138] sm:$0xf0]  ;;  %v5615_v39 = vld [vmem:[#allocation7 + $0x10c] sm:$0xf]  ;;  %v5764_v14 = vld [vmem:[#allocation10 + $0x1ac] sm:$0xf0] }
 0x1f4   :  { %1480 = vmatpush.bf16.msrb.mxu0 %v4440_v52  ;;  %1506 = vmatpush.bf16.msrb.mxu2 %v4444_v44  ;;  %v4335_v52 = vld [vmem:[#allocation7 + $0x68] sm:$0xf]  ;;  %v5597_v44 = vld [vmem:[#allocation7 + $0x74] sm:$0xf0]  ;;  %v4436_v26 = vor.u32 %v5619_v28, %v4433_v33  ;;  %v4417_v40 = vld [vmem:[#allocation7 + $0x118] sm:$0xf0] }
 0x1f5   :  { %v4567_v33 = vld [vmem:[#allocation10 + $0x40] sm:$0xf] }
 0x1f6   :  { %1469 = vmatpush.bf16.msra.mxu3 %v4280_v31  ;;  %1495 = vmatpush.bf16.msrb.mxu1 %v4284_v60  ;;  %v4336_v31 = vor.u32 %v5597_v44, %v4335_v52  ;;  %v4340_v60 = vor.u32 %v5595_v47, %v4337_v35 }
 0x1f8   :  { %1481 = vmatpush.bf16.msrb.mxu0 %v4424_v3  ;;  %1507 = vmatpush.bf16.msrb.mxu2 %v4428_v4  ;;  %v5629_v3 = vld [vmem:[#allocation7 + $0x174] sm:$0xf0]  ;;  %v5627_v4 = vld [vmem:[#allocation7 + $0x16c] sm:$0xf] }
 0x1f9   :  { %1470 = vmatmul.bf16.vlgmr.msra.gmra.mxu3 %v6412_v19  ;;  %1496 = vmatmul.bf16.vlgmr.msrb.gmra.mxu1 %v6412_v19  ;;  %v4468_v16 = vor.u32 %v5627_v4, %v4465_v5  ;;  %v5768_v4 = vld [vmem:[#allocation10 + $0x1cc] sm:$0xf0] }
 0x1fa   :  { %1514 = vmatpush.bf16.msrb.mxu3 %v4400_v61  ;;  %1540 = vmatpush.bf16.msra.mxu1 %v4404_v0  ;;  %v4319_v61 = vld [vmem:[#allocation7 + $0x48] sm:$0xf]  ;;  %v5593_v0 = vld [vmem:[#allocation7 + $0x54] sm:$0xf0] }
 0x1fb   :  { %v4320_v7 = vor.u32 %v5593_v0, %v4319_v61 }
 0x1fc   :  { %1482 = vmatpush.bf16.msrb.mxu0 %v4408_v62  ;;  %1508 = vmatpush.bf16.msrb.mxu2 %v4412_v8  ;;  %v4287_v62 = vld [vmem:[#allocation7 + $0x8] sm:$0xf]  ;;  %v5585_v8 = vld [vmem:[#allocation7 + $0x14] sm:$0xf0] }
 0x1fd   :  { %v4288_v9 = vor.u32 %v5585_v8, %v4287_v62  ;;  %v6433_v8 = vld [vmem:[#allocation13] sm:$0xff] }
 0x1fe   :  { %1515 = vmatpush.bf16.msrb.mxu3 %v4384_v15  ;;  %1541 = vmatpush.bf16.msra.mxu1 %v4388_v20  ;;  %v4464_v15 = vor.u32 %v5629_v3, %v4463_v63  ;;  %v5623_v20 = vld [vmem:[#allocation7 + $0x14c] sm:$0xf]  ;;  %v4759_v63 = vld [vmem:[#allocation10 + $0x1c0] sm:$0xf] }
 0x1ff   :  { %1483 = vmatmul.bf16.vlgmr.msrb.gmra.mxu0 %v6417_v54  ;;  %1509 = vmatmul.bf16.vlgmr.msrb.gmra.mxu2 %v6417_v54 }
 0x200   :  { %1527 = vmatpush.bf16.msra.mxu0 %v4528_v29  ;;  %1553 = vmatpush.bf16.msra.mxu2 %v4532_v30  ;;  %v4452_v29 = vor.u32 %v5623_v20, %v4449_v21  ;;  %v4431_v30 = vld [vmem:[#allocation7 + $0x128] sm:$0xf]  ;;  %v4583_v20 = vld [vmem:[#allocation10 + $0x60] sm:$0xf]  ;;  %v5724_v21 = vld [vmem:[#allocation10 + $0x6c] sm:$0xf0] }
 0x202   :  { %1516 = vmatpush.bf16.msrb.mxu3 %v4368_v34  ;;  %1542 = vmatpush.bf16.msra.mxu1 %v4372_v36  ;;  %v4292_v34 = vor.u32 %v5583_v24, %v4289_v25  ;;  %v4432_v36 = vor.u32 %v5621_v32, %v4431_v30  ;;  %v1566_v24 = vperm.slane %v6433_v8, 6  ;;  %v4584_v25 = vor.u32 %v5724_v21, %v4583_v20  ;;  %v5744_v20 = vld [vmem:[#allocation10 + $0x10c] sm:$0xf0] }
 0x204   :  { %1528 = vmatpush.bf16.msra.mxu0 %v4512_v43  ;;  %1554 = vmatpush.bf16.msra.mxu2 %v4516_v46  ;;  %v4416_v43 = vor.u32 %v5617_v37, %v4415_v45  ;;  %v4420_v46 = vor.u32 %v5615_v39, %v4417_v40  ;;  %v5756_v45 = vld [vmem:[#allocation10 + $0x16c] sm:$0xf0]  ;;  %v6436_v39 = vld [vmem:[#allocation13 + $0x8] sm:$0xff] }
 0x205   :  { %v1567_v40 = vperm.slane %v6436_v39, 6 }
 0x206   :  { %1517 = vmatpush.bf16.msrb.mxu3 %v4352_v50  ;;  %1543 = vmatpush.bf16.msra.mxu1 %v4356_v51 }
 0x208   :  { %1529 = vmatpush.bf16.msra.mxu0 %v4496_v42  ;;  %1555 = vmatpush.bf16.msra.mxu2 %v4500_v55  ;;  %v5740_v55 = vld [vmem:[#allocation10 + $0xec] sm:$0xf0] }
 0x20a   :  { %1518 = vmatpush.bf16.msrb.mxu3 %v4336_v31  ;;  %1544 = vmatpush.bf16.msra.mxu1 %v4340_v60  ;;  %v5772_v60 = vld [vmem:[#allocation10 + $0x1ec] sm:$0xf0] }
 0x20b   :  { %v4776_v0 = vor.u32 %v5772_v60, %v4775_v59  ;;  %v4535_v60 = vld [vmem:[#allocation10] sm:$0xf] }
 0x20c   :  { %1530 = vmatpush.bf16.msra.mxu0 %v4480_v1  ;;  %1556 = vmatpush.bf16.msra.mxu2 %v4484_v2  ;;  %v4615_v1 = vld [vmem:[#allocation10 + $0xa0] sm:$0xf]  ;;  %v5732_v2 = vld [vmem:[#allocation10 + $0xac] sm:$0xf0] }
 0x20d   :  { %v4616_v3 = vor.u32 %v5732_v2, %v4615_v1 }
 0x20e   :  { %1519 = vmatpush.bf16.msrb.mxu3 %v4320_v7  ;;  %1545 = vmatpush.bf16.msra.mxu1 %v4324_v10  ;;  %v4760_v7 = vor.u32 %v5768_v4, %v4759_v63  ;;  %v4599_v10 = vld [vmem:[#allocation10 + $0x80] sm:$0xf] }
 0x20f   :  { %v4600_v13 = vor.u32 %v5728_v11, %v4599_v10  ;;  %v4903_v4 = vld [vmem:[#allocation10 + $0x2e0] sm:$0xf]  ;;  %v5804_v11 = vld [vmem:[#allocation10 + $0x2ec] sm:$0xf0] }
 0x210   :  { %1531 = vmatpush.bf16.msra.mxu0 %v4464_v15  ;;  %1557 = vmatpush.bf16.msra.mxu2 %v4468_v16  ;;  %v4744_v16 = vor.u32 %v5764_v14, %v4743_v12  ;;  %v5738_v12 = vld [vmem:[#allocation10 + $0xe4] sm:$0xf] }
 0x212   :  { %1520 = vmatpush.bf16.msrb.mxu3 %v4304_v22  ;;  %1546 = vmatpush.bf16.msra.mxu1 %v4308_v23  ;;  %v4727_v22 = vld [vmem:[#allocation10 + $0x180] sm:$0xf] }
 0x214   :  { %1532 = vmatpush.bf16.msra.mxu0 %v4448_v27  ;;  %1558 = vmatpush.bf16.msra.mxu2 %v4452_v29  ;;  %v5760_v27 = vld [vmem:[#allocation10 + $0x18c] sm:$0xf0] }
 0x215   :  { %v4728_v30 = vor.u32 %v5760_v27, %v4727_v22  ;;  %v4904_v22 = vor.u32 %v5804_v11, %v4903_v4  ;;  %v5792_v11 = vld [vmem:[#allocation10 + $0x28c] sm:$0xf0] }
 0x216   :  { %1521 = vmatpush.bf16.msrb.mxu3 %v4288_v9  ;;  %1547 = vmatpush.bf16.msra.mxu1 %v4292_v34  ;;  %v5720_v9 = vld [vmem:[#allocation10 + $0x4c] sm:$0xf0]  ;;  %v4711_v34 = vld [vmem:[#allocation10 + $0x160] sm:$0xf] }
 0x218   :  { %1533 = vmatpush.bf16.msra.mxu0 %v4432_v36  ;;  %1559 = vmatpush.bf16.msra.mxu2 %v4436_v26  ;;  %v4568_v26 = vor.u32 %v5720_v9, %v4567_v33 }
 0x219   :  { %1522 = vmatmul.bf16.vlgmr.msrb.gmra.mxu3 %v6412_v19  ;;  %1548 = vmatmul.bf16.vlgmr.msra.gmra.mxu1 %v6412_v19  ;;  %v4647_v19 = vld [vmem:[#allocation10 + $0xe0] sm:$0xf] }
 0x21a   :  { %v4648_v56 = vor.u32 %v5740_v55, %v4647_v19  ;;  %v5752_v55 = vld [vmem:[#allocation10 + $0x14c] sm:$0xf0]  ;;  %2549 = vmatpush.bf16.msrb.mxu1 %v4904_v22 }
 0x21c   :  { %1534 = vmatpush.bf16.msra.mxu0 %v4416_v43  ;;  %1560 = vmatpush.bf16.msra.mxu2 %v4420_v46  ;;  %v4712_v43 = vor.u32 %v5756_v45, %v4711_v34  ;;  %v4633_v45 = vld [vmem:[#allocation10 + $0xd0] sm:$0xf0] }
 0x21d   :  { %2523 = vmatpush.bf16.msra.mxu3 %v4648_v56 }
 0x21f   :  { %1535 = vmatmul.bf16.vlgmr.msra.gmra.mxu0 %v6417_v54  ;;  %1561 = vmatmul.bf16.vlgmr.msra.gmra.mxu2 %v6417_v54  ;;  %v4631_v54 = vld [vmem:[#allocation10 + $0xc0] sm:$0xf] }
 0x220   :  { %v4632_v31 = vor.u32 %v5736_v58, %v4631_v54  ;;  %2536 = vmatpush.bf16.msrb.mxu0 %v4776_v0 }
 0x222   :  { %2524 = vmatpush.bf16.msra.mxu3 %v4632_v31 }
 0x224   :  { %2537 = vmatpush.bf16.msrb.mxu0 %v4760_v7 }
 0x226   :  { %2525 = vmatpush.bf16.msra.mxu3 %v4616_v3  ;;  %v5748_v3 = vld [vmem:[#allocation10 + $0x12c] sm:$0xf0] }
 0x228   :  { %2538 = vmatpush.bf16.msrb.mxu0 %v4744_v16 }
 0x22a   :  { %2526 = vmatpush.bf16.msra.mxu3 %v4600_v13  ;;  %v4649_v13 = vld [vmem:[#allocation10 + $0xf0] sm:$0xf0] }
 0x22c   :  { %2539 = vmatpush.bf16.msrb.mxu0 %v4728_v30 }
 0x22e   :  { %2527 = vmatpush.bf16.msra.mxu3 %v4584_v25  ;;  %v5800_v25 = vld [vmem:[#allocation10 + $0x2cc] sm:$0xf0] }
 0x230   :  { %2540 = vmatpush.bf16.msrb.mxu0 %v4712_v43 }
 0x232   :  { %2528 = vmatpush.bf16.msra.mxu3 %v4568_v26  ;;  %v5734_v26 = vld [vmem:[#allocation10 + $0xc4] sm:$0xf] }
 0x233   :  { %v4636_v43 = vor.u32 %v5734_v26, %v4633_v45  ;;  %v5788_v45 = vld [vmem:[#allocation10 + $0x26c] sm:$0xf0] }
 0x256   :  { %v1059_v53 = vpop.f32.mrf.mxu1 }
 0x25c   :  { %v1033_v6 = vpop.f32.mrf.mxu3  ;;  %v1046_v48 = vpop.f32.mrf.mxu0 }
 0x25d   :  { %v1047_v17 = vadd.f32 %v1046_v48, %v1033_v6 }
 0x25e   :  { %v1061_v49 = vpop.f32.mrf.mxu1 }
 0x262   :  { %v1072_v50 = vpop.f32.mrf.mxu2 }
 0x263   :  { %v1073_v28 = vadd.f32 %v1072_v50, %v1059_v53  ;;  %v4551_v53 = vld [vmem:[#allocation10 + $0x20] sm:$0xf]  ;;  %v5716_v50 = vld [vmem:[#allocation10 + $0x2c] sm:$0xf0] }
 0x264   :  { %v1035_v51 = vpop.f32.mrf.mxu3  ;;  %v1048_v52 = vpop.f32.mrf.mxu0  ;;  %v4552_v19 = vor.u32 %v5716_v50, %v4551_v53  ;;  %v4871_v50 = vld [vmem:[#allocation10 + $0x2a0] sm:$0xf] }
 0x265   :  { %v4695_v51 = vld [vmem:[#allocation10 + $0x140] sm:$0xf] }
 0x266   :  { %v6425_v44 = vpop.f32.mrf.mxu1  ;;  %2529 = vmatpush.bf16.msra.mxu3 %v4552_v19 }
 0x26a   :  { %v1074_v47 = vpop.f32.mrf.mxu2 }
 0x26c   :  { %v6427_v35 = vpop.f32.mrf.mxu3  ;;  %v6429_v42 = vpop.f32.mrf.mxu0 }
 0x26e   :  { %v1113_v57 = vpop.f32.mrf.mxu1 }
 0x26f   :  { %v4696_v57 = vor.u32 %v5752_v55, %v4695_v51  ;;  %v5796_v51 = vld [vmem:[#allocation10 + $0x2ac] sm:$0xf0]  ;;  %v5015_v55 = vld [vmem:[#allocation10 + $0x3c0] sm:$0xf] }
 0x271   :  { %2541 = vmatpush.bf16.msrb.mxu0 %v4696_v57 }
 0x272   :  { %v6431_v61 = vpop.f32.mrf.mxu2 }
 0x274   :  { %v1087_v38 = vpop.f32.mrf.mxu3  ;;  %v1100_v41 = vpop.f32.mrf.mxu0 }
 0x275   :  { %v5712_v38 = vld [vmem:[#allocation10 + $0xc] sm:$0xf0]  ;;  %v4679_v41 = vld [vmem:[#allocation10 + $0x120] sm:$0xf] }
 0x276   :  { %v1497_v5 = vpop.f32.mrf.mxu1  ;;  %v4536_v7 = vor.u32 %v5712_v38, %v4535_v60  ;;  %v4680_v10 = vor.u32 %v5748_v3, %v4679_v41  ;;  %v5730_v60 = vld [vmem:[#allocation10 + $0xa4] sm:$0xf]  ;;  %v4761_v3 = vld [vmem:[#allocation10 + $0x1d0] sm:$0xf0] }
 0x277   :  { %v1498_v37 = vadd.f32 %v1497_v5, %v1073_v28  ;;  %v5836_v28 = vld [vmem:[#allocation10 + $0x3ec] sm:$0xf0] }
 0x278   :  { %2530 = vmatpush.bf16.msra.mxu3 %v4536_v7  ;;  %2542 = vmatpush.bf16.msrb.mxu0 %v4680_v10  ;;  %v4855_v10 = vld [vmem:[#allocation10 + $0x280] sm:$0xf] }
 0x27a   :  { %v1126_v15 = vpop.f32.mrf.mxu2 }
 0x27c   :  { %v1471_v18 = vpop.f32.mrf.mxu3  ;;  %v1484_v62 = vpop.f32.mrf.mxu0 }
 0x27d   :  { %v1472_v23 = vadd.f32 %v1471_v18, %v1047_v17  ;;  %v4663_v18 = vld [vmem:[#allocation10 + $0x100] sm:$0xf] }
 0x27e   :  { %v1499_v29 = vpop.f32.mrf.mxu1 }
 0x27f   :  { %v1485_v32 = vadd.f32 %v1484_v62, %v1472_v23  ;;  %v4652_v23 = vor.u32 %v5738_v12, %v4649_v13  ;;  %v4664_v62 = vor.u32 %v5744_v20, %v4663_v18  ;;  %v6461_v20 = vld [vmem:[#allocation13 + $0x18] sm:$0xff] }
 0x281   :  { %v1570_v36 = vadd.f32 %v1566_v24, %v1485_v32  ;;  %v4887_v24 = vld [vmem:[#allocation10 + $0x2c0] sm:$0xf]  ;;  %2575 = vmatpush.bf16.msrb.mxu3 %v4652_v23  ;;  %2543 = vmatpush.bf16.msrb.mxu0 %v4664_v62  ;;  %v5726_v23 = vld [vmem:[#allocation10 + $0x84] sm:$0xf]  ;;  %v4601_v62 = vld [vmem:[#allocation10 + $0x90] sm:$0xf0] }
 0x282   :  { %v1510_v6 = vpop.f32.mrf.mxu2  ;;  %v5031_v32 = vld [vmem:[#allocation10 + $0x3e0] sm:$0xf]  ;;  %v4888_v34 = vor.u32 %v5800_v25, %v4887_v24  ;;  %v1099_v24 = vadd.f32 %v6429_v42, %v6427_v35  ;;  %v1569_v35 = vperm.slane %v6461_v20, 6  ;;  %v5824_v42 = vld [vmem:[#allocation10 + $0x38c] sm:$0xf0] }
 0x283   :  { %v1574_v46 = vmul.f32 0.01, %v1570_v36  ;;  %v1511_v48 = vadd.f32 %v1510_v6, %v1498_v37  ;;  %v4777_v6 = vld [vmem:[#allocation10 + $0x1f0] sm:$0xf0] }
 0x284   :  { %v1473_v49 = vpop.f32.mrf.mxu3  ;;  %v1486_v47 = vpop.f32.mrf.mxu0  ;;  %2550 = vmatpush.bf16.msrb.mxu1 %v4888_v34 }
 0x285   :  { %v6439_v52 = vmax.f32 %v1570_v36, %v1574_v46  ;;  %v1571_v56 = vadd.f32 %v1567_v40, %v1511_v48  ;;  %v5032_v36 = vor.u32 %v5836_v28, %v5031_v32  ;;  %v5770_v46 = vld [vmem:[#allocation10 + $0x1e4] sm:$0xf]  ;;  %2576 = vmatpush.bf16.msrb.mxu3 %v4636_v43  ;;  %v4839_v32 = vld [vmem:[#allocation10 + $0x260] sm:$0xf] }
 0x286   :  { %v4780_v53 = vor.u32 %v5770_v46, %v4777_v6  ;;  %v5722_v46 = vld [vmem:[#allocation10 + $0x64] sm:$0xf] }
 0x287   :  { %v1582_v54 = vmul.f32 %v6439_v52, %v6439_v52  ;;  %v1587_v58 = vsel %vm1586_vm10, %v6439_v52, 0.0  ;;  %v1575_v31 = vmul.f32 0.01, %v1571_v56  ;;  %2562 = vmatpush.bf16.msrb.mxu2 %v5032_v36 }
 0x288   :  { %v1588_v59 = vrot.slane %v1587_v58, 4  ;;  %2588 = vmatpush.bf16.msra.mxu0 %v4780_v53  ;;  %v4840_v53 = vor.u32 %v5788_v45, %v4839_v32  ;;  %v4553_v32 = vld [vmem:[#allocation10 + $0x30] sm:$0xf0] }
 0x289   :  { %v1615_v0 = vsel %vm1586_vm10, %v1582_v54, 0.0  ;;  %v6446_v63 = vmax.f32 %v1571_v56, %v1575_v31  ;;  %v5832_v56 = vld [vmem:[#allocation10 + $0x3cc] sm:$0xf0] }
 0x28a   :  { %v1589_v1 = vadd.f32 %v1588_v59, %v1587_v58  ;;  %v1616_v2 = vrot.slane %v1615_v0, 4  ;;  %v1512_v5 = vpop.f32.mrf.mxu2  ;;  %v4872_v59 = vor.u32 %v5796_v51, %v4871_v50  ;;  %v5016_v31 = vor.u32 %v5832_v56, %v5015_v55  ;;  %v4585_v51 = vld [vmem:[#allocation10 + $0x70] sm:$0xf0] }
 0x28b   :  { %v1583_v16 = vmul.f32 %v6446_v63, %v6446_v63  ;;  %v1594_v17 = vsel %vm1586_vm10, %v6446_v63, 0.0 }
 0x28c   :  { %v1590_v14 = vrot.slane %v1589_v1, 2  ;;  %v1617_v15 = vadd.f32 %v1616_v2, %v1615_v0  ;;  %v1595_v21 = vrot.slane %v1594_v17, 4  ;;  %v4617_v0 = vld [vmem:[#allocation10 + $0xb0] sm:$0xf0]  ;;  %v5766_v2 = vld [vmem:[#allocation10 + $0x1c4] sm:$0xf]  ;;  %2563 = vmatpush.bf16.msrb.mxu2 %v5016_v31  ;;  %2551 = vmatpush.bf16.msrb.mxu1 %v4872_v59 }
 0x28d   :  { %v1622_v30 = vsel %vm1586_vm10, %v1583_v16, 0.0  ;;  %v4764_v7 = vor.u32 %v5766_v2, %v4761_v3  ;;  %v5828_v16 = vld [vmem:[#allocation10 + $0x3ac] sm:$0xf0]  ;;  %v4823_v59 = vld [vmem:[#allocation10 + $0x240] sm:$0xf] }
 0x28e   :  { %v1591_v27 = vadd.f32 %v1590_v14, %v1589_v1  ;;  %v1618_v29 = vrot.slane %v1617_v15, 2  ;;  %v1596_v33 = vadd.f32 %v1595_v21, %v1594_v17  ;;  %v1623_v9 = vrot.slane %v1622_v30, 4  ;;  %v6459_v14 = vld [vmem:[#allocation13 + $0x10] sm:$0xff] }
 0x28f   :  { %v4620_v1 = vor.u32 %v5730_v60, %v4617_v0  ;;  %v4856_v21 = vor.u32 %v5792_v11, %v4855_v10  ;;  %2589 = vmatpush.bf16.msra.mxu0 %v4764_v7  ;;  %v1568_v36 = vperm.slane %v6459_v14, 6  ;;  %v5784_v0 = vld [vmem:[#allocation10 + $0x24c] sm:$0xf0] }
 0x290   :  { %v1592_v37 = vrot.slane %v1591_v27, 1  ;;  %v1619_v40 = vadd.f32 %v1618_v29, %v1617_v15  ;;  %v1597_v48 = vrot.slane %v1596_v33, 2  ;;  %v1624_v49 = vadd.f32 %v1623_v9, %v1622_v30  ;;  %v4999_v15 = vld [vmem:[#allocation10 + $0x3a0] sm:$0xf]  ;;  %v5762_v29 = vld [vmem:[#allocation10 + $0x1a4] sm:$0xf] }
 0x291   :  { %2577 = vmatpush.bf16.msrb.mxu3 %v4620_v1  ;;  %v5000_v22 = vor.u32 %v5828_v16, %v4999_v15  ;;  %v4745_v30 = vld [vmem:[#allocation10 + $0x1b0] sm:$0xf0]  ;;  %2552 = vmatpush.bf16.msrb.mxu1 %v4856_v21  ;;  %v5820_v1 = vld [vmem:[#allocation10 + $0x36c] sm:$0xf0]  ;;  %v4824_v10 = vor.u32 %v5784_v0, %v4823_v59 }
 0x292   :  { %v1593_v47 = vadd.f32 %v1592_v37, %v1591_v27  ;;  %v1620_v19 = vrot.slane %v1619_v40, 1  ;;  %v1598_v57 = vadd.f32 %v1597_v48, %v1596_v33  ;;  %v1625_v54 = vrot.slane %v1624_v49, 2  ;;  %v4983_v37 = vld [vmem:[#allocation10 + $0x380] sm:$0xf]  ;;  %v5780_v21 = vld [vmem:[#allocation10 + $0x22c] sm:$0xf0] }
 0x293   :  { %v4604_v27 = vor.u32 %v5726_v23, %v4601_v62  ;;  %2564 = vmatpush.bf16.msrb.mxu2 %v5000_v22  ;;  %v4748_v26 = vor.u32 %v5762_v29, %v4745_v30  ;;  %v4984_v50 = vor.u32 %v5824_v42, %v4983_v37  ;;  %v4951_v62 = vld [vmem:[#allocation10 + $0x340] sm:$0xf]  ;;  %v5714_v30 = vld [vmem:[#allocation10 + $0x24] sm:$0xf] }
 0x294   :  { %v1621_v38 = vadd.f32 %v1620_v19, %v1619_v40  ;;  %v6455_v41 = vmul.f32 0.5, %v1593_v47  ;;  %v1599_v4 = vrot.slane %v1598_v57, 1  ;;  %v1626_v5 = vadd.f32 %v1625_v54, %v1624_v49  ;;  %v5758_v47 = vld [vmem:[#allocation10 + $0x184] sm:$0xf]  ;;  %v4729_v54 = vld [vmem:[#allocation10 + $0x190] sm:$0xf0] }
 0x295   :  { %2578 = vmatpush.bf16.msrb.mxu3 %v4604_v27  ;;  %v1125_v19 = vadd.f32 %v6431_v61, %v6425_v44  ;;  %2590 = vmatpush.bf16.msra.mxu0 %v4748_v26  ;;  %v4732_v60 = vor.u32 %v5758_v47, %v4729_v54  ;;  %v4569_v44 = vld [vmem:[#allocation10 + $0x50] sm:$0xf0]  ;;  %v5754_v61 = vld [vmem:[#allocation10 + $0x164] sm:$0xf] }
 0x296   :  { %v6453_v58 = vpop.f32.mrf.mxu1  ;;  %v1647_v12 = vmul.f32 0.5, %v1621_v38  ;;  %v1651_v13 = vmul.f32 %v6455_v41, %v6455_v41  ;;  %v1600_v17 = vadd.f32 %v1599_v4, %v1598_v57  ;;  %v1627_v18 = vrot.slane %v1626_v5, 1  ;;  %v4967_v38 = vld [vmem:[#allocation10 + $0x360] sm:$0xf]  ;;  %v5718_v4 = vld [vmem:[#allocation10 + $0x44] sm:$0xf]  ;;  %2553 = vmatpush.bf16.msrb.mxu1 %v4840_v53 }
 0x297   :  { %v4588_v57 = vor.u32 %v5722_v46, %v4585_v51  ;;  %2565 = vmatpush.bf16.msrb.mxu2 %v4984_v50  ;;  %v1550_v2 = vadd.f32 %v6453_v58, %v1125_v19  ;;  %v4968_v11 = vor.u32 %v5820_v1, %v4967_v38  ;;  %v5812_v51 = vld [vmem:[#allocation10 + $0x32c] sm:$0xf0]  ;;  %v5710_v47 = vld [vmem:[#allocation10 + $0x4] sm:$0xf] }
 0x298   :  { %v1655_v25 = vsub.f32 %v1647_v12, %v1651_v13  ;;  %v1628_v28 = vadd.f32 %v1627_v18, %v1626_v5  ;;  %v6465_v33 = vmul.f32 0.5, %v1600_v17  ;;  %v4572_v12 = vor.u32 %v5718_v4, %v4569_v44  ;;  %v4713_v13 = vld [vmem:[#allocation10 + $0x170] sm:$0xf0]  ;;  %v4807_v18 = vld [vmem:[#allocation10 + $0x220] sm:$0xf] }
 0x299   :  { %2579 = vmatpush.bf16.msrb.mxu3 %v4588_v57  ;;  %2591 = vmatpush.bf16.msra.mxu0 %v4732_v60  ;;  %v4716_v17 = vor.u32 %v5754_v61, %v4713_v13  ;;  %v5746_v60 = vld [vmem:[#allocation10 + $0x124] sm:$0xf] }
 0x29a   :  { %v1659_v40 = vmax.f32 %v1655_v25, 0.0  ;;  %v1648_v6 = vmul.f32 0.5, %v1628_v28  ;;  %v1652_v48 = vmul.f32 %v6465_v33, %v6465_v33  ;;  %v5750_v28 = vld [vmem:[#allocation10 + $0x144] sm:$0xf]  ;;  %2554 = vmatpush.bf16.msrb.mxu1 %v4824_v10  ;;  %v4905_v10 = vld [vmem:[#allocation10 + $0x2f0] sm:$0xf0] }
 0x29b   :  { %2566 = vmatpush.bf16.msrb.mxu2 %v4968_v11 }
 0x29c   :  { %v1523_v9 = vpop.f32.mrf.mxu3  ;;  %v1536_v34 = vpop.f32.mrf.mxu0  ;;  %v6473_v55 = vadd.f32 1e-05, %v1659_v40  ;;  %v1656_v31 = vsub.f32 %v1648_v6, %v1652_v48  ;;  %v5776_v6 = vld [vmem:[#allocation10 + $0x20c] sm:$0xf0]  ;;  %v4935_v48 = vld [vmem:[#allocation10 + $0x320] sm:$0xf] }
 0x29d   :  { %v1524_v43 = vadd.f32 %v1523_v9, %v1099_v24  ;;  %v5816_v24 = vld [vmem:[#allocation10 + $0x34c] sm:$0xf0]  ;;  %2580 = vmatpush.bf16.msrb.mxu3 %v4572_v12  ;;  %v4808_v9 = vor.u32 %v5780_v21, %v4807_v18  ;;  %2592 = vmatpush.bf16.msra.mxu0 %v4716_v17  ;;  %v4936_v59 = vor.u32 %v5812_v51, %v4935_v48  ;;  %v4919_v21 = vld [vmem:[#allocation10 + $0x300] sm:$0xf] }
 0x29e   :  { %v1551_v49 = vpop.f32.mrf.mxu1  ;;  %5988 = vrsqrt.f32 %v6473_v55  ;;  %v1660_v5 = vmax.f32 %v1656_v31, 0.0  ;;  %v4952_v29 = vor.u32 %v5816_v24, %v4951_v62  ;;  %v4537_v31 = vld [vmem:[#allocation10 + $0x10] sm:$0xf0]  ;;  %vm1673_vm11 = vweird.f32 %v6473_v55 }
 0x29f   :  { %v1537_v56 = vadd.f32 %v1536_v34, %v1524_v43  ;;  %v4556_v34 = vor.u32 %v5714_v30, %v4553_v32  ;;  %2555 = vmatpush.bf16.msrb.mxu1 %v4808_v9  ;;  %v4540_v1 = vor.u32 %v5710_v47, %v4537_v31  ;;  %v6518_v31 = vld [vmem:[#allocation13 + $0x20] sm:$0xff] }
 0x2a0   :  { %v6477_v22 = vadd.f32 1e-05, %v1660_v5  ;;  %2567 = vmatpush.bf16.msrb.mxu2 %v4952_v29  ;;  %v4665_v29 = vld [vmem:[#allocation10 + $0x110] sm:$0xf0] }
 0x2a1   :  { %v1572_v3 = vadd.f32 %v1568_v36, %v1537_v56  ;;  %v4697_v36 = vld [vmem:[#allocation10 + $0x150] sm:$0xf0]  ;;  %2581 = vmatpush.bf16.msrb.mxu3 %v4556_v34  ;;  %v5798_v34 = vld [vmem:[#allocation10 + $0x2c4] sm:$0xf] }
 0x2a2   :  { %v1562_v7 = vpop.f32.mrf.mxu2  ;;  %5990 = vrsqrt.f32 %v6477_v22  ;;  %v4700_v43 = vor.u32 %v5750_v28, %v4697_v36  ;;  %v4889_v36 = vld [vmem:[#allocation10 + $0x2d0] sm:$0xf0]  ;;  %vm1683_vm15 = vweird.f32 %v6477_v22 }
 0x2a3   :  { %v1576_v15 = vmul.f32 0.01, %v1572_v3  ;;  %v1563_v16 = vadd.f32 %v1562_v7, %v1550_v2  ;;  %v4681_v2 = vld [vmem:[#allocation10 + $0x130] sm:$0xf0] }
 0x2a4   :  { %v1525_v58 = vpop.f32.mrf.mxu3  ;;  %v1538_v23 = vpop.f32.mrf.mxu0  ;;  %2593 = vmatpush.bf16.msra.mxu0 %v4700_v43  ;;  %2568 = vmatpush.bf16.msrb.mxu2 %v4936_v59  ;;  %v4684_v13 = vor.u32 %v5746_v60, %v4681_v2 }
 0x2a5   :  { %v6479_v25 = vmax.f32 %v1572_v3, %v1576_v15  ;;  %v1573_v27 = vadd.f32 %v1569_v35, %v1563_v16  ;;  %v6482_v26 = vpop.eup %5988  ;;  %v4791_v35 = vld [vmem:[#allocation10 + $0x200] sm:$0xf]  ;;  %v5802_v3 = vld [vmem:[#allocation10 + $0x2e4] sm:$0xf]  ;;  %2582 = vmatpush.bf16.msrb.mxu3 %v4540_v1  ;;  %v5808_v58 = vld [vmem:[#allocation10 + $0x30c] sm:$0xf0] }
 0x2a6   :  { %v1668_v42 = vmul.f32 %v6482_v26, %v6473_v55  ;;  %v4792_v50 = vor.u32 %v5776_v6, %v4791_v35  ;;  %vm1674_vm12 = vweird.f32 %v6482_v26  ;;  %v4908_v24 = vor.u32 %v5802_v3, %v4905_v10  ;;  %v5834_v35 = vld [vmem:[#allocation10 + $0x3e4] sm:$0xf] }
 0x2a7   :  { %v1584_v45 = vmul.f32 %v6479_v25, %v6479_v25  ;;  %v1601_v37 = vsel %vm1586_vm10, %v6479_v25, 0.0  ;;  %v1577_v40 = vmul.f32 0.01, %v1573_v27  ;;  %vm1675_vm14 = vmor %vm1673_vm11, %vm1674_vm12  ;;  %v4892_v55 = vor.u32 %v5798_v34, %v4889_v36  ;;  %v5830_v3 = vld [vmem:[#allocation10 + $0x3c4] sm:$0xf] }
 0x2a8   :  { %v1602_v46 = vrot.slane %v1601_v37, 4  ;;  %v1669_v19 = vmul.f32 %v6482_v26, %v1668_v42  ;;  %v6499_v4 = vpop.eup %5990  ;;  %2556 = vmatpush.bf16.msrb.mxu1 %v4792_v50  ;;  %2594 = vmatpush.bf16.msra.mxu0 %v4684_v13  ;;  %v5033_v42 = vld [vmem:[#allocation10 + $0x3f0] sm:$0xf0] }
 0x2a9   :  { %v1629_v49 = vsel %vm1586_vm10, %v1584_v45, 0.0  ;;  %v6491_v53 = vmax.f32 %v1573_v27, %v1577_v40  ;;  %v1678_v11 = vmul.f32 %v6499_v4, %v6477_v22  ;;  %vm1684_vm13 = vweird.f32 %v6499_v4  ;;  %v5742_v27 = vld [vmem:[#allocation10 + $0x104] sm:$0xf] }
 0x2aa   :  { %v1603_v56 = vadd.f32 %v1602_v46, %v1601_v37  ;;  %v1630_v57 = vrot.slane %v1629_v49, 4  ;;  %v1564_v54 = vpop.f32.mrf.mxu2  ;;  %v1670_v44 = vmul.f32 0.5, %v1669_v19  ;;  %v4920_v40 = vor.u32 %v5808_v58, %v4919_v21  ;;  %vm1685_vm0 = vmor %vm1683_vm15, %vm1684_vm13  ;;  %v4857_v21 = vld [vmem:[#allocation10 + $0x290] sm:$0xf0] }
 0x2ab   :  { %v1585_v0 = vmul.f32 %v6491_v53, %v6491_v53  ;;  %v1608_v38 = vsel %vm1586_vm10, %v6491_v53, 0.0  ;;  %v1679_v23 = vmul.f32 %v6499_v4, %v1678_v11  ;;  %v4668_v43 = vor.u32 %v5742_v27, %v4665_v29 }
 0x2ac   :  { %v1604_v61 = vrot.slane %v1603_v56, 2  ;;  %v1631_v5 = vadd.f32 %v1630_v57, %v1629_v49  ;;  %v1609_v7 = vrot.slane %v1608_v38, 4  ;;  %v1671_v15 = vsub.f32 1.5, %v1670_v44  ;;  %2601 = vmatpush.bf16.msra.mxu1 %v4908_v24  ;;  %2569 = vmatpush.bf16.msrb.mxu2 %v4920_v40  ;;  %v5017_v44 = vld [vmem:[#allocation10 + $0x3d0] sm:$0xf0] }
 0x2ad   :  { %v1636_v12 = vsel %vm1586_vm10, %v1585_v0, 0.0  ;;  %v1680_v45 = vmul.f32 0.5, %v1679_v23  ;;  %2595 = vmatpush.bf16.msra.mxu0 %v4668_v43  ;;  %v5036_v54 = vor.u32 %v5834_v35, %v5033_v42  ;;  %v4873_v0 = vld [vmem:[#allocation10 + $0x2b0] sm:$0xf0] }
 0x2ae   :  { %v1605_v16 = vadd.f32 %v1604_v61, %v1603_v56  ;;  %v1632_v17 = vrot.slane %v1631_v5, 2  ;;  %v1610_v18 = vadd.f32 %v1609_v7, %v1608_v38  ;;  %v1637_v62 = vrot.slane %v1636_v12, 4  ;;  %v5001_v24 = vld [vmem:[#allocation10 + $0x3b0] sm:$0xf0] }
 0x2af   :  { %v1672_v30 = vmul.f32 %v6482_v26, %v1671_v15  ;;  %v1681_v51 = vsub.f32 1.5, %v1680_v45  ;;  %v4655_v15 = vld [vmem:[#allocation10 + $0xe8] sm:$0xf]  ;;  %v4985_v42 = vld [vmem:[#allocation10 + $0x390] sm:$0xf0] }
 0x2b0   :  { %v1606_v32 = vrot.slane %v1605_v16, 1  ;;  %v1633_v28 = vadd.f32 %v1632_v17, %v1631_v5  ;;  %v1611_v9 = vrot.slane %v1610_v18, 2  ;;  %v1638_v37 = vadd.f32 %v1637_v62, %v1636_v12  ;;  %2602 = vmatpush.bf16.msra.mxu1 %v4892_v55  ;;  %2614 = vmatpush.bf16.msra.mxu2 %v5036_v54 }
 0x2b1   :  { %v1676_v46 = vsel %vm1675_vm14, %v6482_v26, %v1672_v30  ;;  %v1682_v59 = vmul.f32 %v6499_v4, %v1681_v51  ;;  %v5020_v17 = vor.u32 %v5830_v3, %v5017_v44  ;;  %v4783_v51 = vld [vmem:[#allocation10 + $0x1e8] sm:$0xf]  ;;  %v5733_v44 = vld [vmem:[#allocation10 + $0xb4] sm:$0xf0] }
 0x2b2   :  { %v1607_v6 = vadd.f32 %v1606_v32, %v1605_v16  ;;  %v1634_v48 = vrot.slane %v1633_v28, 1  ;;  %v1612_v49 = vadd.f32 %v1611_v9, %v1610_v18  ;;  %v1707_v50 = vmul.f32 %v6433_v8, %v1676_v46  ;;  %v5794_v8 = vld [vmem:[#allocation10 + $0x2a4] sm:$0xf]  ;;  %v5741_v32 = vld [vmem:[#allocation10 + $0xf4] sm:$0xf0] }
 0x2b3   :  { %v1639_v47 = vrot.slane %v1638_v37, 2  ;;  %v1686_v61 = vsel %vm1685_vm0, %v6499_v4, %v1682_v59  ;;  %v4876_v16 = vor.u32 %v5794_v8, %v4873_v0  ;;  %v5790_v18 = vld [vmem:[#allocation10 + $0x284] sm:$0xf]  ;;  %v6532_v4 = vld [vmem:[#allocation13 + $0x28] sm:$0xff]  ;;  %v4969_v0 = vld [vmem:[#allocation10 + $0x370] sm:$0xf0] }
 0x2b4   :  { %v1635_v19 = vadd.f32 %v1634_v48, %v1633_v28  ;;  %v6514_v56 = vmul.f32 0.5, %v1607_v6  ;;  %v1613_v57 = vrot.slane %v1612_v49, 1  ;;  %v1711_v60 = vmul.f32 %v1707_v50, %v6455_v41  ;;  %2615 = vmatpush.bf16.msra.mxu2 %v5020_v17  ;;  %v5786_v28 = vld [vmem:[#allocation10 + $0x264] sm:$0xf]  ;;  %v4639_v6 = vld [vmem:[#allocation10 + $0xc8] sm:$0xf] }
 0x2b5   :  { %v1640_v26 = vadd.f32 %v1639_v47, %v1638_v37  ;;  %v1731_v22 = vperm.slane %v1707_v50, 7  ;;  %v1708_v41 = vmul.f32 %v6436_v39, %v1686_v61  ;;  %v5826_v39 = vld [vmem:[#allocation10 + $0x3a4] sm:$0xf]  ;;  %2603 = vmatpush.bf16.msra.mxu1 %v4876_v16  ;;  %v4860_v45 = vor.u32 %v5790_v18, %v4857_v21  ;;  %v4841_v37 = vld [vmem:[#allocation10 + $0x270] sm:$0xf0] }
 0x2b6   :  { %v1649_v38 = vmul.f32 0.5, %v1635_v19  ;;  %v1653_v1 = vmul.f32 %v6514_v56, %v6514_v56  ;;  %v1614_v2 = vadd.f32 %v1613_v57, %v1612_v49  ;;  %v1719_v7 = vrot.slane %v1711_v60, 7  ;;  %v5737_v48 = vld [vmem:[#allocation10 + $0xd4] sm:$0xf0]  ;;  %v5782_v59 = vld [vmem:[#allocation10 + $0x244] sm:$0xf] }
 0x2b7   :  { %v1641_v5 = vrot.slane %v1640_v26, 1  ;;  %v1712_v62 = vmul.f32 %v1708_v41, %v6465_v33  ;;  %v1735_v27 = vmul.f32 %v1731_v22, %v6439_v52  ;;  %v1732_v9 = vperm.slane %v1708_v41, 7  ;;  %v5822_v33 = vld [vmem:[#allocation10 + $0x384] sm:$0xf]  ;;  %v5773_v47 = vld [vmem:[#allocation10 + $0x1f4] sm:$0xf0] }
 0x2b8   :  { %v1657_v10 = vsub.f32 %v1649_v38, %v1653_v1  ;;  %v6527_v11 = vmul.f32 0.5, %v1614_v2  ;;  %v1727_v13 = vsub.f32 %v6518_v31, %v1719_v7  ;;  %v5004_v35 = vor.u32 %v5826_v39, %v5001_v24  ;;  %v5818_v8 = vld [vmem:[#allocation10 + $0x364] sm:$0xf]  ;;  %v4623_v3 = vld [vmem:[#allocation10 + $0xa8] sm:$0xf] }
 0x2b9   :  { %v1642_v12 = vadd.f32 %v1641_v5, %v1640_v26  ;;  %v1720_v36 = vrot.slane %v1712_v62, 7  ;;  %v4656_v52 = vor.u32 %v5741_v32, %v4655_v15  ;;  %2604 = vmatpush.bf16.msra.mxu1 %v4860_v45  ;;  %v4844_v55 = vor.u32 %v5786_v28, %v4841_v37  ;;  %v4825_v26 = vld [vmem:[#allocation10 + $0x250] sm:$0xf0]  ;;  %v4767_v22 = vld [vmem:[#allocation10 + $0x1c8] sm:$0xf] }
 0x2ba   :  { %v1661_v58 = vmax.f32 %v1657_v10, 0.0  ;;  %v1654_v23 = vmul.f32 %v6527_v11, %v6527_v11  ;;  %v1739_v30 = vperm.slane %v1727_v13, 0  ;;  %2616 = vmatpush.bf16.msra.mxu2 %v5004_v35  ;;  %v4988_v19 = vor.u32 %v5822_v33, %v4985_v42  ;;  %v5769_v7 = vld [vmem:[#allocation10 + $0x1d4] sm:$0xf0]  ;;  %v5778_v10 = vld [vmem:[#allocation10 + $0x224] sm:$0xf] }
 0x2bb   :  { %v1650_v29 = vmul.f32 0.5, %v1642_v12  ;;  %v1728_v46 = vsub.f32 %v6532_v4, %v1720_v36  ;;  %v1736_v57 = vmul.f32 %v1732_v9, %v6446_v63  ;;  %v4640_v1 = vor.u32 %v5737_v48, %v4639_v6  ;;  %v4809_v12 = vld [vmem:[#allocation10 + $0x230] sm:$0xf0]  ;;  %v5814_v15 = vld [vmem:[#allocation10 + $0x344] sm:$0xf] }
 0x2bc   :  { %v6536_v34 = vadd.f32 1e-05, %v1661_v58  ;;  %v1743_v43 = vadd.f32 %v1739_v30, %v1735_v27  ;;  %v4784_v2 = vor.u32 %v5773_v47, %v4783_v51  ;;  %v4828_v63 = vor.u32 %v5782_v59, %v4825_v26  ;;  %v4953_v16 = vld [vmem:[#allocation10 + $0x350] sm:$0xf0]  ;;  %v4607_v58 = vld [vmem:[#allocation10 + $0x88] sm:$0xf] }
 0x2bd   :  { %v1658_v40 = vsub.f32 %v1650_v29, %v1654_v23  ;;  %v1740_v54 = vperm.slane %v1728_v46, 0  ;;  %2605 = vmatpush.bf16.msra.mxu1 %v4844_v55  ;;  %v4972_v41 = vor.u32 %v5818_v8, %v4969_v0  ;;  %v4624_v17 = vor.u32 %v5733_v44, %v4623_v3  ;;  %v5729_v23 = vld [vmem:[#allocation10 + $0x94] sm:$0xf0]  ;;  %v4751_v62 = vld [vmem:[#allocation10 + $0x1a8] sm:$0xf] }
 0x2be   :  { %5992 = vrsqrt.f32 %v6536_v34  ;;  %v6540_v50 = vpack.c.bf16 %v1743_v43, %v1743_v43  ;;  %2617 = vmatpush.bf16.msra.mxu2 %v4988_v19  ;;  %v4768_v21 = vor.u32 %v5769_v7, %v4767_v22  ;;  %v4812_v39 = vor.u32 %v5778_v10, %v4809_v12  ;;  %v5765_v24 = vld [vmem:[#allocation10 + $0x1b4] sm:$0xf0]  ;;  %v5774_v29 = vld [vmem:[#allocation10 + $0x204] sm:$0xf]  ;;  %v4793_v30 = vld [vmem:[#allocation10 + $0x210] sm:$0xf0] }
 0x2bf   :  { %v1662_v49 = vmax.f32 %v1658_v40, 0.0  ;;  %v1744_v38 = vadd.f32 %v1740_v54, %v1736_v57  ;;  %v4956_v27 = vor.u32 %v5814_v15, %v4953_v16  ;;  %v5810_v9 = vld [vmem:[#allocation10 + $0x324] sm:$0xf]  ;;  %v4937_v36 = vld [vmem:[#allocation10 + $0x330] sm:$0xf0]  ;;  %v4608_v37 = vor.u32 %v5729_v23, %v4607_v58 }
 0x2c0   :  { %2531 = vmatmul.bf16.vlgmr.msra.gmra.mxu3 %v6540_v50  ;;  %v4752_v43 = vor.u32 %v5765_v24, %v4751_v62  ;;  %v4591_v35 = vld [vmem:[#allocation10 + $0x68] sm:$0xf]  ;;  %v5725_v33 = vld [vmem:[#allocation10 + $0x74] sm:$0xf0]  ;;  %v4796_v42 = vor.u32 %v5774_v29, %v4793_v30  ;;  %v4940_v48 = vor.u32 %v5810_v9, %v4937_v36  ;;  %vm1693_vm2 = vweird.f32 %v6536_v34  ;;  %v5806_v51 = vld [vmem:[#allocation10 + $0x304] sm:$0xf] }
 0x2c1   :  { %v6543_v60 = vadd.f32 1e-05, %v1662_v49  ;;  %2627 = vmatpush.bf16.msra.mxu3 %v4656_v52  ;;  %v6547_v5 = vpack.c.bf16 %v1744_v38, %v1744_v38  ;;  %2606 = vmatpush.bf16.msra.mxu1 %v4828_v63  ;;  %v4735_v46 = vld [vmem:[#allocation10 + $0x188] sm:$0xf]  ;;  %v5761_v6 = vld [vmem:[#allocation10 + $0x194] sm:$0xf0]  ;;  %v4592_v19 = vor.u32 %v5725_v33, %v4591_v35 }
 0x2c2   :  { %2618 = vmatpush.bf16.msra.mxu2 %v4972_v41  ;;  %v4921_v47 = vld [vmem:[#allocation10 + $0x310] sm:$0xf0]  ;;  %v4736_v54 = vor.u32 %v5761_v6, %v4735_v46  ;;  %v4575_v59 = vld [vmem:[#allocation10 + $0x48] sm:$0xf]  ;;  %v5721_v26 = vld [vmem:[#allocation10 + $0x54] sm:$0xf0] }
 0x2c3   :  { %5994 = vrsqrt.f32 %v6543_v60  ;;  %2544 = vmatmul.bf16.vlgmr.msrb.gmra.mxu0 %v6547_v5  ;;  %v4719_v38 = vld [vmem:[#allocation10 + $0x168] sm:$0xf]  ;;  %vm1703_vm5 = vweird.f32 %v6543_v60  ;;  %v4576_v44 = vor.u32 %v5721_v26, %v4575_v59  ;;  %v6558_v22 = vld [vmem:[#allocation13 + $0x30] sm:$0xff]  ;;  %v5749_v23 = vld [vmem:[#allocation10 + $0x134] sm:$0xf0] }
 0x2c4   :  { %v5993_v61 = vpop.eup %5992  ;;  %2640 = vmatpush.bf16.msrb.mxu0 %v4784_v2  ;;  %v4559_v63 = vld [vmem:[#allocation10 + $0x28] sm:$0xf] }
 0x2c5   :  { %v1688_v13 = vmul.f32 %v5993_v61, %v6536_v34  ;;  %2628 = vmatpush.bf16.msra.mxu3 %v4640_v1  ;;  %vm1694_vm1 = vweird.f32 %v5993_v61  ;;  %2607 = vmatpush.bf16.msra.mxu1 %v4812_v39  ;;  %v5757_v1 = vld [vmem:[#allocation10 + $0x174] sm:$0xf0]  ;;  %v4924_v34 = vor.u32 %v5806_v51, %v4921_v47  ;;  %v4703_v12 = vld [vmem:[#allocation10 + $0x148] sm:$0xf]  ;;  %v4641_v51 = vld [vmem:[#allocation10 + $0xd8] sm:$0xf0] }
 0x2c6   :  { %2619 = vmatpush.bf16.msra.mxu2 %v4956_v27  ;;  %vm1695_vm3 = vmor %vm1693_vm2, %vm1694_vm1  ;;  %v4543_v16 = vld [vmem:[#allocation10 + $0x8] sm:$0xf]  ;;  %v5805_v27 = vld [vmem:[#allocation10 + $0x2f4] sm:$0xf0] }
 0x2c7   :  { %v1689_v18 = vmul.f32 %v5993_v61, %v1688_v13  ;;  %v5753_v13 = vld [vmem:[#allocation10 + $0x154] sm:$0xf0]  ;;  %v4687_v58 = vld [vmem:[#allocation10 + $0x128] sm:$0xf]  ;;  %v5771_v47 = vld [vmem:[#allocation10 + $0x1ec] sm:$0xf] }
 0x2c8   :  { %2641 = vmatpush.bf16.msrb.mxu0 %v4768_v21  ;;  %v5713_v21 = vld [vmem:[#allocation10 + $0x14] sm:$0xf0]  ;;  %v4911_v24 = vld [vmem:[#allocation10 + $0x2e8] sm:$0xf] }
 0x2c9   :  { %v5995_v32 = vpop.eup %5994  ;;  %v1690_v28 = vmul.f32 0.5, %v1689_v18  ;;  %2629 = vmatpush.bf16.msra.mxu3 %v4624_v17  ;;  %2608 = vmatpush.bf16.msra.mxu1 %v4796_v42  ;;  %v4704_v18 = vor.u32 %v5753_v13, %v4703_v12  ;;  %v4544_v36 = vor.u32 %v5713_v21, %v4543_v16  ;;  %v4895_v33 = vld [vmem:[#allocation10 + $0x2c8] sm:$0xf]  ;;  %v5801_v42 = vld [vmem:[#allocation10 + $0x2d4] sm:$0xf0] }
 0x2ca   :  { %v1698_v45 = vmul.f32 %v5995_v32, %v6543_v60  ;;  %vm1704_vm4 = vweird.f32 %v5995_v32  ;;  %2620 = vmatpush.bf16.msra.mxu2 %v4940_v48  ;;  %v5837_v48 = vld [vmem:[#allocation10 + $0x3f4] sm:$0xf0]  ;;  %v4879_v26 = vld [vmem:[#allocation10 + $0x2a8] sm:$0xf]  ;;  %v5763_v16 = vld [vmem:[#allocation10 + $0x1ac] sm:$0xf] }
 0x2cb   :  { %v1691_v40 = vsub.f32 1.5, %v1690_v28  ;;  %vm1705_vm6 = vmor %vm1703_vm5, %vm1704_vm4  ;;  %v4657_v28 = vld [vmem:[#allocation10 + $0xf8] sm:$0xf0]  ;;  %v5007_v13 = vld [vmem:[#allocation10 + $0x3a8] sm:$0xf]  ;;  %vm3895_vm4 = vcmask 1045508  }
 0x2cc   :  { %v1699_v52 = vmul.f32 %v5995_v32, %v1698_v45  ;;  %2642 = vmatpush.bf16.msrb.mxu0 %v4752_v43  ;;  %v4912_v45 = vor.u32 %v5805_v27, %v4911_v24  ;;  %v5745_v43 = vld [vmem:[#allocation10 + $0x114] sm:$0xf0]  ;;  %v4991_v24 = vld [vmem:[#allocation10 + $0x388] sm:$0xf] }
 0x2cd   :  { %v1692_v49 = vmul.f32 %v5993_v61, %v1691_v40  ;;  %2630 = vmatpush.bf16.msra.mxu3 %v4608_v37  ;;  %v4671_v40 = vld [vmem:[#allocation10 + $0x108] sm:$0xf]  ;;  %v5825_v27 = vld [vmem:[#allocation10 + $0x394] sm:$0xf0] }
 0x2ce   :  { %v1700_v55 = vmul.f32 0.5, %v1699_v52  ;;  %2621 = vmatpush.bf16.msra.mxu2 %v4924_v34  ;;  %v5039_v52 = vld [vmem:[#allocation10 + $0x3e8] sm:$0xf]  ;;  %v5833_v34 = vld [vmem:[#allocation10 + $0x3d4] sm:$0xf0] }
 0x2cf   :  { %v1696_v57 = vsel %vm1695_vm3, %v5993_v61, %v1692_v49  ;;  %v5717_v61 = vld [vmem:[#allocation10 + $0x34] sm:$0xf0]  ;;  %v5735_v49 = vld [vmem:[#allocation10 + $0xcc] sm:$0xf]  ;;  %v5040_v59 = vor.u32 %v5837_v48, %v5039_v52 }
 0x2d0   :  { %v1709_v8 = vmul.f32 %v1696_v57, %v6459_v14  ;;  %v1701_v0 = vsub.f32 1.5, %v1700_v55  ;;  %2583 = vmatmul.bf16.vlgmr.msrb.gmra.mxu3 %v6540_v50  ;;  %2643 = vmatpush.bf16.msrb.mxu0 %v4736_v54  ;;  %v4720_v14 = vor.u32 %v5757_v1, %v4719_v38  ;;  %v4560_v60 = vor.u32 %v5717_v61, %v4559_v63  ;;  %v4785_v55 = vld [vmem:[#allocation10 + $0x1f8] sm:$0xf0]  ;;  %v5023_v1 = vld [vmem:[#allocation10 + $0x3c8] sm:$0xf] }
 0x2d1   :  { %2631 = vmatpush.bf16.msra.mxu3 %v4592_v19  ;;  %v4672_v57 = vor.u32 %v5745_v43, %v4671_v40  ;;  %v4896_v54 = vor.u32 %v5801_v42, %v4895_v33  ;;  %v4788_v38 = vor.u32 %v5771_v47, %v4785_v55  ;;  %v5024_v61 = vor.u32 %v5833_v34, %v5023_v1  ;;  %v4975_v43 = vld [vmem:[#allocation10 + $0x368] sm:$0xf]  ;;  %v5719_v33 = vld [vmem:[#allocation10 + $0x4c] sm:$0xf]  ;;  %v4577_v42 = vld [vmem:[#allocation10 + $0x58] sm:$0xf0] }
 0x2d2   :  { %v1713_v2 = vmul.f32 %v1709_v8, %v6514_v56  ;;  %v1702_v3 = vmul.f32 %v5995_v32, %v1701_v0  ;;  %v1733_v41 = vperm.slane %v1709_v8, 7  ;;  %v5797_v8 = vld [vmem:[#allocation10 + $0x2b4] sm:$0xf0]  ;;  %v5755_v52 = vld [vmem:[#allocation10 + $0x16c] sm:$0xf]  ;;  %v4580_v47 = vor.u32 %v5719_v33, %v4577_v42 }
 0x2d3   :  { %2596 = vmatmul.bf16.vlgmr.msra.gmra.mxu0 %v6547_v5  ;;  %v4880_v63 = vor.u32 %v5797_v8, %v4879_v26  ;;  %v5751_v26 = vld [vmem:[#allocation10 + $0x14c] sm:$0xf]  ;;  %v4705_v8 = vld [vmem:[#allocation10 + $0x158] sm:$0xf0]  ;;  %v4799_v1 = vld [vmem:[#allocation10 + $0x208] sm:$0xf] }
 0x2d4   :  { %v1721_v7 = vrot.slane %v1713_v2, 7  ;;  %v1706_v10 = vsel %vm1705_vm6, %v5995_v32, %v1702_v3  ;;  %2644 = vmatpush.bf16.msrb.mxu0 %v4720_v14  ;;  %v1737_v62 = vmul.f32 %v1733_v41, %v6479_v25  ;;  %v5739_v32 = vld [vmem:[#allocation10 + $0xec] sm:$0xf]  ;;  %v4625_v3 = vld [vmem:[#allocation10 + $0xb8] sm:$0xf0] }
 0x2d5   :  { %v1710_v56 = vmul.f32 %v1706_v10, %v6461_v20  ;;  %2632 = vmatpush.bf16.msra.mxu3 %v4576_v44  ;;  %v6565_v20 = vld [vmem:[#allocation13 + $0x38] sm:$0xff]  ;;  %v4660_v35 = vor.u32 %v5739_v32, %v4657_v28  ;;  %v5731_v2 = vld [vmem:[#allocation10 + $0xac] sm:$0xf] }
 0x2d6   :  { %v1729_v15 = vsub.f32 %v6558_v22, %v1721_v7  ;;  %v5767_v44 = vld [vmem:[#allocation10 + $0x1cc] sm:$0xf]  ;;  %v4769_v14 = vld [vmem:[#allocation10 + $0x1d8] sm:$0xf0]  ;;  %v4863_v7 = vld [vmem:[#allocation10 + $0x288] sm:$0xf]  ;;  %v4628_v10 = vor.u32 %v5731_v2, %v4625_v3  ;;  %v4708_v3 = vor.u32 %v5751_v26, %v4705_v8 }
 0x2d7   :  { %v1714_v17 = vmul.f32 %v1710_v56, %v6527_v11  ;;  %v1734_v30 = vperm.slane %v1710_v56, 7  ;;  %v4688_v11 = vor.u32 %v5749_v23, %v4687_v58  ;;  %v5793_v41 = vld [vmem:[#allocation10 + $0x294] sm:$0xf0]  ;;  %v4772_v12 = vor.u32 %v5767_v44, %v4769_v14  ;;  %v4847_v58 = vld [vmem:[#allocation10 + $0x268] sm:$0xf] }
 0x2d8   :  { %v1741_v39 = vperm.slane %v1729_v15, 0  ;;  %2645 = vmatpush.bf16.msrb.mxu0 %v4704_v18  ;;  %v5829_v56 = vld [vmem:[#allocation10 + $0x3b4] sm:$0xf0]  ;;  %v4609_v15 = vld [vmem:[#allocation10 + $0x98] sm:$0xf0]  ;;  %v4864_v18 = vor.u32 %v5793_v41, %v4863_v7 }
 0x2d9   :  { %v1722_v29 = vrot.slane %v1714_v17, 7  ;;  %2633 = vmatpush.bf16.msra.mxu3 %v4560_v60  ;;  %v1738_v46 = vmul.f32 %v1734_v30, %v6491_v53  ;;  %v4644_v53 = vor.u32 %v5735_v49, %v4641_v51  ;;  %v5727_v60 = vld [vmem:[#allocation10 + $0x8c] sm:$0xf]  ;;  %v4753_v17 = vld [vmem:[#allocation10 + $0x1b8] sm:$0xf0]  ;;  %v5008_v21 = vor.u32 %v5829_v56, %v5007_v13 }
 0x2da   :  { %v1745_v9 = vadd.f32 %v1741_v39, %v1737_v62  ;;  %v5789_v23 = vld [vmem:[#allocation10 + $0x274] sm:$0xf0]  ;;  %v4612_v62 = vor.u32 %v5727_v60, %v4609_v15  ;;  %v4756_v39 = vor.u32 %v5763_v16, %v4753_v17  ;;  %v4593_v30 = vld [vmem:[#allocation10 + $0x78] sm:$0xf0]  ;;  %v5759_v32 = vld [vmem:[#allocation10 + $0x18c] sm:$0xf] }
 0x2db   :  { %v1730_v37 = vsub.f32 %v6565_v20, %v1722_v29  ;;  %v5723_v29 = vld [vmem:[#allocation10 + $0x6c] sm:$0xf]  ;;  %v4737_v28 = vld [vmem:[#allocation10 + $0x198] sm:$0xf0]  ;;  %v4815_v49 = vld [vmem:[#allocation10 + $0x228] sm:$0xf] }
 0x2dc   :  { %v6568_v25 = vpack.c.bf16 %v1745_v9, %v1745_v9  ;;  %2646 = vmatpush.bf16.msrb.mxu0 %v4688_v11  ;;  %v4848_v9 = vor.u32 %v5789_v23, %v4847_v58  ;;  %v4831_v11 = vld [vmem:[#allocation10 + $0x248] sm:$0xf]  ;;  %v4740_v40 = vor.u32 %v5759_v32, %v4737_v28  ;;  %v5781_v51 = vld [vmem:[#allocation10 + $0x234] sm:$0xf0]  ;;  %v5747_v7 = vld [vmem:[#allocation10 + $0x12c] sm:$0xf] }
 0x2dd   :  { %v1742_v6 = vperm.slane %v1730_v37, 0  ;;  %2634 = vmatpush.bf16.msra.mxu3 %v4544_v36  ;;  %v4992_v36 = vor.u32 %v5825_v27, %v4991_v24  ;;  %v4596_v37 = vor.u32 %v5723_v29, %v4593_v30  ;;  %v5777_v34 = vld [vmem:[#allocation10 + $0x214] sm:$0xf0]  ;;  %v4943_v44 = vld [vmem:[#allocation10 + $0x328] sm:$0xf] }
 0x2de   :  { %2557 = vmatmul.bf16.vlgmr.msrb.gmra.mxu1 %v6568_v25  ;;  %v5813_v14 = vld [vmem:[#allocation10 + $0x334] sm:$0xf0]  ;;  %v4689_v41 = vld [vmem:[#allocation10 + $0x138] sm:$0xf0]  ;;  %v4800_v13 = vor.u32 %v5777_v34, %v4799_v1  ;;  %v4927_v16 = vld [vmem:[#allocation10 + $0x308] sm:$0xf] }
 0x2df   :  { %2653 = vmatpush.bf16.msrb.mxu1 %v4912_v45  ;;  %v1746_v19 = vadd.f32 %v1742_v6, %v1738_v46  ;;  %v5785_v45 = vld [vmem:[#allocation10 + $0x254] sm:$0xf0]  ;;  %v4721_v46 = vld [vmem:[#allocation10 + $0x178] sm:$0xf0]  ;;  %v4944_v56 = vor.u32 %v5813_v14, %v4943_v44  ;;  %v4692_v15 = vor.u32 %v5747_v7, %v4689_v41  ;;  %v5835_v23 = vld [vmem:[#allocation10 + $0x3ec] sm:$0xf] }
 0x2e0   :  { %2635 = vmatmul.bf16.vlgmr.msra.gmra.mxu3 %v6540_v50  ;;  %2647 = vmatpush.bf16.msrb.mxu0 %v4672_v57  ;;  %v4832_v6 = vor.u32 %v5785_v45, %v4831_v11  ;;  %v4724_v55 = vor.u32 %v5755_v52, %v4721_v46  ;;  %v5817_v57 = vld [vmem:[#allocation10 + $0x354] sm:$0xf0]  ;;  %v4673_v58 = vld [vmem:[#allocation10 + $0x118] sm:$0xf0]  ;;  %v5831_v28 = vld [vmem:[#allocation10 + $0x3cc] sm:$0xf] }
 0x2e1   :  { %2679 = vmatpush.bf16.msrb.mxu3 %v4660_v35  ;;  %v6572_v0 = vpack.c.bf16 %v1746_v19, %v1746_v19  ;;  %v5821_v35 = vld [vmem:[#allocation10 + $0x374] sm:$0xf0]  ;;  %v4959_v19 = vld [vmem:[#allocation10 + $0x348] sm:$0xf]  ;;  %v4897_v24 = vld [vmem:[#allocation10 + $0x2d8] sm:$0xf0] }
 0x2e2   :  { %v4976_v48 = vor.u32 %v5821_v35, %v4975_v43  ;;  %v5809_v17 = vld [vmem:[#allocation10 + $0x314] sm:$0xf0]  ;;  %v4881_v11 = vld [vmem:[#allocation10 + $0x2b8] sm:$0xf0]  ;;  %v5791_v35 = vld [vmem:[#allocation10 + $0x28c] sm:$0xf] }
 0x2e3   :  { %2570 = vmatmul.bf16.vlgmr.msrb.gmra.mxu2 %v6572_v0  ;;  %2654 = vmatpush.bf16.msrb.mxu1 %v4896_v54  ;;  %v5715_v54 = vld [vmem:[#allocation10 + $0x2c] sm:$0xf]  ;;  %v4928_v27 = vor.u32 %v5809_v17, %v4927_v16  ;;  %v5009_v43 = vld [vmem:[#allocation10 + $0x3b8] sm:$0xf0] }
 0x2e4   :  { %2666 = vmatpush.bf16.msrb.mxu2 %v5040_v59  ;;  %2692 = vmatpush.bf16.msra.mxu0 %v4788_v38  ;;  %v4561_v59 = vld [vmem:[#allocation10 + $0x38] sm:$0xf0]  ;;  %v4960_v38 = vor.u32 %v5817_v57, %v4959_v19  ;;  %v5823_v46 = vld [vmem:[#allocation10 + $0x38c] sm:$0xf] }
 0x2e5   :  { %2680 = vmatpush.bf16.msrb.mxu3 %v4644_v53  ;;  %2648 = vmatmul.bf16.vlgmr.msrb.gmra.mxu0 %v6547_v5  ;;  %v4816_v53 = vor.u32 %v5781_v51, %v4815_v49  ;;  %v4564_v2 = vor.u32 %v5715_v54, %v4561_v59  ;;  %v4865_v33 = vld [vmem:[#allocation10 + $0x298] sm:$0xf0]  ;;  %v5783_v19 = vld [vmem:[#allocation10 + $0x24c] sm:$0xf] }
 0x2e6   :  { %v4868_v52 = vor.u32 %v5791_v35, %v4865_v33  ;;  %v4833_v57 = vld [vmem:[#allocation10 + $0x258] sm:$0xf0]  ;;  %v5815_v59 = vld [vmem:[#allocation10 + $0x34c] sm:$0xf] }
 0x2e7   :  { %2655 = vmatpush.bf16.msrb.mxu1 %v4880_v63  ;;  %v5711_v63 = vld [vmem:[#allocation10 + $0xc] sm:$0xf]  ;;  %v4961_v26 = vld [vmem:[#allocation10 + $0x358] sm:$0xf0] }
 0x2e8   :  { %2667 = vmatpush.bf16.msrb.mxu2 %v5024_v61  ;;  %2693 = vmatpush.bf16.msra.mxu0 %v4772_v12  ;;  %v4545_v61 = vld [vmem:[#allocation10 + $0x18] sm:$0xf0]  ;;  %v5779_v8 = vld [vmem:[#allocation10 + $0x22c] sm:$0xf] }
 0x2e9   :  { %2681 = vmatpush.bf16.msrb.mxu3 %v4628_v10  ;;  %v5803_v10 = vld [vmem:[#allocation10 + $0x2ec] sm:$0xf]  ;;  %v4913_v12 = vld [vmem:[#allocation10 + $0x2f8] sm:$0xf0]  ;;  %v4548_v60 = vor.u32 %v5711_v63, %v4545_v61 }
 0x2ea   :  { %v5811_v34 = vld [vmem:[#allocation10 + $0x32c] sm:$0xf]  ;;  %v4801_v44 = vld [vmem:[#allocation10 + $0x218] sm:$0xf0] }
 0x2eb   :  { %2656 = vmatpush.bf16.msrb.mxu1 %v4864_v18  ;;  %v5743_v18 = vld [vmem:[#allocation10 + $0x10c] sm:$0xf]  ;;  %v4929_v7 = vld [vmem:[#allocation10 + $0x318] sm:$0xf0] }
 0x2ec   :  { %2668 = vmatpush.bf16.msrb.mxu2 %v5008_v21  ;;  %2694 = vmatpush.bf16.msra.mxu0 %v4756_v39  ;;  %v4916_v21 = vor.u32 %v5803_v10, %v4913_v12  ;;  %v5799_v39 = vld [vmem:[#allocation10 + $0x2cc] sm:$0xf]  ;;  %v4676_v29 = vor.u32 %v5743_v18, %v4673_v58  ;;  %v5864_v58 = vld [vmem:[#allocation11 + $0xcc] sm:$0xf0] }
 0x2ed   :  { %2682 = vmatpush.bf16.msrb.mxu3 %v4612_v62  ;;  %v5041_v62 = vld [vmem:[#allocation10 + $0x3f8] sm:$0xf0]  ;;  %v4900_v32 = vor.u32 %v5799_v39, %v4897_v24  ;;  %v5807_v61 = vld [vmem:[#allocation10 + $0x30c] sm:$0xf] }
 0x2ee   :  { %2609 = vmatmul.bf16.vlgmr.msra.gmra.mxu1 %v6568_v25  ;;  %v5044_v30 = vor.u32 %v5835_v23, %v5041_v62  ;;  %v4932_v41 = vor.u32 %v5807_v61, %v4929_v7  ;;  %v5860_v62 = vld [vmem:[#allocation11 + $0xac] sm:$0xf0] }
 0x2ef   :  { %2657 = vmatpush.bf16.msrb.mxu1 %v4848_v9  ;;  %v5025_v9 = vld [vmem:[#allocation10 + $0x3d8] sm:$0xf0] }
 0x2f0   :  { %2669 = vmatpush.bf16.msrb.mxu2 %v4992_v36  ;;  %2695 = vmatpush.bf16.msra.mxu0 %v4740_v40  ;;  %v5795_v36 = vld [vmem:[#allocation10 + $0x2ac] sm:$0xf]  ;;  %v5028_v45 = vor.u32 %v5831_v28, %v5025_v9 }
 0x2f1   :  { %2683 = vmatpush.bf16.msrb.mxu3 %v4596_v37  ;;  %v4884_v37 = vor.u32 %v5795_v36, %v4881_v11  ;;  %v5827_v40 = vld [vmem:[#allocation10 + $0x3ac] sm:$0xf]  ;;  %v5095_v36 = vld [vmem:[#allocation11 + $0x60] sm:$0xf]  ;;  %v5852_v11 = vld [vmem:[#allocation11 + $0x6c] sm:$0xf0] }
 0x2f2   :  { %v5012_v42 = vor.u32 %v5827_v40, %v5009_v43  ;;  %v5900_v40 = vld [vmem:[#allocation11 + $0x1ec] sm:$0xf0] }
 0x2f3   :  { %2622 = vmatmul.bf16.vlgmr.msra.gmra.mxu2 %v6572_v0  ;;  %2658 = vmatpush.bf16.msrb.mxu1 %v4832_v6  ;;  %v4993_v6 = vld [vmem:[#allocation10 + $0x398] sm:$0xf0] }
 0x2f4   :  { %2670 = vmatpush.bf16.msrb.mxu2 %v4976_v48  ;;  %2696 = vmatpush.bf16.msra.mxu0 %v4724_v55  ;;  %v4849_v48 = vld [vmem:[#allocation10 + $0x278] sm:$0xf0]  ;;  %v4996_v49 = vor.u32 %v5823_v46, %v4993_v6  ;;  %v5848_v46 = vld [vmem:[#allocation11 + $0x4c] sm:$0xf0]  ;;  %v5271_v6 = vld [vmem:[#allocation11 + $0x1c0] sm:$0xf] }
 0x2f5   :  { %2684 = vmatpush.bf16.msrb.mxu3 %v4580_v47  ;;  %v5819_v47 = vld [vmem:[#allocation10 + $0x36c] sm:$0xf]  ;;  %v4977_v55 = vld [vmem:[#allocation10 + $0x378] sm:$0xf0] }
 0x2f6   :  { %v4980_v54 = vor.u32 %v5819_v47, %v4977_v55 }
 0x2f7   :  { %2659 = vmatpush.bf16.msrb.mxu1 %v4816_v53  ;;  %v4817_v53 = vld [vmem:[#allocation10 + $0x238] sm:$0xf0] }
 0x2f8   :  { %2671 = vmatpush.bf16.msrb.mxu2 %v4960_v38  ;;  %2697 = vmatpush.bf16.msra.mxu0 %v4708_v3  ;;  %v4964_v38 = vor.u32 %v5815_v59, %v4961_v26  ;;  %v4820_v1 = vor.u32 %v5779_v8, %v4817_v53  ;;  %v5775_v3 = vld [vmem:[#allocation10 + $0x20c] sm:$0xf]  ;;  %v5892_v26 = vld [vmem:[#allocation11 + $0x1ac] sm:$0xf0]  ;;  %v1880_v53 = vperm.slane %v6532_v4, 1 }
 0x2f9   :  { %2685 = vmatpush.bf16.msrb.mxu3 %v4564_v2  ;;  %v4945_v2 = vld [vmem:[#allocation10 + $0x338] sm:$0xf0]  ;;  %v4804_v63 = vor.u32 %v5775_v3, %v4801_v44  ;;  %v5047_v3 = vld [vmem:[#allocation11] sm:$0xf]  ;;  %v5840_v44 = vld [vmem:[#allocation11 + $0xc] sm:$0xf0] }
 0x2fa   :  { %v4948_v14 = vor.u32 %v5811_v34, %v4945_v2  ;;  %v5048_v7 = vor.u32 %v5840_v44, %v5047_v3  ;;  %v1881_v3 = vperm.slane %v6558_v22, 1 }
 0x2fb   :  { %2660 = vmatpush.bf16.msrb.mxu1 %v4800_v13 }
 0x2fc   :  { %2672 = vmatpush.bf16.msrb.mxu2 %v4944_v56  ;;  %2698 = vmatpush.bf16.msra.mxu0 %v4692_v15  ;;  %v5868_v15 = vld [vmem:[#allocation11 + $0xec] sm:$0xf0] }
 0x2fd   :  { %2686 = vmatpush.bf16.msrb.mxu3 %v4548_v60  ;;  %v5159_v60 = vld [vmem:[#allocation11 + $0xe0] sm:$0xf] }
 0x2fe   :  { %2661 = vmatmul.bf16.vlgmr.msrb.gmra.mxu1 %v6568_v25  ;;  %v5160_v16 = vor.u32 %v5868_v15, %v5159_v60 }
 0x2ff   :  { %2705 = vmatpush.bf16.msra.mxu1 %v4916_v21  ;;  %v5143_v21 = vld [vmem:[#allocation11 + $0xc0] sm:$0xf] }
 0x300   :  { %2673 = vmatpush.bf16.msrb.mxu2 %v4928_v27  ;;  %2687 = vmatmul.bf16.vlgmr.msrb.gmra.mxu3 %v6540_v50  ;;  %v5787_v50 = vld [vmem:[#allocation10 + $0x26c] sm:$0xf]  ;;  %v5144_v23 = vor.u32 %v5864_v58, %v5143_v21 }
 0x301   :  { %2699 = vmatpush.bf16.msra.mxu0 %v4676_v29  ;;  %v4852_v51 = vor.u32 %v5787_v50, %v4849_v48  ;;  %3679 = vmatpush.bf16.msra.mxu3 %v5160_v16 }
 0x303   :  { %2706 = vmatpush.bf16.msra.mxu1 %v4900_v32  ;;  %2674 = vmatmul.bf16.vlgmr.msrb.gmra.mxu2 %v6572_v0  ;;  %v5856_v32 = vld [vmem:[#allocation11 + $0x8c] sm:$0xf0] }
 0x304   :  { %2718 = vmatpush.bf16.msra.mxu2 %v5044_v30  ;;  %2700 = vmatmul.bf16.vlgmr.msra.gmra.mxu0 %v6547_v5  ;;  %v4836_v5 = vor.u32 %v5783_v19, %v4833_v57  ;;  %v5111_v30 = vld [vmem:[#allocation11 + $0x80] sm:$0xf]  ;;  %v5844_v57 = vld [vmem:[#allocation11 + $0x2c] sm:$0xf0] }
 0x305   :  { %3680 = vmatpush.bf16.msra.mxu3 %v5144_v23  ;;  %v5112_v28 = vor.u32 %v5856_v32, %v5111_v30  ;;  %v5063_v19 = vld [vmem:[#allocation11 + $0x20] sm:$0xf]  ;;  %v5145_v32 = vld [vmem:[#allocation11 + $0xd0] sm:$0xf0] }
 0x306   :  { %v5064_v59 = vor.u32 %v5844_v57, %v5063_v19  ;;  %v5223_v23 = vld [vmem:[#allocation11 + $0x160] sm:$0xf]  ;;  %v5876_v57 = vld [vmem:[#allocation11 + $0x12c] sm:$0xf0] }
 0x307   :  { %2707 = vmatpush.bf16.msra.mxu1 %v4884_v37  ;;  %v5096_v37 = vor.u32 %v5852_v11, %v5095_v36  ;;  %v5191_v19 = vld [vmem:[#allocation11 + $0x120] sm:$0xf] }
 0x308   :  { %2719 = vmatpush.bf16.msra.mxu2 %v5028_v45  ;;  %v5287_v45 = vld [vmem:[#allocation11 + $0x1e0] sm:$0xf] }
 0x309   :  { %v5288_v43 = vor.u32 %v5900_v40, %v5287_v45  ;;  %v5207_v45 = vld [vmem:[#allocation11 + $0x140] sm:$0xf] }
 0x30b   :  { %2708 = vmatpush.bf16.msra.mxu1 %v4868_v52  ;;  %3692 = vmatpush.bf16.msrb.mxu0 %v5288_v43  ;;  %v5079_v52 = vld [vmem:[#allocation11 + $0x40] sm:$0xf] }
 0x30c   :  { %2720 = vmatpush.bf16.msra.mxu2 %v5012_v42  ;;  %v5080_v48 = vor.u32 %v5848_v46, %v5079_v52  ;;  %v5858_v52 = vld [vmem:[#allocation11 + $0xa4] sm:$0xf] }
 0x30f   :  { %2709 = vmatpush.bf16.msra.mxu1 %v4852_v51 }
 0x310   :  { %2721 = vmatpush.bf16.msra.mxu2 %v4996_v49  ;;  %v5896_v49 = vld [vmem:[#allocation11 + $0x1cc] sm:$0xf0] }
 0x311   :  { %v5272_v47 = vor.u32 %v5896_v49, %v5271_v6  ;;  %v5129_v49 = vld [vmem:[#allocation11 + $0xb0] sm:$0xf0] }
 0x313   :  { %2710 = vmatpush.bf16.msra.mxu1 %v4836_v5  ;;  %3693 = vmatpush.bf16.msrb.mxu0 %v5272_v47 }
 0x314   :  { %2722 = vmatpush.bf16.msra.mxu2 %v4980_v54  ;;  %v5255_v54 = vld [vmem:[#allocation11 + $0x1a0] sm:$0xf] }
 0x315   :  { %v5256_v8 = vor.u32 %v5892_v26, %v5255_v54  ;;  %v5924_v26 = vld [vmem:[#allocation11 + $0x2ac] sm:$0xf0] }
 0x317   :  { %2711 = vmatpush.bf16.msra.mxu1 %v4820_v1  ;;  %3694 = vmatpush.bf16.msrb.mxu0 %v5256_v8 }
 0x318   :  { %2723 = vmatpush.bf16.msra.mxu2 %v4964_v38 }
 0x31b   :  { %2712 = vmatpush.bf16.msra.mxu1 %v4804_v63 }
 0x31c   :  { %2724 = vmatpush.bf16.msra.mxu2 %v4948_v14  ;;  %v5239_v14 = vld [vmem:[#allocation11 + $0x180] sm:$0xf] }
 0x31e   :  { %2713 = vmatmul.bf16.vlgmr.msra.gmra.mxu1 %v6568_v25  ;;  %v5127_v25 = vld [vmem:[#allocation11 + $0xa0] sm:$0xf] }
 0x31f   :  { %v5128_v39 = vor.u32 %v5860_v62, %v5127_v25  ;;  %v5884_v25 = vld [vmem:[#allocation11 + $0x16c] sm:$0xf0] }
 0x320   :  { %2725 = vmatpush.bf16.msra.mxu2 %v4932_v41  ;;  %v5888_v41 = vld [vmem:[#allocation11 + $0x18c] sm:$0xf0]  ;;  %v5224_v62 = vor.u32 %v5884_v25, %v5223_v23  ;;  %v5097_v23 = vld [vmem:[#allocation11 + $0x70] sm:$0xf0] }
 0x321   :  { %3681 = vmatpush.bf16.msra.mxu3 %v5128_v39  ;;  %v5415_v39 = vld [vmem:[#allocation11 + $0x2e0] sm:$0xf] }
 0x323   :  { %2726 = vmatmul.bf16.vlgmr.msra.gmra.mxu2 %v6572_v0  ;;  %v1879_v0 = vperm.slane %v6518_v31, 1 }
 0x325   :  { %3682 = vmatpush.bf16.msra.mxu3 %v5112_v28 }
 0x329   :  { %3683 = vmatpush.bf16.msra.mxu3 %v5096_v37  ;;  %v5880_v37 = vld [vmem:[#allocation11 + $0x14c] sm:$0xf0] }
 0x32a   :  { %v5208_v43 = vor.u32 %v5880_v37, %v5207_v45  ;;  %v5081_v45 = vld [vmem:[#allocation11 + $0x50] sm:$0xf0] }
 0x32d   :  { %3684 = vmatpush.bf16.msra.mxu3 %v5080_v48 }
 0x331   :  { %3685 = vmatpush.bf16.msra.mxu3 %v5064_v59  ;;  %v5383_v59 = vld [vmem:[#allocation11 + $0x2a0] sm:$0xf] }
 0x335   :  { %3686 = vmatpush.bf16.msra.mxu3 %v5048_v7 }
 0x340   :  { %v2545_v10 = vpop.f32.mrf.mxu0 }
 0x343   :  { %v2532_v12 = vpop.f32.mrf.mxu3 }
 0x344   :  { %v2533_v9 = vadd.f32 %v2532_v12, %v1879_v0  ;;  %v5932_v0 = vld [vmem:[#allocation11 + $0x2ec] sm:$0xf0] }
 0x345   :  { %v5416_v30 = vor.u32 %v5932_v0, %v5415_v39  ;;  %v5898_v0 = vld [vmem:[#allocation11 + $0x1e4] sm:$0xf] }
 0x346   :  { %v2546_v35 = vadd.f32 %v2545_v10, %v2533_v9  ;;  %v5866_v10 = vld [vmem:[#allocation11 + $0xe4] sm:$0xf] }
 0x347   :  { %3705 = vmatpush.bf16.msrb.mxu1 %v5416_v30 }
 0x348   :  { %v2547_v13 = vpop.f32.mrf.mxu0 }
 0x349   :  { %v5240_v13 = vor.u32 %v5888_v41, %v5239_v14  ;;  %v5175_v41 = vld [vmem:[#allocation11 + $0x100] sm:$0xf] }
 0x34b   :  { %v2534_v56 = vpop.f32.mrf.mxu3  ;;  %3695 = vmatpush.bf16.msrb.mxu0 %v5240_v13  ;;  %v5367_v13 = vld [vmem:[#allocation11 + $0x280] sm:$0xf] }
 0x34c   :  { %v5161_v56 = vld [vmem:[#allocation11 + $0xf0] sm:$0xf0] }
 0x34d   :  { %v5164_v16 = vor.u32 %v5866_v10, %v5161_v56  ;;  %v5872_v10 = vld [vmem:[#allocation11 + $0x10c] sm:$0xf0] }
 0x34e   :  { %v5176_v22 = vor.u32 %v5872_v10, %v5175_v41  ;;  %v5920_v56 = vld [vmem:[#allocation11 + $0x28c] sm:$0xf0]  ;;  %v5838_v10 = vld [vmem:[#allocation11 + $0x4] sm:$0xf] }
 0x34f   :  { %3731 = vmatpush.bf16.msrb.mxu3 %v5164_v16  ;;  %3696 = vmatpush.bf16.msrb.mxu0 %v5224_v62 }
 0x350   :  { %v6585_v17 = vpop.f32.mrf.mxu0 }
 0x353   :  { %v6587_v18 = vpop.f32.mrf.mxu3  ;;  %3697 = vmatpush.bf16.msrb.mxu0 %v5208_v43 }
 0x354   :  { %v2585_v60 = vadd.f32 %v6587_v18, %v1880_v53 }
 0x356   :  { %v2598_v18 = vadd.f32 %v6585_v17, %v2585_v60 }
 0x358   :  { %v2599_v27 = vpop.f32.mrf.mxu0 }
 0x35b   :  { %v2558_v24 = vpop.f32.mrf.mxu1  ;;  %v2586_v29 = vpop.f32.mrf.mxu3 }
 0x35c   :  { %v2559_v50 = vadd.f32 %v2558_v24, %v2546_v35  ;;  %v5862_v24 = vld [vmem:[#allocation11 + $0xc4] sm:$0xf]  ;;  %v5399_v35 = vld [vmem:[#allocation11 + $0x2c0] sm:$0xf] }
 0x35d   :  { %v5148_v9 = vor.u32 %v5862_v24, %v5145_v32  ;;  %v5289_v24 = vld [vmem:[#allocation11 + $0x1f0] sm:$0xf0] }
 0x35e   :  { %v5292_v32 = vor.u32 %v5898_v0, %v5289_v24  ;;  %v5904_v0 = vld [vmem:[#allocation11 + $0x20c] sm:$0xf0] }
 0x35f   :  { %3732 = vmatpush.bf16.msrb.mxu3 %v5148_v9 }
 0x362   :  { %v6590_v42 = vpop.f32.mrf.mxu0 }
 0x363   :  { %v2560_v33 = vpop.f32.mrf.mxu1  ;;  %v6592_v31 = vpop.f32.mrf.mxu3 }
 0x364   :  { %v5928_v33 = vld [vmem:[#allocation11 + $0x2cc] sm:$0xf0]  ;;  %v2637_v25 = vadd.f32 %v6592_v31, %v1881_v3  ;;  %v5894_v31 = vld [vmem:[#allocation11 + $0x1c4] sm:$0xf] }
 0x365   :  { %v5400_v48 = vor.u32 %v5928_v33, %v5399_v35  ;;  %v5273_v33 = vld [vmem:[#allocation11 + $0x1d0] sm:$0xf0] }
 0x366   :  { %v2571_v51 = vpop.f32.mrf.mxu2 }
 0x367   :  { %v2572_v55 = vadd.f32 %v2571_v51, %v2559_v50  ;;  %v5132_v51 = vor.u32 %v5858_v52, %v5129_v49  ;;  %3706 = vmatpush.bf16.msrb.mxu1 %v5400_v48  ;;  %v2650_v52 = vadd.f32 %v6590_v42, %v2637_v25 }
 0x369   :  { %v2731_v5 = vmul.f32 0.01, %v2572_v55  ;;  %3733 = vmatpush.bf16.msrb.mxu3 %v5132_v51  ;;  %v5912_v51 = vld [vmem:[#allocation11 + $0x24c] sm:$0xf0] }
 0x36a   :  { %v2651_v34 = vpop.f32.mrf.mxu0 }
 0x36b   :  { %v6595_v38 = vmax.f32 %v2572_v55, %v2731_v5  ;;  %v2610_v1 = vpop.f32.mrf.mxu1  ;;  %v2638_v2 = vpop.f32.mrf.mxu3  ;;  %v5192_v5 = vor.u32 %v5876_v57, %v5191_v19  ;;  %v5854_v34 = vld [vmem:[#allocation11 + $0x84] sm:$0xf]  ;;  %v5065_v57 = vld [vmem:[#allocation11 + $0x30] sm:$0xf0] }
 0x36c   :  { %v2611_v40 = vadd.f32 %v2610_v1, %v2598_v18  ;;  %v5384_v1 = vor.u32 %v5924_v26, %v5383_v59  ;;  %v5113_v2 = vld [vmem:[#allocation11 + $0x90] sm:$0xf0]  ;;  %v5351_v18 = vld [vmem:[#allocation11 + $0x260] sm:$0xf]  ;;  %v5842_v19 = vld [vmem:[#allocation11 + $0x24] sm:$0xf] }
 0x36d   :  { %v2739_v63 = vmul.f32 %v6595_v38, %v6595_v38  ;;  %v2743_v61 = vsel %vm1586_vm10, %v6595_v38, 0.0  ;;  %v5116_v14 = vor.u32 %v5854_v34, %v5113_v2  ;;  %3698 = vmatpush.bf16.msrb.mxu0 %v5192_v5  ;;  %v5068_v26 = vor.u32 %v5842_v19, %v5065_v57 }
 0x36e   :  { %v2744_v4 = vrot.slane %v2743_v61, 4  ;;  %v2573_v12 = vpop.f32.mrf.mxu2  ;;  %3707 = vmatpush.bf16.msrb.mxu1 %v5384_v1 }
 0x36f   :  { %v2771_v15 = vsel %vm1586_vm10, %v2739_v63, 0.0  ;;  %3734 = vmatpush.bf16.msrb.mxu3 %v5116_v14  ;;  %v5319_v14 = vld [vmem:[#allocation11 + $0x220] sm:$0xf] }
 0x370   :  { %v2745_v21 = vadd.f32 %v2744_v4, %v2743_v61  ;;  %v2772_v58 = vrot.slane %v2771_v15, 4 }
 0x371   :  { %3699 = vmatpush.bf16.msrb.mxu0 %v5176_v22 }
 0x372   :  { %v2746_v27 = vrot.slane %v2745_v21, 2  ;;  %v2773_v29 = vadd.f32 %v2772_v58, %v2771_v15  ;;  %v5850_v58 = vld [vmem:[#allocation11 + $0x64] sm:$0xf] }
 0x373   :  { %v2612_v28 = vpop.f32.mrf.mxu1  ;;  %v5100_v39 = vor.u32 %v5850_v58, %v5097_v23 }
 0x374   :  { %v2747_v36 = vadd.f32 %v2746_v27, %v2745_v21  ;;  %v2774_v11 = vrot.slane %v2773_v29, 2  ;;  %v5368_v21 = vor.u32 %v5920_v56, %v5367_v13  ;;  %v5916_v28 = vld [vmem:[#allocation11 + $0x26c] sm:$0xf0] }
 0x375   :  { %3735 = vmatpush.bf16.msrb.mxu3 %v5100_v39  ;;  %3744 = vmatpush.bf16.msra.mxu0 %v5292_v32  ;;  %v5303_v39 = vld [vmem:[#allocation11 + $0x200] sm:$0xf] }
 0x376   :  { %v2748_v46 = vrot.slane %v2747_v36, 1  ;;  %v2775_v6 = vadd.f32 %v2774_v11, %v2773_v29  ;;  %v2623_v50 = vpop.f32.mrf.mxu2  ;;  %3708 = vmatpush.bf16.msrb.mxu1 %v5368_v21  ;;  %v5846_v11 = vld [vmem:[#allocation11 + $0x44] sm:$0xf]  ;;  %v5543_v32 = vld [vmem:[#allocation11 + $0x3e0] sm:$0xf] }
 0x377   :  { %v2624_v17 = vadd.f32 %v2623_v50, %v2611_v40  ;;  %v5084_v35 = vor.u32 %v5846_v11, %v5081_v45 }
 0x378   :  { %v2749_v47 = vadd.f32 %v2748_v46, %v2747_v36  ;;  %v2776_v55 = vrot.slane %v2775_v6, 1  ;;  %v5352_v36 = vor.u32 %v5916_v28, %v5351_v18  ;;  %v5964_v18 = vld [vmem:[#allocation11 + $0x3ec] sm:$0xf0] }
 0x379   :  { %v2732_v54 = vmul.f32 0.01, %v2624_v17  ;;  %3736 = vmatpush.bf16.msrb.mxu3 %v5084_v35  ;;  %v5544_v45 = vor.u32 %v5964_v18, %v5543_v32  ;;  %v5918_v32 = vld [vmem:[#allocation11 + $0x284] sm:$0xf] }
 0x37a   :  { %v2777_v8 = vadd.f32 %v2776_v55, %v2775_v6  ;;  %v6604_v53 = vmul.f32 0.5, %v2749_v47  ;;  %v5276_v6 = vor.u32 %v5894_v31, %v5273_v33  ;;  %3709 = vmatpush.bf16.msrb.mxu1 %v5352_v36  ;;  %v5882_v31 = vld [vmem:[#allocation11 + $0x164] sm:$0xf] }
 0x37b   :  { %v6607_v44 = vmax.f32 %v2624_v17, %v2732_v54  ;;  %v2662_v7 = vpop.f32.mrf.mxu1  ;;  %v5335_v17 = vld [vmem:[#allocation11 + $0x240] sm:$0xf]  ;;  %v5890_v54 = vld [vmem:[#allocation11 + $0x1a4] sm:$0xf]  ;;  %3718 = vmatpush.bf16.msrb.mxu2 %v5544_v45 }
 0x37c   :  { %v2803_v63 = vmul.f32 0.5, %v2777_v8  ;;  %v2807_v61 = vmul.f32 %v6604_v53, %v6604_v53  ;;  %v2663_v47 = vadd.f32 %v2662_v7, %v2650_v52  ;;  %v5336_v55 = vor.u32 %v5912_v51, %v5335_v17  ;;  %3745 = vmatpush.bf16.msra.mxu0 %v5276_v6  ;;  %v5257_v8 = vld [vmem:[#allocation11 + $0x1b0] sm:$0xf0]  ;;  %v5930_v52 = vld [vmem:[#allocation11 + $0x2e4] sm:$0xf] }
 0x37d   :  { %v2740_v4 = vmul.f32 %v6607_v44, %v6607_v44  ;;  %v2750_v12 = vsel %vm1586_vm10, %v6607_v44, 0.0  ;;  %v5260_v34 = vor.u32 %v5890_v54, %v5257_v8  ;;  %3737 = vmatpush.bf16.msrb.mxu3 %v5068_v26  ;;  %v5417_v6 = vld [vmem:[#allocation11 + $0x2f0] sm:$0xf0]  ;;  %v5926_v8 = vld [vmem:[#allocation11 + $0x2c4] sm:$0xf] }
 0x37e   :  { %v2811_v60 = vsub.f32 %v2803_v63, %v2807_v61  ;;  %v2751_v15 = vrot.slane %v2750_v12, 4  ;;  %v2625_v16 = vpop.f32.mrf.mxu2  ;;  %3710 = vmatpush.bf16.msrb.mxu1 %v5336_v55  ;;  %v5908_v63 = vld [vmem:[#allocation11 + $0x22c] sm:$0xf0]  ;;  %v5420_v17 = vor.u32 %v5930_v52, %v5417_v6  ;;  %v5209_v26 = vld [vmem:[#allocation11 + $0x150] sm:$0xf0] }
 0x37f   :  { %v2778_v62 = vsel %vm1586_vm10, %v2740_v4, 0.0  ;;  %v5320_v41 = vor.u32 %v5908_v63, %v5319_v14  ;;  %v5049_v4 = vld [vmem:[#allocation11 + $0x10] sm:$0xf0]  ;;  %v5960_v55 = vld [vmem:[#allocation11 + $0x3cc] sm:$0xf0] }
 0x380   :  { %v2815_v27 = vmax.f32 %v2811_v60, 0.0  ;;  %v2752_v29 = vadd.f32 %v2751_v15, %v2750_v12  ;;  %v2779_v30 = vrot.slane %v2778_v62, 4  ;;  %3746 = vmatpush.bf16.msra.mxu0 %v5260_v34  ;;  %v5052_v56 = vor.u32 %v5838_v10, %v5049_v4  ;;  %v5886_v60 = vld [vmem:[#allocation11 + $0x184] sm:$0xf]  ;;  %v5241_v15 = vld [vmem:[#allocation11 + $0x190] sm:$0xf0] }
 0x381   :  { %v6617_v9 = vpop.f32.mrf.mxu0  ;;  %v5244_v23 = vor.u32 %v5886_v60, %v5241_v15  ;;  %v6650_v10 = vld [vmem:[#allocation13 + $0x20] sm:$0xff]  ;;  %v5193_v60 = vld [vmem:[#allocation11 + $0x130] sm:$0xf0] }
 0x382   :  { %v6619_v37 = vadd.f32 1e-05, %v2815_v27  ;;  %v2753_v40 = vrot.slane %v2752_v29, 2  ;;  %v2780_v43 = vadd.f32 %v2779_v30, %v2778_v62  ;;  %3711 = vmatpush.bf16.msrb.mxu1 %v5320_v41  ;;  %3738 = vmatpush.bf16.msrb.mxu3 %v5052_v56  ;;  %v5304_v30 = vor.u32 %v5904_v0, %v5303_v39  ;;  %v5874_v41 = vld [vmem:[#allocation11 + $0x124] sm:$0xf] }
 0x383   :  { %v6622_v46 = vpop.f32.mrf.mxu3  ;;  %v2664_v49 = vpop.f32.mrf.mxu1  ;;  %v5922_v15 = vld [vmem:[#allocation11 + $0x2a4] sm:$0xf]  ;;  %v5495_v39 = vld [vmem:[#allocation11 + $0x380] sm:$0xf]  ;;  %v5952_v0 = vld [vmem:[#allocation11 + $0x38c] sm:$0xf0] }
 0x384   :  { %5996 = vrsqrt.f32 %v6619_v37  ;;  %v2754_v50 = vadd.f32 %v2753_v40, %v2752_v29  ;;  %v2781_v48 = vrot.slane %v2780_v43, 2  ;;  %3747 = vmatpush.bf16.msra.mxu0 %v5244_v23  ;;  %v5225_v40 = vld [vmem:[#allocation11 + $0x170] sm:$0xf0]  ;;  %vm2829_vm8 = vweird.f32 %v6619_v37 }
 0x385   :  { %v5228_v33 = vor.u32 %v5882_v31, %v5225_v40  ;;  %v5369_v31 = vld [vmem:[#allocation11 + $0x290] sm:$0xf0] }
 0x386   :  { %v2755_v5 = vrot.slane %v2754_v50, 1  ;;  %v2782_v59 = vadd.f32 %v2781_v48, %v2780_v43  ;;  %v2675_v42 = vpop.f32.mrf.mxu2  ;;  %3712 = vmatpush.bf16.msrb.mxu1 %v5304_v30  ;;  %v5177_v30 = vld [vmem:[#allocation11 + $0x110] sm:$0xf0]  ;;  %v5372_v6 = vor.u32 %v5918_v32, %v5369_v31  ;;  %v5431_v31 = vld [vmem:[#allocation11 + $0x300] sm:$0xf] }
 0x387   :  { %v2676_v1 = vadd.f32 %v2675_v42, %v2663_v47  ;;  %v5527_v47 = vld [vmem:[#allocation11 + $0x3c0] sm:$0xf] }
 0x388   :  { %v2756_v2 = vadd.f32 %v2755_v5, %v2754_v50  ;;  %v2783_v3 = vrot.slane %v2782_v59, 1  ;;  %3748 = vmatpush.bf16.msra.mxu0 %v5228_v33  ;;  %v5528_v5 = vor.u32 %v5960_v55, %v5527_v47  ;;  %v5353_v47 = vld [vmem:[#allocation11 + $0x270] sm:$0xf0] }
 0x389   :  { %v2733_v61 = vmul.f32 0.01, %v2676_v1  ;;  %v2703_v7 = vpop.f32.mrf.mxu0 }
 0x38a   :  { %v6625_v12 = vpop.eup %5996  ;;  %v2784_v22 = vadd.f32 %v2783_v3, %v2782_v59  ;;  %v6627_v13 = vmul.f32 0.5, %v2756_v2  ;;  %3757 = vmatpush.bf16.msra.mxu1 %v5420_v17  ;;  %v5878_v59 = vld [vmem:[#allocation11 + $0x144] sm:$0xf]  ;;  %3719 = vmatpush.bf16.msrb.mxu2 %v5528_v5  ;;  %v5956_v7 = vld [vmem:[#allocation11 + $0x3ac] sm:$0xf0] }
 0x38b   :  { %v2824_v16 = vmul.f32 %v6625_v12, %v6619_v37  ;;  %v6631_v21 = vmax.f32 %v2676_v1, %v2733_v61  ;;  %v2690_v58 = vpop.f32.mrf.mxu3  ;;  %vm2830_vm7 = vweird.f32 %v6625_v12  ;;  %v5401_v1 = vld [vmem:[#allocation11 + $0x2d0] sm:$0xf0]  ;;  %v5212_v14 = vor.u32 %v5878_v59, %v5209_v26  ;;  %v5511_v61 = vld [vmem:[#allocation11 + $0x3a0] sm:$0xf]  ;;  %v5869_v5 = vld [vmem:[#allocation11 + $0xf4] sm:$0xf0] }
 0x38c   :  { %v2804_v25 = vmul.f32 0.5, %v2784_v22  ;;  %v2808_v62 = vmul.f32 %v6627_v13, %v6627_v13  ;;  %vm2831_vm9 = vmor %vm2829_vm8, %vm2830_vm7  ;;  %v5404_v63 = vor.u32 %v5926_v8, %v5401_v1  ;;  %v5512_v56 = vor.u32 %v5956_v7, %v5511_v61  ;;  %v5337_v61 = vld [vmem:[#allocation11 + $0x250] sm:$0xf0] }
 0x38d   :  { %v2825_v24 = vmul.f32 %v6625_v12, %v2824_v16  ;;  %v2741_v27 = vmul.f32 %v6631_v21, %v6631_v21  ;;  %v2757_v29 = vsel %vm1586_vm10, %v6631_v21, 0.0  ;;  %v1882_v16 = vperm.slane %v6565_v20, 1  ;;  %3749 = vmatpush.bf16.msra.mxu0 %v5212_v14 }
 0x38e   :  { %v2812_v28 = vsub.f32 %v2804_v25, %v2808_v62  ;;  %v2758_v36 = vrot.slane %v2757_v29, 4  ;;  %v2677_v11 = vpop.f32.mrf.mxu2  ;;  %3758 = vmatpush.bf16.msra.mxu1 %v5404_v63  ;;  %v5196_v58 = vor.u32 %v5874_v41, %v5193_v60  ;;  %3720 = vmatpush.bf16.msrb.mxu2 %v5512_v56  ;;  %v5910_v63 = vld [vmem:[#allocation11 + $0x244] sm:$0xf]  ;;  %v5865_v56 = vld [vmem:[#allocation11 + $0xd4] sm:$0xf0] }
 0x38f   :  { %v2826_v43 = vmul.f32 0.5, %v2825_v24  ;;  %v2785_v35 = vsel %vm1586_vm10, %v2741_v27, 0.0  ;;  %v5496_v27 = vor.u32 %v5952_v0, %v5495_v39  ;;  %v2689_v40 = vadd.f32 %v6622_v46, %v1882_v16  ;;  %v5321_v39 = vld [vmem:[#allocation11 + $0x230] sm:$0xf0]  ;;  %v6680_v0 = vld [vmem:[#allocation13 + $0x28] sm:$0xff] }
 0x390   :  { %v2816_v50 = vmax.f32 %v2812_v28, 0.0  ;;  %v2759_v48 = vadd.f32 %v2758_v36, %v2757_v29  ;;  %v2786_v49 = vrot.slane %v2785_v35, 4  ;;  %v5870_v29 = vld [vmem:[#allocation11 + $0x104] sm:$0xf] }
 0x391   :  { %v2827_v51 = vsub.f32 1.5, %v2826_v43  ;;  %3750 = vmatpush.bf16.msra.mxu0 %v5196_v58  ;;  %v5180_v43 = vor.u32 %v5870_v29, %v5177_v30  ;;  %v2702_v8 = vadd.f32 %v6617_v9, %v2689_v40  ;;  %v5447_v58 = vld [vmem:[#allocation11 + $0x320] sm:$0xf]  ;;  %v5135_v29 = vld [vmem:[#allocation11 + $0xa8] sm:$0xf] }
 0x392   :  { %v6642_v19 = vadd.f32 1e-05, %v2816_v50  ;;  %v2760_v57 = vrot.slane %v2759_v48, 2  ;;  %v2787_v54 = vadd.f32 %v2786_v49, %v2785_v35  ;;  %3721 = vmatpush.bf16.msrb.mxu2 %v5496_v27  ;;  %v5479_v50 = vld [vmem:[#allocation11 + $0x360] sm:$0xf] }
 0x393   :  { %v2828_v42 = vmul.f32 %v6625_v12, %v2827_v51  ;;  %v5914_v51 = vld [vmem:[#allocation11 + $0x264] sm:$0xf]  ;;  %v5861_v30 = vld [vmem:[#allocation11 + $0xb4] sm:$0xf0]  ;;  %v5936_v40 = vld [vmem:[#allocation11 + $0x30c] sm:$0xf0] }
 0x394   :  { %5998 = vrsqrt.f32 %v6642_v19  ;;  %v2761_v34 = vadd.f32 %v2760_v57, %v2759_v48  ;;  %v2788_v2 = vrot.slane %v2787_v54, 2  ;;  %v5948_v48 = vld [vmem:[#allocation11 + $0x36c] sm:$0xf0]  ;;  %vm2839_vm12 = vweird.f32 %v6642_v19 }
 0x395   :  { %v2832_v3 = vsel %vm2831_vm9, %v6625_v12, %v2828_v42  ;;  %v5385_v12 = vld [vmem:[#allocation11 + $0x2b0] sm:$0xf0]  ;;  %v5480_v17 = vor.u32 %v5948_v48, %v5479_v50  ;;  %3751 = vmatpush.bf16.msra.mxu0 %v5180_v43  ;;  %v5356_v42 = vor.u32 %v5914_v51, %v5353_v47  ;;  %v5902_v43 = vld [vmem:[#allocation11 + $0x204] sm:$0xf]  ;;  %v5432_v47 = vor.u32 %v5936_v40, %v5431_v31 }
 0x396   :  { %v2863_v37 = vmul.f32 %v6650_v10, %v2832_v3  ;;  %v2762_v4 = vrot.slane %v2761_v34, 1  ;;  %v2789_v22 = vadd.f32 %v2788_v2, %v2787_v54  ;;  %v5388_v24 = vor.u32 %v5922_v15, %v5385_v12  ;;  %v5167_v54 = vld [vmem:[#allocation11 + $0xe8] sm:$0xf]  ;;  %v5944_v2 = vld [vmem:[#allocation11 + $0x34c] sm:$0xf0] }
 0x397   :  { %3722 = vmatpush.bf16.msrb.mxu2 %v5480_v17  ;;  %v5168_v14 = vor.u32 %v5869_v5, %v5167_v54  ;;  %v5340_v15 = vor.u32 %v5910_v63, %v5337_v61  ;;  %v5940_v12 = vld [vmem:[#allocation11 + $0x32c] sm:$0xf0]  ;;  %v5962_v48 = vld [vmem:[#allocation11 + $0x3e4] sm:$0xf]  ;;  %v5853_v54 = vld [vmem:[#allocation11 + $0x74] sm:$0xf0] }
 0x398   :  { %v2763_v23 = vadd.f32 %v2762_v4, %v2761_v34  ;;  %v2790_v25 = vrot.slane %v2789_v22, 1  ;;  %v2867_v62 = vmul.f32 %v2863_v37, %v6604_v53  ;;  %v2887_v28 = vperm.slane %v2863_v37, 2  ;;  %3759 = vmatpush.bf16.msra.mxu1 %v5388_v24  ;;  %v5463_v34 = vld [vmem:[#allocation11 + $0x340] sm:$0xf]  ;;  %v5529_v63 = vld [vmem:[#allocation11 + $0x3d0] sm:$0xf0] }
 0x399   :  { %v5950_v31 = vld [vmem:[#allocation11 + $0x384] sm:$0xf]  ;;  %v6708_v40 = vld [vmem:[#allocation13 + $0x30] sm:$0xff] }
 0x39a   :  { %v6655_v18 = vpop.eup %5998  ;;  %v2791_v20 = vadd.f32 %v2790_v25, %v2789_v22  ;;  %v6657_v36 = vmul.f32 0.5, %v2763_v23  ;;  %v2875_v45 = vrot.slane %v2867_v62, 7  ;;  %v2891_v46 = vmul.f32 %v2887_v28, %v6595_v38  ;;  %v5151_v22 = vld [vmem:[#allocation11 + $0xc8] sm:$0xf] }
 0x39b   :  { %v2714_v11 = vpop.f32.mrf.mxu1  ;;  %v2834_v53 = vmul.f32 %v6655_v18, %v6642_v19  ;;  %vm2840_vm11 = vweird.f32 %v6655_v18  ;;  %v5464_v38 = vor.u32 %v5944_v2, %v5463_v34  ;;  %v5152_v25 = vor.u32 %v5865_v56, %v5151_v22  ;;  %v5906_v19 = vld [vmem:[#allocation11 + $0x224] sm:$0xf]  ;;  %v5295_v34 = vld [vmem:[#allocation11 + $0x1e8] sm:$0xf]  ;;  %v5901_v2 = vld [vmem:[#allocation11 + $0x1f4] sm:$0xf0] }
 0x39c   :  { %v2805_v35 = vmul.f32 0.5, %v2791_v20  ;;  %v2809_v33 = vmul.f32 %v6657_v36, %v6657_v36  ;;  %v2883_v52 = vsub.f32 %v6650_v10, %v2875_v45  ;;  %3760 = vmatpush.bf16.msra.mxu1 %v5372_v6  ;;  %v2715_v41 = vadd.f32 %v2714_v11, %v2702_v8  ;;  %vm2841_vm13 = vmor %vm2839_vm12, %vm2840_vm11  ;;  %v5119_v11 = vld [vmem:[#allocation11 + $0x88] sm:$0xf]  ;;  %v5857_v45 = vld [vmem:[#allocation11 + $0x94] sm:$0xf0] }
 0x39d   :  { %v2835_v49 = vmul.f32 %v6655_v18, %v2834_v53  ;;  %3723 = vmatpush.bf16.msrb.mxu2 %v5464_v38  ;;  %v5448_v62 = vor.u32 %v5940_v12, %v5447_v58  ;;  %v5324_v32 = vor.u32 %v5906_v19, %v5321_v39  ;;  %v5136_v53 = vor.u32 %v5861_v30, %v5135_v29  ;;  %v5958_v38 = vld [vmem:[#allocation11 + $0x3c4] sm:$0xf]  ;;  %v5897_v19 = vld [vmem:[#allocation11 + $0x1d4] sm:$0xf0]  ;;  %v5513_v39 = vld [vmem:[#allocation11 + $0x3b0] sm:$0xf0] }
 0x39e   :  { %v2813_v55 = vsub.f32 %v2805_v35, %v2809_v33  ;;  %v2895_v57 = vperm.slane %v2883_v52, 3  ;;  %v5305_v35 = vld [vmem:[#allocation11 + $0x210] sm:$0xf0]  ;;  %v5532_v22 = vor.u32 %v5958_v38, %v5529_v63 }
 0x39f   :  { %v2836_v59 = vmul.f32 0.5, %v2835_v49  ;;  %v5545_v49 = vld [vmem:[#allocation11 + $0x3f0] sm:$0xf0]  ;;  %v5308_v5 = vor.u32 %v5902_v43, %v5305_v35  ;;  %v5845_v35 = vld [vmem:[#allocation11 + $0x34] sm:$0xf0] }
 0x3a0   :  { %v2817_v26 = vmax.f32 %v2813_v55, 0.0  ;;  %v2899_v1 = vadd.f32 %v2895_v57, %v2891_v46  ;;  %3761 = vmatpush.bf16.msra.mxu1 %v5356_v42  ;;  %v5103_v57 = vld [vmem:[#allocation11 + $0x68] sm:$0xf] }
 0x3a1   :  { %v2837_v3 = vsub.f32 1.5, %v2836_v59  ;;  %3724 = vmatpush.bf16.msrb.mxu2 %v5448_v62  ;;  %v5548_v59 = vor.u32 %v5962_v48, %v5545_v49  ;;  %v5279_v62 = vld [vmem:[#allocation11 + $0x1c8] sm:$0xf] }
 0x3a2   :  { %v6669_v7 = vadd.f32 1e-05, %v2817_v26  ;;  %v6671_v4 = vpack.c.bf16 %v2899_v1, %v2899_v1  ;;  %v5120_v1 = vor.u32 %v5857_v45, %v5119_v11 }
 0x3a3   :  { %v2716_v37 = vpop.f32.mrf.mxu1  ;;  %v2838_v9 = vmul.f32 %v6655_v18, %v2837_v3 }
 0x3a4   :  { %6000 = vrsqrt.f32 %v6669_v7  ;;  %3687 = vmatmul.bf16.vlgmr.msra.gmra.mxu3 %v6671_v4  ;;  %3762 = vmatpush.bf16.msra.mxu1 %v5340_v15  ;;  %v5087_v15 = vld [vmem:[#allocation11 + $0x48] sm:$0xf]  ;;  %vm2849_vm15 = vweird.f32 %v6669_v7 }
 0x3a5   :  { %v2842_v23 = vsel %vm2841_vm13, %v6655_v18, %v2838_v9  ;;  %3783 = vmatpush.bf16.msra.mxu3 %v5168_v14  ;;  %3725 = vmatpush.bf16.msrb.mxu2 %v5432_v47  ;;  %v5104_v9 = vor.u32 %v5853_v54, %v5103_v57  ;;  %v5247_v57 = vld [vmem:[#allocation11 + $0x188] sm:$0xf]  ;;  %v5946_v54 = vld [vmem:[#allocation11 + $0x364] sm:$0xf] }
 0x3a6   :  { %v2727_v60 = vpop.f32.mrf.mxu2  ;;  %v2864_v24 = vmul.f32 %v6680_v0, %v2842_v23  ;;  %v5954_v23 = vld [vmem:[#allocation11 + $0x3a4] sm:$0xf] }
 0x3a7   :  { %v2728_v16 = vadd.f32 %v2727_v60, %v2715_v41  ;;  %v5296_v60 = vor.u32 %v5901_v2, %v5295_v34  ;;  %v5516_v30 = vor.u32 %v5954_v23, %v5513_v39  ;;  %v5169_v34 = vld [vmem:[#allocation11 + $0xf8] sm:$0xf0] }
 0x3a8   :  { %v2888_v28 = vperm.slane %v2864_v24, 2  ;;  %v2868_v18 = vmul.f32 %v2864_v24, %v6627_v13  ;;  %3763 = vmatpush.bf16.msra.mxu1 %v5324_v32 }
 0x3a9   :  { %v2734_v27 = vmul.f32 0.01, %v2728_v16  ;;  %3784 = vmatpush.bf16.msra.mxu3 %v5152_v25  ;;  %3770 = vmatpush.bf16.msra.mxu2 %v5548_v59  ;;  %v5889_v59 = vld [vmem:[#allocation11 + $0x194] sm:$0xf0] }
 0x3aa   :  { %v6686_v33 = vpop.eup %6000  ;;  %v2876_v50 = vrot.slane %v2868_v18, 7  ;;  %v2892_v3 = vmul.f32 %v2888_v28, %v6607_v44  ;;  %v5849_v44 = vld [vmem:[#allocation11 + $0x54] sm:$0xf0]  ;;  %v5280_v18 = vor.u32 %v5897_v19, %v5279_v62  ;;  %v5938_v62 = vld [vmem:[#allocation11 + $0x324] sm:$0xf] }
 0x3ab   :  { %v6683_v20 = vmax.f32 %v2728_v16, %v2734_v27  ;;  %v2844_v13 = vmul.f32 %v6686_v33, %v6669_v7  ;;  %vm2850_vm14 = vweird.f32 %v6686_v33  ;;  %v5088_v32 = vor.u32 %v5849_v44, %v5087_v15  ;;  %v5071_v7 = vld [vmem:[#allocation11 + $0x28] sm:$0xf]  ;;  %v5933_v15 = vld [vmem:[#allocation11 + $0x2f4] sm:$0xf0]  ;;  %v5153_v44 = vld [vmem:[#allocation11 + $0xd8] sm:$0xf0] }
 0x3ac   :  { %v2884_v55 = vsub.f32 %v6680_v0, %v2876_v50  ;;  %3764 = vmatpush.bf16.msra.mxu1 %v5308_v5  ;;  %vm2851_vm0 = vmor %vm2849_vm15, %vm2850_vm14  ;;  %v5449_v19 = vld [vmem:[#allocation11 + $0x330] sm:$0xf0] }
 0x3ad   :  { %v2742_v52 = vmul.f32 %v6683_v20, %v6683_v20  ;;  %v2764_v6 = vsel %vm1586_vm10, %v6683_v20, 0.0  ;;  %v2845_v42 = vmul.f32 %v6686_v33, %v2844_v13  ;;  %3785 = vmatpush.bf16.msra.mxu3 %v5136_v53  ;;  %3771 = vmatpush.bf16.msra.mxu2 %v5532_v22  ;;  %v5497_v53 = vld [vmem:[#allocation11 + $0x390] sm:$0xf0]  ;;  %v5841_v13 = vld [vmem:[#allocation11 + $0x14] sm:$0xf0] }
 0x3ae   :  { %v2765_v17 = vrot.slane %v2764_v6, 4  ;;  %v2729_v51 = vpop.f32.mrf.mxu2  ;;  %v2896_v14 = vperm.slane %v2884_v55, 3  ;;  %v5500_v50 = vor.u32 %v5950_v31, %v5497_v53  ;;  %v5433_v31 = vld [vmem:[#allocation11 + $0x310] sm:$0xf0] }
 0x3af   :  { %v2792_v46 = vsel %vm1586_vm10, %v2742_v52, 0.0  ;;  %v2846_v61 = vmul.f32 0.5, %v2845_v42  ;;  %v5263_v52 = vld [vmem:[#allocation11 + $0x1a8] sm:$0xf] }
 0x3b0   :  { %v2766_v26 = vadd.f32 %v2765_v17, %v2764_v6  ;;  %v2793_v8 = vrot.slane %v2792_v46, 4  ;;  %v2900_v56 = vadd.f32 %v2896_v14, %v2892_v3  ;;  %v5893_v6 = vld [vmem:[#allocation11 + $0x1b4] sm:$0xf0]  ;;  %v5231_v3 = vld [vmem:[#allocation11 + $0x168] sm:$0xf] }
 0x3b1   :  { %v2847_v16 = vsub.f32 1.5, %v2846_v61  ;;  %3786 = vmatpush.bf16.msra.mxu3 %v5120_v1  ;;  %3772 = vmatpush.bf16.msra.mxu2 %v5516_v30  ;;  %v5264_v55 = vor.u32 %v5893_v6, %v5263_v52  ;;  %v5867_v1 = vld [vmem:[#allocation11 + $0xec] sm:$0xf]  ;;  %v5942_v14 = vld [vmem:[#allocation11 + $0x344] sm:$0xf]  ;;  %v5248_v61 = vor.u32 %v5889_v59, %v5247_v57 }
 0x3b2   :  { %v2767_v41 = vrot.slane %v2766_v26, 2  ;;  %v2794_v37 = vadd.f32 %v2793_v8, %v2792_v46  ;;  %v6700_v25 = vpack.c.bf16 %v2900_v56, %v2900_v56  ;;  %v5072_v46 = vor.u32 %v5845_v35, %v5071_v7  ;;  %v5881_v30 = vld [vmem:[#allocation11 + $0x154] sm:$0xf0]  ;;  %v5199_v52 = vld [vmem:[#allocation11 + $0x128] sm:$0xf] }
 0x3b3   :  { %v2848_v24 = vmul.f32 %v6686_v33, %v2847_v16  ;;  %v5172_v56 = vor.u32 %v5867_v1, %v5169_v34  ;;  %v5929_v7 = vld [vmem:[#allocation11 + $0x2d4] sm:$0xf0]  ;;  %v5105_v1 = vld [vmem:[#allocation11 + $0x78] sm:$0xf0] }
 0x3b4   :  { %v2768_v58 = vadd.f32 %v2767_v41, %v2766_v26  ;;  %v2795_v12 = vrot.slane %v2794_v37, 2  ;;  %3700 = vmatmul.bf16.vlgmr.msrb.gmra.mxu0 %v6700_v25  ;;  %3739 = vmatmul.bf16.vlgmr.msrb.gmra.mxu3 %v6671_v4  ;;  %v5481_v26 = vld [vmem:[#allocation11 + $0x370] sm:$0xf0]  ;;  %v5885_v41 = vld [vmem:[#allocation11 + $0x174] sm:$0xf0] }
 0x3b5   :  { %v2852_v28 = vsel %vm2851_vm0, %v6686_v33, %v2848_v24  ;;  %3787 = vmatpush.bf16.msra.mxu3 %v5104_v9  ;;  %3796 = vmatpush.bf16.msrb.mxu0 %v5296_v60  ;;  %v5055_v33 = vld [vmem:[#allocation11 + $0x8] sm:$0xf]  ;;  %v5484_v2 = vor.u32 %v5946_v54, %v5481_v26  ;;  %v5232_v39 = vor.u32 %v5885_v41, %v5231_v3  ;;  %v5877_v6 = vld [vmem:[#allocation11 + $0x134] sm:$0xf0] }
 0x3b6   :  { %v2769_v27 = vrot.slane %v2768_v58, 1  ;;  %v2796_v29 = vadd.f32 %v2795_v12, %v2794_v37  ;;  %v2865_v43 = vmul.f32 %v6708_v40, %v2852_v28  ;;  %3773 = vmatpush.bf16.msra.mxu2 %v5500_v50  ;;  %v5056_v63 = vor.u32 %v5841_v13, %v5055_v33  ;;  %v5465_v37 = vld [vmem:[#allocation11 + $0x350] sm:$0xf0]  ;;  %v5423_v60 = vld [vmem:[#allocation11 + $0x2e8] sm:$0xf] }
 0x3b7   :  { %v5468_v16 = vor.u32 %v5942_v14, %v5465_v37  ;;  %v5863_v12 = vld [vmem:[#allocation11 + $0xcc] sm:$0xf]  ;;  %v5424_v24 = vor.u32 %v5933_v15, %v5423_v60  ;;  %v5391_v50 = vld [vmem:[#allocation11 + $0x2a8] sm:$0xf]  ;;  %v5925_v33 = vld [vmem:[#allocation11 + $0x2b4] sm:$0xf0] }
 0x3b8   :  { %v2770_v11 = vadd.f32 %v2769_v27, %v2768_v58  ;;  %v2797_v45 = vrot.slane %v2796_v29, 1  ;;  %v2869_v17 = vmul.f32 %v2865_v43, %v6657_v36  ;;  %v2889_v5 = vperm.slane %v2865_v43, 2  ;;  %v5859_v28 = vld [vmem:[#allocation11 + $0xac] sm:$0xf]  ;;  %v5873_v59 = vld [vmem:[#allocation11 + $0x114] sm:$0xf0] }
 0x3b9   :  { %3788 = vmatpush.bf16.msra.mxu3 %v5088_v32  ;;  %3797 = vmatpush.bf16.msrb.mxu0 %v5280_v18  ;;  %v5156_v27 = vor.u32 %v5863_v12, %v5153_v44  ;;  %v5407_v32 = vld [vmem:[#allocation11 + $0x2c8] sm:$0xf]  ;;  %v5934_v18 = vld [vmem:[#allocation11 + $0x304] sm:$0xf]  ;;  %v5855_v13 = vld [vmem:[#allocation11 + $0x8c] sm:$0xf]  ;;  %v5392_v57 = vor.u32 %v5925_v33, %v5391_v50 }
 0x3ba   :  { %v2798_v48 = vadd.f32 %v2797_v45, %v2796_v29  ;;  %v6711_v49 = vmul.f32 0.5, %v2770_v11  ;;  %v2877_v42 = vrot.slane %v2869_v17, 7  ;;  %v2893_v22 = vmul.f32 %v2889_v5, %v6631_v21  ;;  %3774 = vmatpush.bf16.msra.mxu2 %v5484_v2  ;;  %v5215_v29 = vld [vmem:[#allocation11 + $0x148] sm:$0xf]  ;;  %v5137_v11 = vld [vmem:[#allocation11 + $0xb8] sm:$0xf0] }
 0x3bb   :  { %v5452_v45 = vor.u32 %v5938_v62, %v5449_v19  ;;  %v5216_v53 = vor.u32 %v5881_v30, %v5215_v29  ;;  %v5408_v43 = vor.u32 %v5929_v7, %v5407_v32  ;;  %v5140_v35 = vor.u32 %v5859_v28, %v5137_v11  ;;  %v5121_v17 = vld [vmem:[#allocation11 + $0x98] sm:$0xf0]  ;;  %v5183_v5 = vld [vmem:[#allocation11 + $0x108] sm:$0xf]  ;;  %v5921_v26 = vld [vmem:[#allocation11 + $0x294] sm:$0xf0] }
 0x3bc   :  { %v2806_v51 = vmul.f32 0.5, %v2798_v48  ;;  %v2810_v47 = vmul.f32 %v6711_v49, %v6711_v49  ;;  %v2885_v36 = vsub.f32 %v6708_v40, %v2877_v42  ;;  %v5124_v54 = vor.u32 %v5855_v13, %v5121_v17  ;;  %v5375_v42 = vld [vmem:[#allocation11 + $0x288] sm:$0xf]  ;;  %v5899_v2 = vld [vmem:[#allocation11 + $0x1ec] sm:$0xf]  ;;  %v6728_v62 = vld [vmem:[#allocation13 + $0x38] sm:$0xff] }
 0x3bd   :  { %3789 = vmatpush.bf16.msra.mxu3 %v5072_v46  ;;  %3798 = vmatpush.bf16.msrb.mxu0 %v5264_v55  ;;  %v5200_v46 = vor.u32 %v5877_v6, %v5199_v52  ;;  %v5184_v3 = vor.u32 %v5873_v59, %v5183_v5  ;;  %v5917_v37 = vld [vmem:[#allocation11 + $0x274] sm:$0xf0]  ;;  %v5895_v60 = vld [vmem:[#allocation11 + $0x1cc] sm:$0xf]  ;;  %v5281_v15 = vld [vmem:[#allocation11 + $0x1d8] sm:$0xf0] }
 0x3be   :  { %v2814_v8 = vsub.f32 %v2806_v51, %v2810_v47  ;;  %v2897_v9 = vperm.slane %v2885_v36, 3  ;;  %3775 = vmatpush.bf16.msra.mxu2 %v5468_v16  ;;  %v5436_v51 = vor.u32 %v5934_v18, %v5433_v31  ;;  %v5297_v36 = vld [vmem:[#allocation11 + $0x1f8] sm:$0xf0]  ;;  %v5327_v11 = vld [vmem:[#allocation11 + $0x228] sm:$0xf] }
 0x3bf   :  { %v5300_v41 = vor.u32 %v5899_v2, %v5297_v36  ;;  %v5073_v29 = vld [vmem:[#allocation11 + $0x38] sm:$0xf0]  ;;  %v5887_v52 = vld [vmem:[#allocation11 + $0x18c] sm:$0xf]  ;;  %v5311_v33 = vld [vmem:[#allocation11 + $0x208] sm:$0xf] }
 0x3c0   :  { %v2818_v38 = vmax.f32 %v2814_v8, 0.0  ;;  %v2901_v23 = vadd.f32 %v2897_v9, %v2893_v22  ;;  %v5851_v8 = vld [vmem:[#allocation11 + $0x6c] sm:$0xf]  ;;  %v5265_v30 = vld [vmem:[#allocation11 + $0x1b8] sm:$0xf0] }
 0x3c1   :  { %3790 = vmatpush.bf16.msra.mxu3 %v5056_v63  ;;  %3799 = vmatpush.bf16.msrb.mxu0 %v5248_v61  ;;  %v5108_v63 = vor.u32 %v5851_v8, %v5105_v1  ;;  %v5359_v61 = vld [vmem:[#allocation11 + $0x268] sm:$0xf]  ;;  %v5847_v22 = vld [vmem:[#allocation11 + $0x4c] sm:$0xf]  ;;  %v5249_v6 = vld [vmem:[#allocation11 + $0x198] sm:$0xf0] }
 0x3c2   :  { %v6718_v58 = vadd.f32 1e-05, %v2818_v38  ;;  %v6721_v21 = vpack.c.bf16 %v2901_v23, %v2901_v23  ;;  %3776 = vmatpush.bf16.msra.mxu2 %v5452_v45  ;;  %v5376_v38 = vor.u32 %v5921_v26, %v5375_v42  ;;  %v5360_v12 = vor.u32 %v5917_v37, %v5359_v61  ;;  %v5343_v23 = vld [vmem:[#allocation11 + $0x248] sm:$0xf]  ;;  %v5909_v45 = vld [vmem:[#allocation11 + $0x234] sm:$0xf0] }
 0x3c3   :  { %v5905_v13 = vld [vmem:[#allocation11 + $0x214] sm:$0xf0]  ;;  %v5551_v17 = vld [vmem:[#allocation11 + $0x3e8] sm:$0xf]  ;;  %v5931_v5 = vld [vmem:[#allocation11 + $0x2ec] sm:$0xf] }
 0x3c4   :  { %6002 = vrsqrt.f32 %v6718_v58  ;;  %3713 = vmatmul.bf16.vlgmr.msrb.gmra.mxu1 %v6721_v21  ;;  %3752 = vmatmul.bf16.vlgmr.msra.gmra.mxu0 %v6700_v25  ;;  %vm2859_vm2 = vweird.f32 %v6718_v58  ;;  %v5425_v59 = vld [vmem:[#allocation11 + $0x2f8] sm:$0xf0]  ;;  %v5312_v26 = vor.u32 %v5905_v13, %v5311_v33  ;;  %v5535_v36 = vld [vmem:[#allocation11 + $0x3c8] sm:$0xf]  ;;  %v5907_v33 = vld [vmem:[#allocation11 + $0x22c] sm:$0xf] }
 0x3c5   :  { %3835 = vmatpush.bf16.msrb.mxu3 %v5172_v56  ;;  %3800 = vmatpush.bf16.msrb.mxu0 %v5232_v39  ;;  %v5089_v56 = vld [vmem:[#allocation11 + $0x58] sm:$0xf0]  ;;  %v5284_v39 = vor.u32 %v5895_v60, %v5281_v15  ;;  %v5428_v2 = vor.u32 %v5931_v5, %v5425_v59  ;;  %v5923_v15 = vld [vmem:[#allocation11 + $0x2ac] sm:$0xf] }
 0x3c6   :  { %3791 = vmatmul.bf16.vlgmr.msra.gmra.mxu3 %v6671_v4  ;;  %3809 = vmatpush.bf16.msrb.mxu1 %v5424_v24  ;;  %v5092_v44 = vor.u32 %v5847_v22, %v5089_v56  ;;  %v5913_v24 = vld [vmem:[#allocation11 + $0x254] sm:$0xf0]  ;;  %v5519_v22 = vld [vmem:[#allocation11 + $0x3a8] sm:$0xf]  ;;  %v5201_v60 = vld [vmem:[#allocation11 + $0x138] sm:$0xf0] }
 0x3c7   :  { %3777 = vmatpush.bf16.msra.mxu2 %v5436_v51  ;;  %v5344_v7 = vor.u32 %v5913_v24, %v5343_v23  ;;  %v5957_v56 = vld [vmem:[#allocation11 + $0x3b4] sm:$0xf0]  ;;  %v5503_v23 = vld [vmem:[#allocation11 + $0x388] sm:$0xf]  ;;  %v5185_v24 = vld [vmem:[#allocation11 + $0x118] sm:$0xf0] }
 0x3c8   :  { %v5329_v13 = vld [vmem:[#allocation11 + $0x238] sm:$0xf0] }
 0x3c9   :  { %3836 = vmatpush.bf16.msrb.mxu3 %v5156_v27  ;;  %3801 = vmatpush.bf16.msrb.mxu0 %v5216_v53  ;;  %v5843_v27 = vld [vmem:[#allocation11 + $0x2c] sm:$0xf]  ;;  %v5553_v5 = vld [vmem:[#allocation11 + $0x3f8] sm:$0xf0] }
 0x3ca   :  { %v6003_v48 = vpop.eup %6002  ;;  %3810 = vmatpush.bf16.msrb.mxu1 %v5408_v43  ;;  %v5076_v28 = vor.u32 %v5843_v27, %v5073_v29  ;;  %v5839_v53 = vld [vmem:[#allocation11 + $0xc] sm:$0xf]  ;;  %v5057_v43 = vld [vmem:[#allocation11 + $0x18] sm:$0xf0] }
 0x3cb   :  { %v2854_v47 = vmul.f32 %v6003_v48, %v6718_v58  ;;  %vm2860_vm1 = vweird.f32 %v6003_v48  ;;  %v5891_v58 = vld [vmem:[#allocation11 + $0x1ac] sm:$0xf]  ;;  %v5377_v29 = vld [vmem:[#allocation11 + $0x298] sm:$0xf0] }
 0x3cc   :  { %vm2861_vm3 = vmor %vm2859_vm2, %vm2860_vm1  ;;  %v5268_v31 = vor.u32 %v5891_v58, %v5265_v30  ;;  %v5919_v27 = vld [vmem:[#allocation11 + $0x28c] sm:$0xf] }
 0x3cd   :  { %v2855_v55 = vmul.f32 %v6003_v48, %v2854_v47  ;;  %3837 = vmatpush.bf16.msrb.mxu3 %v5140_v35  ;;  %3802 = vmatpush.bf16.msrb.mxu0 %v5200_v46  ;;  %v5252_v47 = vor.u32 %v5887_v52, %v5249_v6  ;;  %v5345_v52 = vld [vmem:[#allocation11 + $0x258] sm:$0xf0] }
 0x3ce   :  { %3811 = vmatpush.bf16.msrb.mxu1 %v5392_v57  ;;  %v5883_v57 = vld [vmem:[#allocation11 + $0x16c] sm:$0xf] }
 0x3cf   :  { %v2856_v34 = vmul.f32 0.5, %v2855_v55  ;;  %v5965_v55 = vld [vmem:[#allocation11 + $0x3f4] sm:$0xf0] }
 0x3d0   :  { %v5552_v8 = vor.u32 %v5965_v55, %v5551_v17  ;;  %v5903_v55 = vld [vmem:[#allocation11 + $0x20c] sm:$0xf] }
 0x3d1   :  { %v2857_v14 = vsub.f32 1.5, %v2856_v34  ;;  %3838 = vmatpush.bf16.msrb.mxu3 %v5124_v54  ;;  %3803 = vmatpush.bf16.msrb.mxu0 %v5184_v3  ;;  %v5233_v54 = vld [vmem:[#allocation11 + $0x178] sm:$0xf0]  ;;  %v5879_v3 = vld [vmem:[#allocation11 + $0x14c] sm:$0xf] }
 0x3d2   :  { %3812 = vmatpush.bf16.msrb.mxu1 %v5376_v38  ;;  %v5236_v34 = vor.u32 %v5883_v57, %v5233_v54  ;;  %v5927_v38 = vld [vmem:[#allocation11 + $0x2cc] sm:$0xf]  ;;  %v5313_v57 = vld [vmem:[#allocation11 + $0x218] sm:$0xf0] }
 0x3d3   :  { %v2858_v9 = vmul.f32 %v6003_v48, %v2857_v14  ;;  %v5217_v14 = vld [vmem:[#allocation11 + $0x158] sm:$0xf0]  ;;  %v5963_v54 = vld [vmem:[#allocation11 + $0x3ec] sm:$0xf] }
 0x3d4   :  { %3765 = vmatmul.bf16.vlgmr.msra.gmra.mxu1 %v6721_v21  ;;  %3804 = vmatmul.bf16.vlgmr.msrb.gmra.mxu0 %v6700_v25 }
 0x3d5   :  { %v2862_v16 = vsel %vm2861_vm3, %v6003_v48, %v2858_v9  ;;  %3839 = vmatpush.bf16.msrb.mxu3 %v5108_v63  ;;  %3848 = vmatpush.bf16.msra.mxu0 %v5300_v41  ;;  %v5328_v48 = vor.u32 %v5909_v45, %v5327_v11  ;;  %v5409_v63 = vld [vmem:[#allocation11 + $0x2d8] sm:$0xf0]  ;;  %v5220_v41 = vor.u32 %v5879_v3, %v5217_v14  ;;  %v5875_v9 = vld [vmem:[#allocation11 + $0x12c] sm:$0xf] }
 0x3d6   :  { %v2866_v19 = vmul.f32 %v6728_v62, %v2862_v16  ;;  %3813 = vmatpush.bf16.msrb.mxu1 %v5360_v12  ;;  %v5412_v37 = vor.u32 %v5927_v38, %v5409_v63  ;;  %v5393_v16 = vld [vmem:[#allocation11 + $0x2b8] sm:$0xf0]  ;;  %v5520_v12 = vor.u32 %v5957_v56, %v5519_v22  ;;  %v5915_v11 = vld [vmem:[#allocation11 + $0x26c] sm:$0xf] }
 0x3d7   :  { %v5361_v45 = vld [vmem:[#allocation11 + $0x278] sm:$0xf0]  ;;  %v5951_v3 = vld [vmem:[#allocation11 + $0x38c] sm:$0xf] }
 0x3d8   :  { %v2870_v32 = vmul.f32 %v2866_v19, %v6711_v49  ;;  %v2890_v18 = vperm.slane %v2866_v19, 2  ;;  %v5060_v49 = vor.u32 %v5839_v53, %v5057_v43  ;;  %v5953_v19 = vld [vmem:[#allocation11 + $0x394] sm:$0xf0]  ;;  %v5471_v53 = vld [vmem:[#allocation11 + $0x348] sm:$0xf] }
 0x3d9   :  { %3840 = vmatpush.bf16.msrb.mxu3 %v5092_v44  ;;  %3849 = vmatpush.bf16.msra.mxu0 %v5284_v39  ;;  %v5396_v44 = vor.u32 %v5923_v15, %v5393_v16  ;;  %v5871_v39 = vld [vmem:[#allocation11 + $0x10c] sm:$0xf]  ;;  %v5504_v58 = vor.u32 %v5953_v19, %v5503_v23  ;;  %v5945_v43 = vld [vmem:[#allocation11 + $0x354] sm:$0xf0]  ;;  %v5505_v14 = vld [vmem:[#allocation11 + $0x398] sm:$0xf0] }
 0x3da   :  { %v2878_v35 = vrot.slane %v2870_v32, 7  ;;  %3814 = vmatpush.bf16.msrb.mxu1 %v5344_v7  ;;  %v2894_v51 = vmul.f32 %v2890_v18, %v6683_v20  ;;  %v5961_v20 = vld [vmem:[#allocation11 + $0x3d4] sm:$0xf0]  ;;  %v5188_v30 = vor.u32 %v5871_v39, %v5185_v24  ;;  %v5380_v32 = vor.u32 %v5919_v27, %v5377_v29  ;;  %v5487_v7 = vld [vmem:[#allocation11 + $0x368] sm:$0xf] }
 0x3db   :  { %v5536_v61 = vor.u32 %v5961_v20, %v5535_v36  ;;  %v5472_v6 = vor.u32 %v5945_v43, %v5471_v53  ;;  %v5521_v36 = vld [vmem:[#allocation11 + $0x3b8] sm:$0xf0]  ;;  %v5508_v38 = vor.u32 %v5951_v3, %v5505_v14  ;;  %v5947_v63 = vld [vmem:[#allocation11 + $0x36c] sm:$0xf]  ;;  %v3037_v53 = vperm.slane %v6708_v40, 4 }
 0x3dc   :  { %v2886_v50 = vsub.f32 %v6728_v62, %v2878_v35  ;;  %v5911_v35 = vld [vmem:[#allocation11 + $0x24c] sm:$0xf]  ;;  %v5473_v22 = vld [vmem:[#allocation11 + $0x358] sm:$0xf0] }
 0x3dd   :  { %3841 = vmatpush.bf16.msrb.mxu3 %v5076_v28  ;;  %3850 = vmatpush.bf16.msra.mxu0 %v5268_v31  ;;  %v5949_v28 = vld [vmem:[#allocation11 + $0x374] sm:$0xf0]  ;;  %v5364_v31 = vor.u32 %v5915_v11, %v5361_v45  ;;  %v5935_v16 = vld [vmem:[#allocation11 + $0x30c] sm:$0xf] }
 0x3de   :  { %v2898_v46 = vperm.slane %v2886_v50, 3  ;;  %3815 = vmatpush.bf16.msrb.mxu1 %v5328_v48  ;;  %v5488_v18 = vor.u32 %v5949_v28, %v5487_v7  ;;  %v5348_v50 = vor.u32 %v5911_v35, %v5345_v52  ;;  %v5455_v48 = vld [vmem:[#allocation11 + $0x328] sm:$0xf] }
 0x3e0   :  { %v2902_v42 = vadd.f32 %v2898_v46, %v2894_v51  ;;  %v5332_v51 = vor.u32 %v5907_v33, %v5329_v13  ;;  %v5937_v46 = vld [vmem:[#allocation11 + $0x314] sm:$0xf0] }
 0x3e1   :  { %3842 = vmatpush.bf16.msrb.mxu3 %v5060_v49  ;;  %3851 = vmatpush.bf16.msra.mxu0 %v5252_v47  ;;  %v5941_v49 = vld [vmem:[#allocation11 + $0x334] sm:$0xf0]  ;;  %v5439_v47 = vld [vmem:[#allocation11 + $0x308] sm:$0xf] }
 0x3e2   :  { %v6736_v1 = vpack.c.bf16 %v2902_v42, %v2902_v42  ;;  %3816 = vmatpush.bf16.msrb.mxu1 %v5312_v26  ;;  %v5456_v17 = vor.u32 %v5941_v49, %v5455_v48  ;;  %v5440_v59 = vor.u32 %v5937_v46, %v5439_v47  ;;  %v5556_v42 = vor.u32 %v5963_v54, %v5553_v5  ;;  %v5959_v26 = vld [vmem:[#allocation11 + $0x3cc] sm:$0xf] }
 0x3e4   :  { %3726 = vmatmul.bf16.vlgmr.msrb.gmra.mxu2 %v6736_v1  ;;  %3843 = vmatmul.bf16.vlgmr.msrb.gmra.mxu3 %v6671_v4  ;;  %v5204_v4 = vor.u32 %v5875_v9, %v5201_v60  ;;  %v5939_v9 = vld [vmem:[#allocation11 + $0x32c] sm:$0xf]  ;;  %v5457_v60 = vld [vmem:[#allocation11 + $0x338] sm:$0xf0] }
 0x3e5   :  { %3822 = vmatpush.bf16.msrb.mxu2 %v5552_v8  ;;  %3852 = vmatpush.bf16.msra.mxu0 %v5236_v34  ;;  %v5537_v8 = vld [vmem:[#allocation11 + $0x3d8] sm:$0xf0]  ;;  %v5460_v15 = vor.u32 %v5939_v9, %v5457_v60 }
 0x3e6   :  { %3861 = vmatpush.bf16.msra.mxu1 %v5428_v2  ;;  %v5540_v34 = vor.u32 %v5959_v26, %v5537_v8  ;;  %v5955_v2 = vld [vmem:[#allocation11 + $0x3ac] sm:$0xf] }
 0x3e7   :  { %3817 = vmatmul.bf16.vlgmr.msrb.gmra.mxu1 %v6721_v21  ;;  %v5524_v20 = vor.u32 %v5955_v2, %v5521_v36  ;;  %v3038_v2 = vperm.slane %v6728_v62, 4 }
 0x3e9   :  { %3823 = vmatpush.bf16.msrb.mxu2 %v5536_v61  ;;  %3853 = vmatpush.bf16.msra.mxu0 %v5220_v41  ;;  %v5489_v61 = vld [vmem:[#allocation11 + $0x378] sm:$0xf0] }
 0x3ea   :  { %3862 = vmatpush.bf16.msra.mxu1 %v5412_v37  ;;  %v5492_v41 = vor.u32 %v5947_v63, %v5489_v61  ;;  %v5943_v37 = vld [vmem:[#allocation11 + $0x34c] sm:$0xf] }
 0x3eb   :  { %v5476_v56 = vor.u32 %v5943_v37, %v5473_v22 }
 0x3ed   :  { %3824 = vmatpush.bf16.msrb.mxu2 %v5520_v12  ;;  %3854 = vmatpush.bf16.msra.mxu0 %v5204_v4 }
 0x3ee   :  { %3863 = vmatpush.bf16.msra.mxu1 %v5396_v44  ;;  %v3035_v44 = vperm.slane %v6650_v10, 4 }
 0x3f1   :  { %3825 = vmatpush.bf16.msrb.mxu2 %v5504_v58  ;;  %3855 = vmatpush.bf16.msra.mxu0 %v5188_v30  ;;  %v3036_v58 = vperm.slane %v6680_v0, 4 }
 0x3f2   :  { %3864 = vmatpush.bf16.msra.mxu1 %v5380_v32 }
 0x3f4   :  { %3778 = vmatmul.bf16.vlgmr.msra.gmra.mxu2 %v6736_v1  ;;  %3856 = vmatmul.bf16.vlgmr.msra.gmra.mxu0 %v6700_v25  ;;  %v5316_v25 = vor.u32 %v5903_v55, %v5313_v57 }
 0x3f5   :  { %3826 = vmatpush.bf16.msrb.mxu2 %v5488_v18 }
 0x3f6   :  { %3865 = vmatpush.bf16.msra.mxu1 %v5364_v31 }
 0x3f9   :  { %3827 = vmatpush.bf16.msrb.mxu2 %v5472_v6 }
 0x3fa   :  { %3866 = vmatpush.bf16.msra.mxu1 %v5348_v50 }
 0x3fd   :  { %3828 = vmatpush.bf16.msrb.mxu2 %v5456_v17 }
 0x3fe   :  { %3867 = vmatpush.bf16.msra.mxu1 %v5332_v51 }
 0x401   :  { %3829 = vmatpush.bf16.msrb.mxu2 %v5440_v59 }
 0x402   :  { %3868 = vmatpush.bf16.msra.mxu1 %v5316_v25 }
 0x404   :  { %3830 = vmatmul.bf16.vlgmr.msrb.gmra.mxu2 %v6736_v1 }
 0x405   :  { %3874 = vmatpush.bf16.msra.mxu2 %v5556_v42  ;;  %3869 = vmatmul.bf16.vlgmr.msra.gmra.mxu1 %v6721_v21  ;;  %v5441_v21 = vld [vmem:[#allocation11 + $0x318] sm:$0xf0] }
 0x406   :  { %v5444_v12 = vor.u32 %v5935_v16, %v5441_v21 }
 0x409   :  { %3875 = vmatpush.bf16.msra.mxu2 %v5540_v34 }
 0x40d   :  { %3876 = vmatpush.bf16.msra.mxu2 %v5524_v20 }
 0x411   :  { %3877 = vmatpush.bf16.msra.mxu2 %v5508_v38 }
 0x415   :  { %3878 = vmatpush.bf16.msra.mxu2 %v5492_v41 }
 0x419   :  { %3879 = vmatpush.bf16.msra.mxu2 %v5476_v56 }
 0x41d   :  { %3880 = vmatpush.bf16.msra.mxu2 %v5460_v15 }
 0x421   :  { %3881 = vmatpush.bf16.msra.mxu2 %v5444_v12 }
 0x424   :  { %3882 = vmatmul.bf16.vlgmr.msra.gmra.mxu2 %v6736_v1 }
 0x427   :  { %v3688_v4 = vpop.f32.mrf.mxu3 }
 0x428   :  { %v3689_v19 = vadd.f32 %v3688_v4, %v3035_v44 }
 0x42f   :  { %v3690_v23 = vpop.f32.mrf.mxu3 }
 0x431   :  { %v3701_v39 = vpop.f32.mrf.mxu0 }
 0x432   :  { %v3702_v24 = vadd.f32 %v3701_v39, %v3689_v19 }
 0x437   :  { %v3740_v27 = vpop.f32.mrf.mxu3 }
 0x438   :  { %v3741_v32 = vadd.f32 %v3740_v27, %v3036_v58 }
 0x439   :  { %v3703_v29 = vpop.f32.mrf.mxu0 }
 0x43f   :  { %v3742_v30 = vpop.f32.mrf.mxu3 }
 0x441   :  { %v3714_v7 = vpop.f32.mrf.mxu1  ;;  %v3753_v28 = vpop.f32.mrf.mxu0 }
 0x442   :  { %v3715_v11 = vadd.f32 %v3714_v7, %v3702_v24  ;;  %v3754_v45 = vadd.f32 %v3753_v28, %v3741_v32 }
 0x449   :  { %v3792_v18 = vpop.f32.mrf.mxu3  ;;  %v3716_v31 = vpop.f32.mrf.mxu1 }
 0x44a   :  { %v3755_v1 = vpop.f32.mrf.mxu0  ;;  %v3793_v10 = vadd.f32 %v3792_v18, %v3037_v53 }
 0x451   :  { %v3794_v43 = vpop.f32.mrf.mxu3  ;;  %v3766_v35 = vpop.f32.mrf.mxu1 }
 0x452   :  { %v3805_v52 = vpop.f32.mrf.mxu0  ;;  %v3767_v6 = vadd.f32 %v3766_v35, %v3754_v45 }
 0x453   :  { %v3806_v50 = vadd.f32 %v3805_v52, %v3793_v10 }
 0x459   :  { %v3768_v48 = vpop.f32.mrf.mxu1 }
 0x45a   :  { %v3807_v49 = vpop.f32.mrf.mxu0 }
 0x464   :  { %v3818_v0 = vpop.f32.mrf.mxu1 }
 0x465   :  { %v3819_v20 = vadd.f32 %v3818_v0, %v3806_v50 }
 0x467   :  { %v3727_v33 = vpop.f32.mrf.mxu2  ;;  %v3844_v13 = vpop.f32.mrf.mxu3 }
 0x468   :  { %v3728_v54 = vadd.f32 %v3727_v33, %v3715_v11  ;;  %v3845_v36 = vadd.f32 %v3844_v13, %v3038_v2 }
 0x46c   :  { %v3820_v17 = vpop.f32.mrf.mxu1 }
 0x46f   :  { %v3729_v51 = vpop.f32.mrf.mxu2  ;;  %v3846_v47 = vpop.f32.mrf.mxu3 }
 0x471   :  { %v3857_v46 = vpop.f32.mrf.mxu0 }
 0x472   :  { %v3858_v3 = vadd.f32 %v3857_v46, %v3845_v36 }
 0x477   :  { %v3779_v55 = vpop.f32.mrf.mxu2 }
 0x478   :  { %v3780_v57 = vadd.f32 %v3779_v55, %v3767_v6 }
 0x479   :  { %v3859_v40 = vpop.f32.mrf.mxu0 }
 0x47a   :  { %v3891_v5 = vrot.slane %v3780_v57, 6 }
 0x47c   :  { %v3894_v59 = vsel %vm1586_vm10, %v3728_v54, %v3891_v5  ;;  %vm3897_vm10 = vcmask 1043456  }
 0x47f   :  { %v3781_v25 = vpop.f32.mrf.mxu2 }
 0x482   :  { %v3870_v42 = vpop.f32.mrf.mxu1 }
 0x483   :  { %v3871_v14 = vadd.f32 %v3870_v42, %v3858_v3 }
 0x487   :  { %v3831_v26 = vpop.f32.mrf.mxu2 }
 0x488   :  { %v3832_v38 = vadd.f32 %v3831_v26, %v3819_v20 }
 0x48a   :  { %v3872_v8 = vpop.f32.mrf.mxu1  ;;  %v3892_v41 = vrot.slane %v3832_v38, 4 }
 0x48f   :  { %v3833_v34 = vpop.f32.mrf.mxu2 }
 0x4a7   :  { %v3883_v63 = vpop.f32.mrf.mxu2 }
 0x4a8   :  { %v3884_v61 = vadd.f32 %v3883_v63, %v3871_v14 }
 0x4aa   :  { %v3893_v37 = vrot.slane %v3884_v61, 2 }
 0x4ac   :  { %v3896_v22 = vsel %vm3895_vm4, %v3892_v41, %v3893_v37 }
 0x4ad   :  { %v3898_v62 = vsel %vm3897_vm10, %v3894_v59, %v3896_v22 }
 0x4ae   :  { %3900 = vst [vmem:[#allocation14] sm:$0xff] %v3898_v62 }
 0x4af   :  { %v3885_v56 = vpop.f32.mrf.mxu2  ;;  %3911 = dma.vmem_to_hbm [thread:$0]  %s3907_s20, 128, %s3909_s23, [#allocation4]  }
 0x4b0   :  { %6210 = dma.done.wait [#allocation4], 128  }
 0x4b1   :  { %6211 = vsyncadd [#allocation4], 4294967168 }
 0x4b2   :  { %3916 = vsyncpa [#allocation3], 1 }
 0x4b3   :  { %3917 = vsyncpa [#allocation6], 1 }
 0x4b4   :  { %3918 = vsyncpa [#allocation9], 1 }
 0x4b5   :  { %3919 = vsyncpa [#allocation12], 1 }
 0x4b6   :  { %3920 = vsyncpa [#allocation4], 1 }

</bundles_post_ra>
